<compile_context>
chip_gen: v5e
topology: v5e:2x2
jax: 0.10.0
libtpu: 0.0.40
codegen_flags: <defaults>
</compile_context>

<pallas_src>
import math
import functools

import jax
import jax.numpy as jnp
from jax.experimental import pallas as pl
from jax.experimental.pallas import tpu as pltpu

# ---- model hyperparameters (small, consistent with the module's __init__) ----
BATCH = 2
SEQ = 8
D_MODEL = 32          # hidden_dim
NUM_HEADS = 4
HEAD_DIM = D_MODEL // NUM_HEADS
DIM_FF = 64           # dim_feedforward
NUM_LAYERS = 2
NUM_OUT = 16          # num_output_features
MAX_LEN = 64
LN_EPS = 1e-5
VEC_W = 4 * D_MODEL   # packed 1-row-parameter slab width (=128 here)


# --------------------------- in-kernel helpers ---------------------------

def _layernorm(x, w, b):
    # x: (N, D); w/b: (1, D)
    mu = jnp.mean(x, axis=-1, keepdims=True)
    var = jnp.mean((x - mu) ** 2, axis=-1, keepdims=True)
    return (x - mu) * jax.lax.rsqrt(var + LN_EPS) * w + b


def _mha(q, k, v, w_o, b_o, mask, num_heads, batch, seq):
    """Multi-head attention core on already-projected q/k/v.

    q/k/v: (B*S, D) with heads lane-contiguous (head h = lanes [h*hd:(h+1)*hd]).
    w_o: (D, D) pre-transposed output projection, b_o: (1, D).
    mask: (S, S) additive mask or None.
    """
    n, d = q.shape
    hd = d // num_heads
    inv_sqrt = 1.0 / math.sqrt(hd)

    def split(t):
        # (B*S, H*hd) -> (H*B, S, hd); combined batch index x = h*B + b.
        # Only minor-dim-preserving reshapes + lane slices + major-dim concat.
        t3 = t.reshape(batch, seq, d)
        return jnp.concatenate(
            [t3[:, :, h * hd:(h + 1) * hd] for h in range(num_heads)], axis=0)

    qx, kx, vx = split(q), split(k), split(v)                     # (H*B, S, hd)

    s = jnp.einsum("xqd,xkd->xqk", qx, kx,
                   preferred_element_type=jnp.float32) * inv_sqrt  # (H*B, S, S)
    if mask is not None:
        s = s + mask                                               # broadcast (S,S)
    s = s - jnp.max(s, axis=-1, keepdims=True)
    p = jnp.exp(s)
    p = p / jnp.sum(p, axis=-1, keepdims=True)                     # exact divide (parity)

    o = jnp.einsum("xqk,xkd->xqd", p, vx,
                   preferred_element_type=jnp.float32)             # (H*B, S, hd)
    # reassemble heads lane-contiguously: (B, S, H*hd) -> (B*S, D)
    om = jnp.concatenate(
        [o[h * batch:(h + 1) * batch] for h in range(num_heads)], axis=-1)
    om = om.reshape(n, d)
    # single output-projection matmul: head-sum folded into MXU K dimension
    return jnp.dot(om, w_o, preferred_element_type=jnp.float32) + b_o


# --------------------------- fused kernel ---------------------------

def _fused_decoder_kernel(x_ref, pe_ref, attn_w_ref, ffw_ref, vec_ref, lin_ref, o_ref,
                          *, num_heads, num_layers, batch, seq, d_model, dim_ff, scale):
    d = d_model

    # Causal tgt_mask generated in-kernel (no DMA / VMEM buffer for it).
    rows = jax.lax.broadcasted_iota(jnp.int32, (seq, seq), 0)
    cols = jax.lax.broadcasted_iota(jnp.int32, (seq, seq), 1)
    causal = jnp.where(cols > rows, -1e30, 0.0).astype(jnp.float32)

    # x * sqrt(d_model) + positional encoding (dropout = identity in eval)
    x = x_ref[...] * scale + pe_ref[...]                            # (B*S, D)
    mem = x                                                         # memory = PE'd input (tgt==memory)

    for l in range(num_layers):                                     # static unroll
        aw = attn_w_ref[l]     # (D, 8D): sa_qkv | sa_o | ca_q | ca_kv | ca_o
        vec = vec_ref[l]       # (5, 4D): packed biases + LN params
        fw = ffw_ref[l]        # (D+FF, FF): ff1^T on top, ff2^T (lane-padded) below

        # --- self-attention block (causal mask, post-norm) ---
        qkv = (jnp.dot(x, aw[:, 0:3 * d], preferred_element_type=jnp.float32)
               + vec[0:1, 0:3 * d])                                 # (B*S, 3D) fused q|k|v
        sa = _mha(qkv[:, 0:d], qkv[:, d:2 * d], qkv[:, 2 * d:3 * d],
                  aw[:, 3 * d:4 * d], vec[0:1, 3 * d:4 * d], causal,
                  num_heads, batch, seq)
        x = _layernorm(x + sa, vec[2:3, 0:d], vec[2:3, d:2 * d])

        # --- cross-attention block (memory_mask=None: no mask add) ---
        cq = (jnp.dot(x, aw[:, 4 * d:5 * d], preferred_element_type=jnp.float32)
              + vec[1:2, 0:d])
        ckv = (jnp.dot(mem, aw[:, 5 * d:7 * d], preferred_element_type=jnp.float32)
               + vec[1:2, d:3 * d])                                 # fused k|v
        ca = _mha(cq, ckv[:, 0:d], ckv[:, d:2 * d],
                  aw[:, 7 * d:8 * d], vec[1:2, 3 * d:4 * d], None,
                  num_heads, batch, seq)
        x = _layernorm(x + ca, vec[2:3, 2 * d:3 * d], vec[2:3, 3 * d:4 * d])

        # --- feed-forward block (ReLU) ---
        h = jnp.maximum(
            jnp.dot(x, fw[0:d, :], preferred_element_type=jnp.float32)
            + vec[3:4, 2 * d:2 * d + dim_ff], 0.0)
        ff = (jnp.dot(h, fw[d:d + dim_ff, 0:d], preferred_element_type=jnp.float32)
              + vec[4:5, 0:d])
        x = _layernorm(x + ff, vec[3:4, 0:d], vec[3:4, d:2 * d])

    # final linear head (W^T rows 0:D, bias row D of the packed lin slab)
    lin = lin_ref[...]
    o_ref[...] = jnp.dot(x, lin[0:d, :], preferred_element_type=jnp.float32) + lin[d:d + 1, :]


# --------------------------- wrapper ---------------------------

def transformer_decoder_forward(x, kp):
    B, S, D = x.shape
    F = kp["lin"].shape[-1]

    xf = x.reshape(B * S, D)                                        # flatten batch into sublanes
    args = (xf, kp["pe"], kp["attn_w"], kp["ffw"], kp["vecs"], kp["lin"])

    def full_spec(a):
        nd = a.ndim
        return pl.BlockSpec(a.shape, lambda i, _nd=nd: (0,) * _nd)

    out_f = pl.pallas_call(
        functools.partial(_fused_decoder_kernel,
                          num_heads=NUM_HEADS, num_layers=NUM_LAYERS,
                          batch=B, seq=S, d_model=D, dim_ff=DIM_FF,
                          scale=math.sqrt(D)),
        out_shape=jax.ShapeDtypeStruct((B * S, F), jnp.float32),
        grid=(1,),                                                  # fully fused, single grid point
        in_specs=[full_spec(a) for a in args],
        out_specs=pl.BlockSpec((B * S, F), lambda i: (0, 0)),
        compiler_params=pltpu.CompilerParams(dimension_semantics=("arbitrary",)),
    )(*args)
    return out_f.reshape(B, S, F)


# --------------------------- host-side parameter prep ---------------------------

def make_pe(max_len, d_model):
    position = jnp.arange(max_len, dtype=jnp.float32)[:, None]
    div_term = jnp.exp(jnp.arange(0, d_model, 2, dtype=jnp.float32)
                       * (-math.log(10000.0) / d_model))
    ang = position * div_term
    pe = jnp.zeros((max_len, d_model), jnp.float32)
    pe = pe.at[:, 0::2].set(jnp.sin(ang))
    pe = pe.at[:, 1::2].set(jnp.cos(ang))
    return pe[None]                                                 # (1, max_len, d_model)


def _row(*parts):
    r = jnp.concatenate(parts)
    assert r.shape[0] <= VEC_W
    return jnp.pad(r, (0, VEC_W - r.shape[0]))


def prepare_kernel_params(raw):
    """PyTorch-layout params -> a handful of packed, pre-transposed HBM slabs."""
    D, FF = D_MODEL, DIM_FF
    assert 2 * D + FF <= VEC_W and 4 * D <= VEC_W and FF >= D

    attn_w_layers, ffw_layers, vec_layers = [], [], []
    for lp in raw["layers"]:
        # attention weights: (D, 8D) = sa_qkv^T | sa_o^T | ca_q^T | ca_kv^T | ca_o^T
        attn_w = jnp.concatenate([
            lp["sa_in_w"].T,             # (D, 3D)
            lp["sa_out_w"].T,            # (D, D)
            lp["ca_in_w"][:D].T,         # (D, D)
            lp["ca_in_w"][D:].T,         # (D, 2D)
            lp["ca_out_w"].T,            # (D, D)
        ], axis=1)
        attn_w_layers.append(attn_w)

        # FFN weights: (D+FF, FF) = [ff1^T ; ff2^T lane-padded to FF]
        ff1_wT = lp["ff1_w"].T                                      # (D, FF)
        ff2_wT = jnp.pad(lp["ff2_w"].T, ((0, 0), (0, FF - D)))      # (FF, FF)
        ffw_layers.append(jnp.concatenate([ff1_wT, ff2_wT], axis=0))

        # all 1-row params packed into a (5, VEC_W) slab
        vec_layers.append(jnp.stack([
            _row(lp["sa_in_b"], lp["sa_out_b"]),                    # row 0
            _row(lp["ca_in_b"], lp["ca_out_b"]),                    # row 1
            _row(lp["ln1_w"], lp["ln1_b"], lp["ln2_w"], lp["ln2_b"]),  # row 2
            _row(lp["ln3_w"], lp["ln3_b"], lp["ff1_b"]),            # row 3
            _row(lp["ff2_b"]),                                      # row 4
        ], axis=0))

    # final linear: rows 0:D = W^T, row D = bias, padded to 40 rows
    lin = jnp.zeros((40, NUM_OUT), jnp.float32)
    lin = lin.at[:D].set(raw["lin_w"].T)
    lin = lin.at[D].set(raw["lin_b"])

    pe_flat = jnp.tile(raw["pe"][0, :SEQ, :], (BATCH, 1))           # (B*S, D)

    return {
        "attn_w": jnp.stack(attn_w_layers, 0),                      # (L, 32, 256)
        "ffw":    jnp.stack(ffw_layers, 0),                         # (L, 96, 64)
        "vecs":   jnp.stack(vec_layers, 0),                         # (L, 5, 128)
        "lin":    lin,                                              # (40, 16)
        "pe":     pe_flat,                                          # (16, 32)
    }


def init_params(key):
    """Deterministic parameters in PyTorch layout (W[out,in], 1-D biases)."""
    params = {"pe": make_pe(MAX_LEN, D_MODEL)}
    std = 0.02
    layers = []
    for _ in range(NUM_LAYERS):
        key, *ks = jax.random.split(key, 7)
        lp = {
            "sa_in_w": jax.random.normal(ks[0], (3 * D_MODEL, D_MODEL), jnp.float32) * std,
            "sa_in_b": jnp.zeros((3 * D_MODEL,), jnp.float32),
            "sa_out_w": jax.random.normal(ks[1], (D_MODEL, D_MODEL), jnp.float32) * std,
            "sa_out_b": jnp.zeros((D_MODEL,), jnp.float32),
            "ca_in_w": jax.random.normal(ks[2], (3 * D_MODEL, D_MODEL), jnp.float32) * std,
            "ca_in_b": jnp.zeros((3 * D_MODEL,), jnp.float32),
            "ca_out_w": jax.random.normal(ks[3], (D_MODEL, D_MODEL), jnp.float32) * std,
            "ca_out_b": jnp.zeros((D_MODEL,), jnp.float32),
            "ln1_w": jnp.ones((D_MODEL,), jnp.float32), "ln1_b": jnp.zeros((D_MODEL,), jnp.float32),
            "ln2_w": jnp.ones((D_MODEL,), jnp.float32), "ln2_b": jnp.zeros((D_MODEL,), jnp.float32),
            "ln3_w": jnp.ones((D_MODEL,), jnp.float32), "ln3_b": jnp.zeros((D_MODEL,), jnp.float32),
            "ff1_w": jax.random.normal(ks[4], (DIM_FF, D_MODEL), jnp.float32) * std,
            "ff1_b": jnp.zeros((DIM_FF,), jnp.float32),
            "ff2_w": jax.random.normal(ks[5], (D_MODEL, DIM_FF), jnp.float32) * std,
            "ff2_b": jnp.zeros((D_MODEL,), jnp.float32),
        }
        layers.append(lp)
    params["layers"] = layers
    key, k_lin = jax.random.split(key)
    # matches module.init_weights(): normal(std=0.01) weight, zero bias
    params["lin_w"] = jax.random.normal(k_lin, (NUM_OUT, D_MODEL), jnp.float32) * 0.01
    params["lin_b"] = jnp.zeros((NUM_OUT,), jnp.float32)
    return params


if __name__ == "__main__":
    key = jax.random.PRNGKey(0)
    key, kx = jax.random.split(key)
    raw = init_params(key)
    kparams = prepare_kernel_params(raw)
    x = jax.random.normal(kx, (BATCH, SEQ, D_MODEL), jnp.float32)

    out = transformer_decoder_forward(x, kparams)
    out = jax.block_until_ready(out)

    assert out.shape == (BATCH, SEQ, NUM_OUT), out.shape
    assert bool(jnp.all(jnp.isfinite(out)))
    print("KERNEL_OK")
</pallas_src>

<mosaic_0001>
module attributes {stable_mosaic.version = 11 : i64} {
  func.func @_fused_decoder_kernel(%arg0: i32, %arg1: memref<16x32xf32, #tpu.memory_space<vmem>>, %arg2: memref<16x32xf32, #tpu.memory_space<vmem>>, %arg3: memref<2x32x256xf32, #tpu.memory_space<vmem>>, %arg4: memref<2x96x64xf32, #tpu.memory_space<vmem>>, %arg5: memref<2x5x128xf32, #tpu.memory_space<vmem>>, %arg6: memref<40x16xf32, #tpu.memory_space<vmem>>, %arg7: memref<16x16xf32, #tpu.memory_space<vmem>>) attributes {dimension_semantics = [#tpu.dimension_semantics<arbitrary>], iteration_bounds = array<i64: 1>, scalar_prefetch = 0 : i64, scratch_operands = 0 : i64, tpu.core_type = #tpu.core_type<tc>, window_params = [{pipeline_mode = #tpu.pipeline_mode<synchronous>, transform_indices = @transform_0, window_bounds = array<i64: 16, 32>}, {pipeline_mode = #tpu.pipeline_mode<synchronous>, transform_indices = @transform_1, window_bounds = array<i64: 16, 32>}, {pipeline_mode = #tpu.pipeline_mode<synchronous>, transform_indices = @transform_2, window_bounds = array<i64: 2, 32, 256>}, {pipeline_mode = #tpu.pipeline_mode<synchronous>, transform_indices = @transform_3, window_bounds = array<i64: 2, 96, 64>}, {pipeline_mode = #tpu.pipeline_mode<synchronous>, transform_indices = @transform_4, window_bounds = array<i64: 2, 5, 128>}, {pipeline_mode = #tpu.pipeline_mode<synchronous>, transform_indices = @transform_5, window_bounds = array<i64: 40, 16>}, {pipeline_mode = #tpu.pipeline_mode<synchronous>, transform_indices = @transform_6, window_bounds = array<i64: 16, 16>}]} {
    %0 = tpu.iota {dimensions = array<i32: 0>} : vector<8x8xi32>
    %1 = tpu.iota {dimensions = array<i32: 1>} : vector<8x8xi32>
    %2 = arith.cmpi sgt, %1, %0 : vector<8x8xi32>
    %cst = arith.constant -1.000000e+30 : f32
    %cst_0 = arith.constant 0.000000e+00 : f32
    %3 = vector.broadcast %cst : f32 to vector<8x8xf32>
    %4 = vector.broadcast %cst_0 : f32 to vector<8x8xf32>
    %5 = arith.select %2, %3, %4 : vector<8x8xi1>, vector<8x8xf32>
    %c0 = arith.constant 0 : index
    %c0_1 = arith.constant 0 : index
    %6 = vector.load %arg1[%c0, %c0_1] : memref<16x32xf32, #tpu.memory_space<vmem>>, vector<16x32xf32>
    %cst_2 = arith.constant 5.65685415 : f32
    %7 = vector.broadcast %cst_2 : f32 to vector<16x32xf32>
    %8 = arith.mulf %6, %7 : vector<16x32xf32>
    %c0_3 = arith.constant 0 : index
    %c0_4 = arith.constant 0 : index
    %9 = vector.load %arg2[%c0_3, %c0_4] : memref<16x32xf32, #tpu.memory_space<vmem>>, vector<16x32xf32>
    %10 = arith.addf %8, %9 : vector<16x32xf32>
    %c0_5 = arith.constant 0 : index
    %c0_6 = arith.constant 0 : index
    %c0_7 = arith.constant 0 : index
    %11 = vector.load %arg3[%c0_5, %c0_6, %c0_7] : memref<2x32x256xf32, #tpu.memory_space<vmem>>, vector<1x32x256xf32>
    %12 = vector.shape_cast %11 : vector<1x32x256xf32> to vector<32x256xf32>
    %c0_8 = arith.constant 0 : index
    %c0_9 = arith.constant 0 : index
    %c0_10 = arith.constant 0 : index
    %13 = vector.load %arg5[%c0_8, %c0_9, %c0_10] : memref<2x5x128xf32, #tpu.memory_space<vmem>>, vector<1x5x128xf32>
    %14 = vector.shape_cast %13 : vector<1x5x128xf32> to vector<5x128xf32>
    %c0_11 = arith.constant 0 : index
    %c0_12 = arith.constant 0 : index
    %c0_13 = arith.constant 0 : index
    %15 = vector.load %arg4[%c0_11, %c0_12, %c0_13] : memref<2x96x64xf32, #tpu.memory_space<vmem>>, vector<1x96x64xf32>
    %16 = vector.shape_cast %15 : vector<1x96x64xf32> to vector<96x64xf32>
    %17 = vector.extract_strided_slice %12 {offsets = [0, 0], sizes = [32, 96], strides = [1, 1]} : vector<32x256xf32> to vector<32x96xf32>
    %cst_14 = arith.constant dense<0.000000e+00> : vector<16x96xf32>
    %18 = tpu.matmul %10, %17, %cst_14 {dimension_numbers = #tpu.dot_dimension_numbers<[1], [0], [0], [1], [0, 0, 1, 1], [], []>} : vector<16x32xf32>, vector<32x96xf32>, vector<16x96xf32> -> vector<16x96xf32>
    %19 = vector.extract_strided_slice %14 {offsets = [0, 0], sizes = [1, 96], strides = [1, 1]} : vector<5x128xf32> to vector<1x96xf32>
    %20 = vector.broadcast %19 : vector<1x96xf32> to vector<16x96xf32>
    %21 = arith.addf %18, %20 : vector<16x96xf32>
    %22 = vector.extract_strided_slice %21 {offsets = [0, 0], sizes = [16, 32], strides = [1, 1]} : vector<16x96xf32> to vector<16x32xf32>
    %23 = vector.extract_strided_slice %21 {offsets = [0, 32], sizes = [16, 32], strides = [1, 1]} : vector<16x96xf32> to vector<16x32xf32>
    %24 = vector.extract_strided_slice %21 {offsets = [0, 64], sizes = [16, 32], strides = [1, 1]} : vector<16x96xf32> to vector<16x32xf32>
    %25 = vector.extract_strided_slice %12 {offsets = [0, 96], sizes = [32, 32], strides = [1, 1]} : vector<32x256xf32> to vector<32x32xf32>
    %26 = vector.extract_strided_slice %14 {offsets = [0, 96], sizes = [1, 32], strides = [1, 1]} : vector<5x128xf32> to vector<1x32xf32>
    %27 = vector.shape_cast %22 : vector<16x32xf32> to vector<2x8x32xf32>
    %28 = vector.extract_strided_slice %27 {offsets = [0, 0, 0], sizes = [2, 8, 8], strides = [1, 1, 1]} : vector<2x8x32xf32> to vector<2x8x8xf32>
    %29 = vector.extract_strided_slice %27 {offsets = [0, 0, 8], sizes = [2, 8, 8], strides = [1, 1, 1]} : vector<2x8x32xf32> to vector<2x8x8xf32>
    %30 = vector.extract_strided_slice %27 {offsets = [0, 0, 16], sizes = [2, 8, 8], strides = [1, 1, 1]} : vector<2x8x32xf32> to vector<2x8x8xf32>
    %31 = vector.extract_strided_slice %27 {offsets = [0, 0, 24], sizes = [2, 8, 8], strides = [1, 1, 1]} : vector<2x8x32xf32> to vector<2x8x8xf32>
    %32 = tpu.concatenate %28, %29, %30, %31 in 0 : vector<2x8x8xf32>, vector<2x8x8xf32>, vector<2x8x8xf32>, vector<2x8x8xf32> -> vector<8x8x8xf32>
    %33 = vector.shape_cast %23 : vector<16x32xf32> to vector<2x8x32xf32>
    %34 = vector.extract_strided_slice %33 {offsets = [0, 0, 0], sizes = [2, 8, 8], strides = [1, 1, 1]} : vector<2x8x32xf32> to vector<2x8x8xf32>
    %35 = vector.extract_strided_slice %33 {offsets = [0, 0, 8], sizes = [2, 8, 8], strides = [1, 1, 1]} : vector<2x8x32xf32> to vector<2x8x8xf32>
    %36 = vector.extract_strided_slice %33 {offsets = [0, 0, 16], sizes = [2, 8, 8], strides = [1, 1, 1]} : vector<2x8x32xf32> to vector<2x8x8xf32>
    %37 = vector.extract_strided_slice %33 {offsets = [0, 0, 24], sizes = [2, 8, 8], strides = [1, 1, 1]} : vector<2x8x32xf32> to vector<2x8x8xf32>
    %38 = tpu.concatenate %34, %35, %36, %37 in 0 : vector<2x8x8xf32>, vector<2x8x8xf32>, vector<2x8x8xf32>, vector<2x8x8xf32> -> vector<8x8x8xf32>
    %39 = vector.shape_cast %24 : vector<16x32xf32> to vector<2x8x32xf32>
    %40 = vector.extract_strided_slice %39 {offsets = [0, 0, 0], sizes = [2, 8, 8], strides = [1, 1, 1]} : vector<2x8x32xf32> to vector<2x8x8xf32>
    %41 = vector.extract_strided_slice %39 {offsets = [0, 0, 8], sizes = [2, 8, 8], strides = [1, 1, 1]} : vector<2x8x32xf32> to vector<2x8x8xf32>
    %42 = vector.extract_strided_slice %39 {offsets = [0, 0, 16], sizes = [2, 8, 8], strides = [1, 1, 1]} : vector<2x8x32xf32> to vector<2x8x8xf32>
    %43 = vector.extract_strided_slice %39 {offsets = [0, 0, 24], sizes = [2, 8, 8], strides = [1, 1, 1]} : vector<2x8x32xf32> to vector<2x8x8xf32>
    %44 = tpu.concatenate %40, %41, %42, %43 in 0 : vector<2x8x8xf32>, vector<2x8x8xf32>, vector<2x8x8xf32>, vector<2x8x8xf32> -> vector<8x8x8xf32>
    "tpu.trace_start"() <{level = 10 : i32, message = "xqd,xkd->xqk"}> : () -> ()
    %cst_15 = arith.constant dense<0.000000e+00> : vector<8x8x8xf32>
    %45 = tpu.matmul %32, %38, %cst_15 {dimension_numbers = #tpu.dot_dimension_numbers<[2], [2], [1], [1], [0, 0, 0, 1, 1, 1], [0], [0]>} : vector<8x8x8xf32>, vector<8x8x8xf32>, vector<8x8x8xf32> -> vector<8x8x8xf32>
    "tpu.trace_stop"() : () -> ()
    %cst_16 = arith.constant 0.353553385 : f32
    %46 = vector.broadcast %cst_16 : f32 to vector<8x8x8xf32>
    %47 = arith.mulf %45, %46 : vector<8x8x8xf32>
    %48 = vector.shape_cast %5 : vector<8x8xf32> to vector<1x8x8xf32>
    %49 = vector.broadcast %48 : vector<1x8x8xf32> to vector<8x8x8xf32>
    %50 = arith.addf %47, %49 : vector<8x8x8xf32>
    %cst_17 = arith.constant dense<0xFF800000> : vector<8x8xf32>
    %51 = vector.multi_reduction <maximumf>, %50, %cst_17 [2] : vector<8x8x8xf32> to vector<8x8xf32>
    %52 = vector.shape_cast %51 : vector<8x8xf32> to vector<8x8x1xf32>
    %53 = vector.broadcast %52 : vector<8x8x1xf32> to vector<8x8x8xf32>
    %54 = arith.subf %50, %53 : vector<8x8x8xf32>
    %55 = math.exp %54 : vector<8x8x8xf32>
    %cst_18 = arith.constant dense<0.000000e+00> : vector<8x8xf32>
    %56 = vector.multi_reduction <add>, %55, %cst_18 [2] : vector<8x8x8xf32> to vector<8x8xf32>
    %57 = vector.shape_cast %56 : vector<8x8xf32> to vector<8x8x1xf32>
    %58 = vector.broadcast %57 : vector<8x8x1xf32> to vector<8x8x8xf32>
    %59 = arith.divf %55, %58 : vector<8x8x8xf32>
    "tpu.trace_start"() <{level = 10 : i32, message = "xqk,xkd->xqd"}> : () -> ()
    %cst_19 = arith.constant dense<0.000000e+00> : vector<8x8x8xf32>
    %60 = tpu.matmul %59, %44, %cst_19 {dimension_numbers = #tpu.dot_dimension_numbers<[2], [1], [1], [2], [0, 0, 0, 1, 1, 2], [0], [0]>} : vector<8x8x8xf32>, vector<8x8x8xf32>, vector<8x8x8xf32> -> vector<8x8x8xf32>
    "tpu.trace_stop"() : () -> ()
    %61 = vector.extract_strided_slice %60 {offsets = [0, 0, 0], sizes = [2, 8, 8], strides = [1, 1, 1]} : vector<8x8x8xf32> to vector<2x8x8xf32>
    %62 = vector.extract_strided_slice %60 {offsets = [2, 0, 0], sizes = [2, 8, 8], strides = [1, 1, 1]} : vector<8x8x8xf32> to vector<2x8x8xf32>
    %63 = vector.extract_strided_slice %60 {offsets = [4, 0, 0], sizes = [2, 8, 8], strides = [1, 1, 1]} : vector<8x8x8xf32> to vector<2x8x8xf32>
    %64 = vector.extract_strided_slice %60 {offsets = [6, 0, 0], sizes = [2, 8, 8], strides = [1, 1, 1]} : vector<8x8x8xf32> to vector<2x8x8xf32>
    %65 = tpu.concatenate %61, %62, %63, %64 in 2 : vector<2x8x8xf32>, vector<2x8x8xf32>, vector<2x8x8xf32>, vector<2x8x8xf32> -> vector<2x8x32xf32>
    %66 = vector.shape_cast %65 : vector<2x8x32xf32> to vector<16x32xf32>
    %cst_20 = arith.constant dense<0.000000e+00> : vector<16x32xf32>
    %67 = tpu.matmul %66, %25, %cst_20 {dimension_numbers = #tpu.dot_dimension_numbers<[1], [0], [0], [1], [0, 0, 1, 1], [], []>} : vector<16x32xf32>, vector<32x32xf32>, vector<16x32xf32> -> vector<16x32xf32>
    %68 = vector.broadcast %26 : vector<1x32xf32> to vector<16x32xf32>
    %69 = arith.addf %67, %68 : vector<16x32xf32>
    %70 = arith.addf %10, %69 : vector<16x32xf32>
    %71 = vector.extract_strided_slice %14 {offsets = [2, 0], sizes = [1, 32], strides = [1, 1]} : vector<5x128xf32> to vector<1x32xf32>
    %72 = vector.extract_strided_slice %14 {offsets = [2, 32], sizes = [1, 32], strides = [1, 1]} : vector<5x128xf32> to vector<1x32xf32>
    %cst_21 = arith.constant dense<0.000000e+00> : vector<16xf32>
    %73 = vector.multi_reduction <add>, %70, %cst_21 [1] : vector<16x32xf32> to vector<16xf32>
    %74 = vector.shape_cast %73 : vector<16xf32> to vector<16x1xf32>
    %cst_22 = arith.constant 3.200000e+01 : f32
    %75 = vector.broadcast %cst_22 : f32 to vector<16x1xf32>
    %76 = arith.divf %74, %75 : vector<16x1xf32>
    %77 = vector.broadcast %76 : vector<16x1xf32> to vector<16x32xf32>
    %78 = arith.subf %70, %77 : vector<16x32xf32>
    %79 = arith.mulf %78, %78 : vector<16x32xf32>
    %cst_23 = arith.constant dense<0.000000e+00> : vector<16xf32>
    %80 = vector.multi_reduction <add>, %79, %cst_23 [1] : vector<16x32xf32> to vector<16xf32>
    %81 = vector.shape_cast %80 : vector<16xf32> to vector<16x1xf32>
    %cst_24 = arith.constant 3.200000e+01 : f32
    %82 = vector.broadcast %cst_24 : f32 to vector<16x1xf32>
    %83 = arith.divf %81, %82 : vector<16x1xf32>
    %84 = vector.broadcast %76 : vector<16x1xf32> to vector<16x32xf32>
    %85 = arith.subf %70, %84 : vector<16x32xf32>
    %cst_25 = arith.constant 9.99999974E-6 : f32
    %86 = vector.broadcast %cst_25 : f32 to vector<16x1xf32>
    %87 = arith.addf %83, %86 : vector<16x1xf32>
    %88 = math.rsqrt %87 : vector<16x1xf32>
    %89 = vector.broadcast %88 : vector<16x1xf32> to vector<16x32xf32>
    %90 = arith.mulf %85, %89 : vector<16x32xf32>
    %91 = vector.broadcast %71 : vector<1x32xf32> to vector<16x32xf32>
    %92 = arith.mulf %90, %91 : vector<16x32xf32>
    %93 = vector.broadcast %72 : vector<1x32xf32> to vector<16x32xf32>
    %94 = arith.addf %92, %93 : vector<16x32xf32>
    %95 = vector.extract_strided_slice %12 {offsets = [0, 128], sizes = [32, 32], strides = [1, 1]} : vector<32x256xf32> to vector<32x32xf32>
    %cst_26 = arith.constant dense<0.000000e+00> : vector<16x32xf32>
    %96 = tpu.matmul %94, %95, %cst_26 {dimension_numbers = #tpu.dot_dimension_numbers<[1], [0], [0], [1], [0, 0, 1, 1], [], []>} : vector<16x32xf32>, vector<32x32xf32>, vector<16x32xf32> -> vector<16x32xf32>
    %97 = vector.extract_strided_slice %14 {offsets = [1, 0], sizes = [1, 32], strides = [1, 1]} : vector<5x128xf32> to vector<1x32xf32>
    %98 = vector.broadcast %97 : vector<1x32xf32> to vector<16x32xf32>
    %99 = arith.addf %96, %98 : vector<16x32xf32>
    %100 = vector.extract_strided_slice %12 {offsets = [0, 160], sizes = [32, 64], strides = [1, 1]} : vector<32x256xf32> to vector<32x64xf32>
    %cst_27 = arith.constant dense<0.000000e+00> : vector<16x64xf32>
    %101 = tpu.matmul %10, %100, %cst_27 {dimension_numbers = #tpu.dot_dimension_numbers<[1], [0], [0], [1], [0, 0, 1, 1], [], []>} : vector<16x32xf32>, vector<32x64xf32>, vector<16x64xf32> -> vector<16x64xf32>
    %102 = vector.extract_strided_slice %14 {offsets = [1, 32], sizes = [1, 64], strides = [1, 1]} : vector<5x128xf32> to vector<1x64xf32>
    %103 = vector.broadcast %102 : vector<1x64xf32> to vector<16x64xf32>
    %104 = arith.addf %101, %103 : vector<16x64xf32>
    %105 = vector.extract_strided_slice %104 {offsets = [0, 0], sizes = [16, 32], strides = [1, 1]} : vector<16x64xf32> to vector<16x32xf32>
    %106 = vector.extract_strided_slice %104 {offsets = [0, 32], sizes = [16, 32], strides = [1, 1]} : vector<16x64xf32> to vector<16x32xf32>
    %107 = vector.extract_strided_slice %12 {offsets = [0, 224], sizes = [32, 32], strides = [1, 1]} : vector<32x256xf32> to vector<32x32xf32>
    %108 = vector.extract_strided_slice %14 {offsets = [1, 96], sizes = [1, 32], strides = [1, 1]} : vector<5x128xf32> to vector<1x32xf32>
    %109 = vector.shape_cast %99 : vector<16x32xf32> to vector<2x8x32xf32>
    %110 = vector.extract_strided_slice %109 {offsets = [0, 0, 0], sizes = [2, 8, 8], strides = [1, 1, 1]} : vector<2x8x32xf32> to vector<2x8x8xf32>
    %111 = vector.extract_strided_slice %109 {offsets = [0, 0, 8], sizes = [2, 8, 8], strides = [1, 1, 1]} : vector<2x8x32xf32> to vector<2x8x8xf32>
    %112 = vector.extract_strided_slice %109 {offsets = [0, 0, 16], sizes = [2, 8, 8], strides = [1, 1, 1]} : vector<2x8x32xf32> to vector<2x8x8xf32>
    %113 = vector.extract_strided_slice %109 {offsets = [0, 0, 24], sizes = [2, 8, 8], strides = [1, 1, 1]} : vector<2x8x32xf32> to vector<2x8x8xf32>
    %114 = tpu.concatenate %110, %111, %112, %113 in 0 : vector<2x8x8xf32>, vector<2x8x8xf32>, vector<2x8x8xf32>, vector<2x8x8xf32> -> vector<8x8x8xf32>
    %115 = vector.shape_cast %105 : vector<16x32xf32> to vector<2x8x32xf32>
    %116 = vector.extract_strided_slice %115 {offsets = [0, 0, 0], sizes = [2, 8, 8], strides = [1, 1, 1]} : vector<2x8x32xf32> to vector<2x8x8xf32>
    %117 = vector.extract_strided_slice %115 {offsets = [0, 0, 8], sizes = [2, 8, 8], strides = [1, 1, 1]} : vector<2x8x32xf32> to vector<2x8x8xf32>
    %118 = vector.extract_strided_slice %115 {offsets = [0, 0, 16], sizes = [2, 8, 8], strides = [1, 1, 1]} : vector<2x8x32xf32> to vector<2x8x8xf32>
    %119 = vector.extract_strided_slice %115 {offsets = [0, 0, 24], sizes = [2, 8, 8], strides = [1, 1, 1]} : vector<2x8x32xf32> to vector<2x8x8xf32>
    %120 = tpu.concatenate %116, %117, %118, %119 in 0 : vector<2x8x8xf32>, vector<2x8x8xf32>, vector<2x8x8xf32>, vector<2x8x8xf32> -> vector<8x8x8xf32>
    %121 = vector.shape_cast %106 : vector<16x32xf32> to vector<2x8x32xf32>
    %122 = vector.extract_strided_slice %121 {offsets = [0, 0, 0], sizes = [2, 8, 8], strides = [1, 1, 1]} : vector<2x8x32xf32> to vector<2x8x8xf32>
    %123 = vector.extract_strided_slice %121 {offsets = [0, 0, 8], sizes = [2, 8, 8], strides = [1, 1, 1]} : vector<2x8x32xf32> to vector<2x8x8xf32>
    %124 = vector.extract_strided_slice %121 {offsets = [0, 0, 16], sizes = [2, 8, 8], strides = [1, 1, 1]} : vector<2x8x32xf32> to vector<2x8x8xf32>
    %125 = vector.extract_strided_slice %121 {offsets = [0, 0, 24], sizes = [2, 8, 8], strides = [1, 1, 1]} : vector<2x8x32xf32> to vector<2x8x8xf32>
    %126 = tpu.concatenate %122, %123, %124, %125 in 0 : vector<2x8x8xf32>, vector<2x8x8xf32>, vector<2x8x8xf32>, vector<2x8x8xf32> -> vector<8x8x8xf32>
    "tpu.trace_start"() <{level = 10 : i32, message = "xqd,xkd->xqk"}> : () -> ()
    %cst_28 = arith.constant dense<0.000000e+00> : vector<8x8x8xf32>
    %127 = tpu.matmul %114, %120, %cst_28 {dimension_numbers = #tpu.dot_dimension_numbers<[2], [2], [1], [1], [0, 0, 0, 1, 1, 1], [0], [0]>} : vector<8x8x8xf32>, vector<8x8x8xf32>, vector<8x8x8xf32> -> vector<8x8x8xf32>
    "tpu.trace_stop"() : () -> ()
    %cst_29 = arith.constant 0.353553385 : f32
    %128 = vector.broadcast %cst_29 : f32 to vector<8x8x8xf32>
    %129 = arith.mulf %127, %128 : vector<8x8x8xf32>
    %cst_30 = arith.constant dense<0xFF800000> : vector<8x8xf32>
    %130 = vector.multi_reduction <maximumf>, %129, %cst_30 [2] : vector<8x8x8xf32> to vector<8x8xf32>
    %131 = vector.shape_cast %130 : vector<8x8xf32> to vector<8x8x1xf32>
    %132 = vector.broadcast %131 : vector<8x8x1xf32> to vector<8x8x8xf32>
    %133 = arith.subf %129, %132 : vector<8x8x8xf32>
    %134 = math.exp %133 : vector<8x8x8xf32>
    %cst_31 = arith.constant dense<0.000000e+00> : vector<8x8xf32>
    %135 = vector.multi_reduction <add>, %134, %cst_31 [2] : vector<8x8x8xf32> to vector<8x8xf32>
    %136 = vector.shape_cast %135 : vector<8x8xf32> to vector<8x8x1xf32>
    %137 = vector.broadcast %136 : vector<8x8x1xf32> to vector<8x8x8xf32>
    %138 = arith.divf %134, %137 : vector<8x8x8xf32>
    "tpu.trace_start"() <{level = 10 : i32, message = "xqk,xkd->xqd"}> : () -> ()
    %cst_32 = arith.constant dense<0.000000e+00> : vector<8x8x8xf32>
    %139 = tpu.matmul %138, %126, %cst_32 {dimension_numbers = #tpu.dot_dimension_numbers<[2], [1], [1], [2], [0, 0, 0, 1, 1, 2], [0], [0]>} : vector<8x8x8xf32>, vector<8x8x8xf32>, vector<8x8x8xf32> -> vector<8x8x8xf32>
    "tpu.trace_stop"() : () -> ()
    %140 = vector.extract_strided_slice %139 {offsets = [0, 0, 0], sizes = [2, 8, 8], strides = [1, 1, 1]} : vector<8x8x8xf32> to vector<2x8x8xf32>
    %141 = vector.extract_strided_slice %139 {offsets = [2, 0, 0], sizes = [2, 8, 8], strides = [1, 1, 1]} : vector<8x8x8xf32> to vector<2x8x8xf32>
    %142 = vector.extract_strided_slice %139 {offsets = [4, 0, 0], sizes = [2, 8, 8], strides = [1, 1, 1]} : vector<8x8x8xf32> to vector<2x8x8xf32>
    %143 = vector.extract_strided_slice %139 {offsets = [6, 0, 0], sizes = [2, 8, 8], strides = [1, 1, 1]} : vector<8x8x8xf32> to vector<2x8x8xf32>
    %144 = tpu.concatenate %140, %141, %142, %143 in 2 : vector<2x8x8xf32>, vector<2x8x8xf32>, vector<2x8x8xf32>, vector<2x8x8xf32> -> vector<2x8x32xf32>
    %145 = vector.shape_cast %144 : vector<2x8x32xf32> to vector<16x32xf32>
    %cst_33 = arith.constant dense<0.000000e+00> : vector<16x32xf32>
    %146 = tpu.matmul %145, %107, %cst_33 {dimension_numbers = #tpu.dot_dimension_numbers<[1], [0], [0], [1], [0, 0, 1, 1], [], []>} : vector<16x32xf32>, vector<32x32xf32>, vector<16x32xf32> -> vector<16x32xf32>
    %147 = vector.broadcast %108 : vector<1x32xf32> to vector<16x32xf32>
    %148 = arith.addf %146, %147 : vector<16x32xf32>
    %149 = arith.addf %94, %148 : vector<16x32xf32>
    %150 = vector.extract_strided_slice %14 {offsets = [2, 64], sizes = [1, 32], strides = [1, 1]} : vector<5x128xf32> to vector<1x32xf32>
    %151 = vector.extract_strided_slice %14 {offsets = [2, 96], sizes = [1, 32], strides = [1, 1]} : vector<5x128xf32> to vector<1x32xf32>
    %cst_34 = arith.constant dense<0.000000e+00> : vector<16xf32>
    %152 = vector.multi_reduction <add>, %149, %cst_34 [1] : vector<16x32xf32> to vector<16xf32>
    %153 = vector.shape_cast %152 : vector<16xf32> to vector<16x1xf32>
    %cst_35 = arith.constant 3.200000e+01 : f32
    %154 = vector.broadcast %cst_35 : f32 to vector<16x1xf32>
    %155 = arith.divf %153, %154 : vector<16x1xf32>
    %156 = vector.broadcast %155 : vector<16x1xf32> to vector<16x32xf32>
    %157 = arith.subf %149, %156 : vector<16x32xf32>
    %158 = arith.mulf %157, %157 : vector<16x32xf32>
    %cst_36 = arith.constant dense<0.000000e+00> : vector<16xf32>
    %159 = vector.multi_reduction <add>, %158, %cst_36 [1] : vector<16x32xf32> to vector<16xf32>
    %160 = vector.shape_cast %159 : vector<16xf32> to vector<16x1xf32>
    %cst_37 = arith.constant 3.200000e+01 : f32
    %161 = vector.broadcast %cst_37 : f32 to vector<16x1xf32>
    %162 = arith.divf %160, %161 : vector<16x1xf32>
    %163 = vector.broadcast %155 : vector<16x1xf32> to vector<16x32xf32>
    %164 = arith.subf %149, %163 : vector<16x32xf32>
    %cst_38 = arith.constant 9.99999974E-6 : f32
    %165 = vector.broadcast %cst_38 : f32 to vector<16x1xf32>
    %166 = arith.addf %162, %165 : vector<16x1xf32>
    %167 = math.rsqrt %166 : vector<16x1xf32>
    %168 = vector.broadcast %167 : vector<16x1xf32> to vector<16x32xf32>
    %169 = arith.mulf %164, %168 : vector<16x32xf32>
    %170 = vector.broadcast %150 : vector<1x32xf32> to vector<16x32xf32>
    %171 = arith.mulf %169, %170 : vector<16x32xf32>
    %172 = vector.broadcast %151 : vector<1x32xf32> to vector<16x32xf32>
    %173 = arith.addf %171, %172 : vector<16x32xf32>
    %174 = vector.extract_strided_slice %16 {offsets = [0, 0], sizes = [32, 64], strides = [1, 1]} : vector<96x64xf32> to vector<32x64xf32>
    %cst_39 = arith.constant dense<0.000000e+00> : vector<16x64xf32>
    %175 = tpu.matmul %173, %174, %cst_39 {dimension_numbers = #tpu.dot_dimension_numbers<[1], [0], [0], [1], [0, 0, 1, 1], [], []>} : vector<16x32xf32>, vector<32x64xf32>, vector<16x64xf32> -> vector<16x64xf32>
    %176 = vector.extract_strided_slice %14 {offsets = [3, 64], sizes = [1, 64], strides = [1, 1]} : vector<5x128xf32> to vector<1x64xf32>
    %177 = vector.broadcast %176 : vector<1x64xf32> to vector<16x64xf32>
    %178 = arith.addf %175, %177 : vector<16x64xf32>
    %cst_40 = arith.constant 0.000000e+00 : f32
    %179 = vector.broadcast %cst_40 : f32 to vector<16x64xf32>
    %180 = arith.maximumf %178, %179 : vector<16x64xf32>
    %181 = vector.extract_strided_slice %16 {offsets = [32, 0], sizes = [64, 32], strides = [1, 1]} : vector<96x64xf32> to vector<64x32xf32>
    %cst_41 = arith.constant dense<0.000000e+00> : vector<16x32xf32>
    %182 = tpu.matmul %180, %181, %cst_41 {dimension_numbers = #tpu.dot_dimension_numbers<[1], [0], [0], [1], [0, 0, 1, 1], [], []>} : vector<16x64xf32>, vector<64x32xf32>, vector<16x32xf32> -> vector<16x32xf32>
    %183 = vector.extract_strided_slice %14 {offsets = [4, 0], sizes = [1, 32], strides = [1, 1]} : vector<5x128xf32> to vector<1x32xf32>
    %184 = vector.broadcast %183 : vector<1x32xf32> to vector<16x32xf32>
    %185 = arith.addf %182, %184 : vector<16x32xf32>
    %186 = arith.addf %173, %185 : vector<16x32xf32>
    %187 = vector.extract_strided_slice %14 {offsets = [3, 0], sizes = [1, 32], strides = [1, 1]} : vector<5x128xf32> to vector<1x32xf32>
    %188 = vector.extract_strided_slice %14 {offsets = [3, 32], sizes = [1, 32], strides = [1, 1]} : vector<5x128xf32> to vector<1x32xf32>
    %cst_42 = arith.constant dense<0.000000e+00> : vector<16xf32>
    %189 = vector.multi_reduction <add>, %186, %cst_42 [1] : vector<16x32xf32> to vector<16xf32>
    %190 = vector.shape_cast %189 : vector<16xf32> to vector<16x1xf32>
    %cst_43 = arith.constant 3.200000e+01 : f32
    %191 = vector.broadcast %cst_43 : f32 to vector<16x1xf32>
    %192 = arith.divf %190, %191 : vector<16x1xf32>
    %193 = vector.broadcast %192 : vector<16x1xf32> to vector<16x32xf32>
    %194 = arith.subf %186, %193 : vector<16x32xf32>
    %195 = arith.mulf %194, %194 : vector<16x32xf32>
    %cst_44 = arith.constant dense<0.000000e+00> : vector<16xf32>
    %196 = vector.multi_reduction <add>, %195, %cst_44 [1] : vector<16x32xf32> to vector<16xf32>
    %197 = vector.shape_cast %196 : vector<16xf32> to vector<16x1xf32>
    %cst_45 = arith.constant 3.200000e+01 : f32
    %198 = vector.broadcast %cst_45 : f32 to vector<16x1xf32>
    %199 = arith.divf %197, %198 : vector<16x1xf32>
    %200 = vector.broadcast %192 : vector<16x1xf32> to vector<16x32xf32>
    %201 = arith.subf %186, %200 : vector<16x32xf32>
    %cst_46 = arith.constant 9.99999974E-6 : f32
    %202 = vector.broadcast %cst_46 : f32 to vector<16x1xf32>
    %203 = arith.addf %199, %202 : vector<16x1xf32>
    %204 = math.rsqrt %203 : vector<16x1xf32>
    %205 = vector.broadcast %204 : vector<16x1xf32> to vector<16x32xf32>
    %206 = arith.mulf %201, %205 : vector<16x32xf32>
    %207 = vector.broadcast %187 : vector<1x32xf32> to vector<16x32xf32>
    %208 = arith.mulf %206, %207 : vector<16x32xf32>
    %209 = vector.broadcast %188 : vector<1x32xf32> to vector<16x32xf32>
    %210 = arith.addf %208, %209 : vector<16x32xf32>
    %c1 = arith.constant 1 : index
    %c0_47 = arith.constant 0 : index
    %c0_48 = arith.constant 0 : index
    %211 = vector.load %arg3[%c1, %c0_47, %c0_48] : memref<2x32x256xf32, #tpu.memory_space<vmem>>, vector<1x32x256xf32>
    %212 = vector.shape_cast %211 : vector<1x32x256xf32> to vector<32x256xf32>
    %c1_49 = arith.constant 1 : index
    %c0_50 = arith.constant 0 : index
    %c0_51 = arith.constant 0 : index
    %213 = vector.load %arg5[%c1_49, %c0_50, %c0_51] : memref<2x5x128xf32, #tpu.memory_space<vmem>>, vector<1x5x128xf32>
    %214 = vector.shape_cast %213 : vector<1x5x128xf32> to vector<5x128xf32>
    %c1_52 = arith.constant 1 : index
    %c0_53 = arith.constant 0 : index
    %c0_54 = arith.constant 0 : index
    %215 = vector.load %arg4[%c1_52, %c0_53, %c0_54] : memref<2x96x64xf32, #tpu.memory_space<vmem>>, vector<1x96x64xf32>
    %216 = vector.shape_cast %215 : vector<1x96x64xf32> to vector<96x64xf32>
    %217 = vector.extract_strided_slice %212 {offsets = [0, 0], sizes = [32, 96], strides = [1, 1]} : vector<32x256xf32> to vector<32x96xf32>
    %cst_55 = arith.constant dense<0.000000e+00> : vector<16x96xf32>
    %218 = tpu.matmul %210, %217, %cst_55 {dimension_numbers = #tpu.dot_dimension_numbers<[1], [0], [0], [1], [0, 0, 1, 1], [], []>} : vector<16x32xf32>, vector<32x96xf32>, vector<16x96xf32> -> vector<16x96xf32>
    %219 = vector.extract_strided_slice %214 {offsets = [0, 0], sizes = [1, 96], strides = [1, 1]} : vector<5x128xf32> to vector<1x96xf32>
    %220 = vector.broadcast %219 : vector<1x96xf32> to vector<16x96xf32>
    %221 = arith.addf %218, %220 : vector<16x96xf32>
    %222 = vector.extract_strided_slice %221 {offsets = [0, 0], sizes = [16, 32], strides = [1, 1]} : vector<16x96xf32> to vector<16x32xf32>
    %223 = vector.extract_strided_slice %221 {offsets = [0, 32], sizes = [16, 32], strides = [1, 1]} : vector<16x96xf32> to vector<16x32xf32>
    %224 = vector.extract_strided_slice %221 {offsets = [0, 64], sizes = [16, 32], strides = [1, 1]} : vector<16x96xf32> to vector<16x32xf32>
    %225 = vector.extract_strided_slice %212 {offsets = [0, 96], sizes = [32, 32], strides = [1, 1]} : vector<32x256xf32> to vector<32x32xf32>
    %226 = vector.extract_strided_slice %214 {offsets = [0, 96], sizes = [1, 32], strides = [1, 1]} : vector<5x128xf32> to vector<1x32xf32>
    %227 = vector.shape_cast %222 : vector<16x32xf32> to vector<2x8x32xf32>
    %228 = vector.extract_strided_slice %227 {offsets = [0, 0, 0], sizes = [2, 8, 8], strides = [1, 1, 1]} : vector<2x8x32xf32> to vector<2x8x8xf32>
    %229 = vector.extract_strided_slice %227 {offsets = [0, 0, 8], sizes = [2, 8, 8], strides = [1, 1, 1]} : vector<2x8x32xf32> to vector<2x8x8xf32>
    %230 = vector.extract_strided_slice %227 {offsets = [0, 0, 16], sizes = [2, 8, 8], strides = [1, 1, 1]} : vector<2x8x32xf32> to vector<2x8x8xf32>
    %231 = vector.extract_strided_slice %227 {offsets = [0, 0, 24], sizes = [2, 8, 8], strides = [1, 1, 1]} : vector<2x8x32xf32> to vector<2x8x8xf32>
    %232 = tpu.concatenate %228, %229, %230, %231 in 0 : vector<2x8x8xf32>, vector<2x8x8xf32>, vector<2x8x8xf32>, vector<2x8x8xf32> -> vector<8x8x8xf32>
    %233 = vector.shape_cast %223 : vector<16x32xf32> to vector<2x8x32xf32>
    %234 = vector.extract_strided_slice %233 {offsets = [0, 0, 0], sizes = [2, 8, 8], strides = [1, 1, 1]} : vector<2x8x32xf32> to vector<2x8x8xf32>
    %235 = vector.extract_strided_slice %233 {offsets = [0, 0, 8], sizes = [2, 8, 8], strides = [1, 1, 1]} : vector<2x8x32xf32> to vector<2x8x8xf32>
    %236 = vector.extract_strided_slice %233 {offsets = [0, 0, 16], sizes = [2, 8, 8], strides = [1, 1, 1]} : vector<2x8x32xf32> to vector<2x8x8xf32>
    %237 = vector.extract_strided_slice %233 {offsets = [0, 0, 24], sizes = [2, 8, 8], strides = [1, 1, 1]} : vector<2x8x32xf32> to vector<2x8x8xf32>
    %238 = tpu.concatenate %234, %235, %236, %237 in 0 : vector<2x8x8xf32>, vector<2x8x8xf32>, vector<2x8x8xf32>, vector<2x8x8xf32> -> vector<8x8x8xf32>
    %239 = vector.shape_cast %224 : vector<16x32xf32> to vector<2x8x32xf32>
    %240 = vector.extract_strided_slice %239 {offsets = [0, 0, 0], sizes = [2, 8, 8], strides = [1, 1, 1]} : vector<2x8x32xf32> to vector<2x8x8xf32>
    %241 = vector.extract_strided_slice %239 {offsets = [0, 0, 8], sizes = [2, 8, 8], strides = [1, 1, 1]} : vector<2x8x32xf32> to vector<2x8x8xf32>
    %242 = vector.extract_strided_slice %239 {offsets = [0, 0, 16], sizes = [2, 8, 8], strides = [1, 1, 1]} : vector<2x8x32xf32> to vector<2x8x8xf32>
    %243 = vector.extract_strided_slice %239 {offsets = [0, 0, 24], sizes = [2, 8, 8], strides = [1, 1, 1]} : vector<2x8x32xf32> to vector<2x8x8xf32>
    %244 = tpu.concatenate %240, %241, %242, %243 in 0 : vector<2x8x8xf32>, vector<2x8x8xf32>, vector<2x8x8xf32>, vector<2x8x8xf32> -> vector<8x8x8xf32>
    "tpu.trace_start"() <{level = 10 : i32, message = "xqd,xkd->xqk"}> : () -> ()
    %cst_56 = arith.constant dense<0.000000e+00> : vector<8x8x8xf32>
    %245 = tpu.matmul %232, %238, %cst_56 {dimension_numbers = #tpu.dot_dimension_numbers<[2], [2], [1], [1], [0, 0, 0, 1, 1, 1], [0], [0]>} : vector<8x8x8xf32>, vector<8x8x8xf32>, vector<8x8x8xf32> -> vector<8x8x8xf32>
    "tpu.trace_stop"() : () -> ()
    %cst_57 = arith.constant 0.353553385 : f32
    %246 = vector.broadcast %cst_57 : f32 to vector<8x8x8xf32>
    %247 = arith.mulf %245, %246 : vector<8x8x8xf32>
    %248 = vector.shape_cast %5 : vector<8x8xf32> to vector<1x8x8xf32>
    %249 = vector.broadcast %248 : vector<1x8x8xf32> to vector<8x8x8xf32>
    %250 = arith.addf %247, %249 : vector<8x8x8xf32>
    %cst_58 = arith.constant dense<0xFF800000> : vector<8x8xf32>
    %251 = vector.multi_reduction <maximumf>, %250, %cst_58 [2] : vector<8x8x8xf32> to vector<8x8xf32>
    %252 = vector.shape_cast %251 : vector<8x8xf32> to vector<8x8x1xf32>
    %253 = vector.broadcast %252 : vector<8x8x1xf32> to vector<8x8x8xf32>
    %254 = arith.subf %250, %253 : vector<8x8x8xf32>
    %255 = math.exp %254 : vector<8x8x8xf32>
    %cst_59 = arith.constant dense<0.000000e+00> : vector<8x8xf32>
    %256 = vector.multi_reduction <add>, %255, %cst_59 [2] : vector<8x8x8xf32> to vector<8x8xf32>
    %257 = vector.shape_cast %256 : vector<8x8xf32> to vector<8x8x1xf32>
    %258 = vector.broadcast %257 : vector<8x8x1xf32> to vector<8x8x8xf32>
    %259 = arith.divf %255, %258 : vector<8x8x8xf32>
    "tpu.trace_start"() <{level = 10 : i32, message = "xqk,xkd->xqd"}> : () -> ()
    %cst_60 = arith.constant dense<0.000000e+00> : vector<8x8x8xf32>
    %260 = tpu.matmul %259, %244, %cst_60 {dimension_numbers = #tpu.dot_dimension_numbers<[2], [1], [1], [2], [0, 0, 0, 1, 1, 2], [0], [0]>} : vector<8x8x8xf32>, vector<8x8x8xf32>, vector<8x8x8xf32> -> vector<8x8x8xf32>
    "tpu.trace_stop"() : () -> ()
    %261 = vector.extract_strided_slice %260 {offsets = [0, 0, 0], sizes = [2, 8, 8], strides = [1, 1, 1]} : vector<8x8x8xf32> to vector<2x8x8xf32>
    %262 = vector.extract_strided_slice %260 {offsets = [2, 0, 0], sizes = [2, 8, 8], strides = [1, 1, 1]} : vector<8x8x8xf32> to vector<2x8x8xf32>
    %263 = vector.extract_strided_slice %260 {offsets = [4, 0, 0], sizes = [2, 8, 8], strides = [1, 1, 1]} : vector<8x8x8xf32> to vector<2x8x8xf32>
    %264 = vector.extract_strided_slice %260 {offsets = [6, 0, 0], sizes = [2, 8, 8], strides = [1, 1, 1]} : vector<8x8x8xf32> to vector<2x8x8xf32>
    %265 = tpu.concatenate %261, %262, %263, %264 in 2 : vector<2x8x8xf32>, vector<2x8x8xf32>, vector<2x8x8xf32>, vector<2x8x8xf32> -> vector<2x8x32xf32>
    %266 = vector.shape_cast %265 : vector<2x8x32xf32> to vector<16x32xf32>
    %cst_61 = arith.constant dense<0.000000e+00> : vector<16x32xf32>
    %267 = tpu.matmul %266, %225, %cst_61 {dimension_numbers = #tpu.dot_dimension_numbers<[1], [0], [0], [1], [0, 0, 1, 1], [], []>} : vector<16x32xf32>, vector<32x32xf32>, vector<16x32xf32> -> vector<16x32xf32>
    %268 = vector.broadcast %226 : vector<1x32xf32> to vector<16x32xf32>
    %269 = arith.addf %267, %268 : vector<16x32xf32>
    %270 = arith.addf %210, %269 : vector<16x32xf32>
    %271 = vector.extract_strided_slice %214 {offsets = [2, 0], sizes = [1, 32], strides = [1, 1]} : vector<5x128xf32> to vector<1x32xf32>
    %272 = vector.extract_strided_slice %214 {offsets = [2, 32], sizes = [1, 32], strides = [1, 1]} : vector<5x128xf32> to vector<1x32xf32>
    %cst_62 = arith.constant dense<0.000000e+00> : vector<16xf32>
    %273 = vector.multi_reduction <add>, %270, %cst_62 [1] : vector<16x32xf32> to vector<16xf32>
    %274 = vector.shape_cast %273 : vector<16xf32> to vector<16x1xf32>
    %cst_63 = arith.constant 3.200000e+01 : f32
    %275 = vector.broadcast %cst_63 : f32 to vector<16x1xf32>
    %276 = arith.divf %274, %275 : vector<16x1xf32>
    %277 = vector.broadcast %276 : vector<16x1xf32> to vector<16x32xf32>
    %278 = arith.subf %270, %277 : vector<16x32xf32>
    %279 = arith.mulf %278, %278 : vector<16x32xf32>
    %cst_64 = arith.constant dense<0.000000e+00> : vector<16xf32>
    %280 = vector.multi_reduction <add>, %279, %cst_64 [1] : vector<16x32xf32> to vector<16xf32>
    %281 = vector.shape_cast %280 : vector<16xf32> to vector<16x1xf32>
    %cst_65 = arith.constant 3.200000e+01 : f32
    %282 = vector.broadcast %cst_65 : f32 to vector<16x1xf32>
    %283 = arith.divf %281, %282 : vector<16x1xf32>
    %284 = vector.broadcast %276 : vector<16x1xf32> to vector<16x32xf32>
    %285 = arith.subf %270, %284 : vector<16x32xf32>
    %cst_66 = arith.constant 9.99999974E-6 : f32
    %286 = vector.broadcast %cst_66 : f32 to vector<16x1xf32>
    %287 = arith.addf %283, %286 : vector<16x1xf32>
    %288 = math.rsqrt %287 : vector<16x1xf32>
    %289 = vector.broadcast %288 : vector<16x1xf32> to vector<16x32xf32>
    %290 = arith.mulf %285, %289 : vector<16x32xf32>
    %291 = vector.broadcast %271 : vector<1x32xf32> to vector<16x32xf32>
    %292 = arith.mulf %290, %291 : vector<16x32xf32>
    %293 = vector.broadcast %272 : vector<1x32xf32> to vector<16x32xf32>
    %294 = arith.addf %292, %293 : vector<16x32xf32>
    %295 = vector.extract_strided_slice %212 {offsets = [0, 128], sizes = [32, 32], strides = [1, 1]} : vector<32x256xf32> to vector<32x32xf32>
    %cst_67 = arith.constant dense<0.000000e+00> : vector<16x32xf32>
    %296 = tpu.matmul %294, %295, %cst_67 {dimension_numbers = #tpu.dot_dimension_numbers<[1], [0], [0], [1], [0, 0, 1, 1], [], []>} : vector<16x32xf32>, vector<32x32xf32>, vector<16x32xf32> -> vector<16x32xf32>
    %297 = vector.extract_strided_slice %214 {offsets = [1, 0], sizes = [1, 32], strides = [1, 1]} : vector<5x128xf32> to vector<1x32xf32>
    %298 = vector.broadcast %297 : vector<1x32xf32> to vector<16x32xf32>
    %299 = arith.addf %296, %298 : vector<16x32xf32>
    %300 = vector.extract_strided_slice %212 {offsets = [0, 160], sizes = [32, 64], strides = [1, 1]} : vector<32x256xf32> to vector<32x64xf32>
    %cst_68 = arith.constant dense<0.000000e+00> : vector<16x64xf32>
    %301 = tpu.matmul %10, %300, %cst_68 {dimension_numbers = #tpu.dot_dimension_numbers<[1], [0], [0], [1], [0, 0, 1, 1], [], []>} : vector<16x32xf32>, vector<32x64xf32>, vector<16x64xf32> -> vector<16x64xf32>
    %302 = vector.extract_strided_slice %214 {offsets = [1, 32], sizes = [1, 64], strides = [1, 1]} : vector<5x128xf32> to vector<1x64xf32>
    %303 = vector.broadcast %302 : vector<1x64xf32> to vector<16x64xf32>
    %304 = arith.addf %301, %303 : vector<16x64xf32>
    %305 = vector.extract_strided_slice %304 {offsets = [0, 0], sizes = [16, 32], strides = [1, 1]} : vector<16x64xf32> to vector<16x32xf32>
    %306 = vector.extract_strided_slice %304 {offsets = [0, 32], sizes = [16, 32], strides = [1, 1]} : vector<16x64xf32> to vector<16x32xf32>
    %307 = vector.extract_strided_slice %212 {offsets = [0, 224], sizes = [32, 32], strides = [1, 1]} : vector<32x256xf32> to vector<32x32xf32>
    %308 = vector.extract_strided_slice %214 {offsets = [1, 96], sizes = [1, 32], strides = [1, 1]} : vector<5x128xf32> to vector<1x32xf32>
    %309 = vector.shape_cast %299 : vector<16x32xf32> to vector<2x8x32xf32>
    %310 = vector.extract_strided_slice %309 {offsets = [0, 0, 0], sizes = [2, 8, 8], strides = [1, 1, 1]} : vector<2x8x32xf32> to vector<2x8x8xf32>
    %311 = vector.extract_strided_slice %309 {offsets = [0, 0, 8], sizes = [2, 8, 8], strides = [1, 1, 1]} : vector<2x8x32xf32> to vector<2x8x8xf32>
    %312 = vector.extract_strided_slice %309 {offsets = [0, 0, 16], sizes = [2, 8, 8], strides = [1, 1, 1]} : vector<2x8x32xf32> to vector<2x8x8xf32>
    %313 = vector.extract_strided_slice %309 {offsets = [0, 0, 24], sizes = [2, 8, 8], strides = [1, 1, 1]} : vector<2x8x32xf32> to vector<2x8x8xf32>
    %314 = tpu.concatenate %310, %311, %312, %313 in 0 : vector<2x8x8xf32>, vector<2x8x8xf32>, vector<2x8x8xf32>, vector<2x8x8xf32> -> vector<8x8x8xf32>
    %315 = vector.shape_cast %305 : vector<16x32xf32> to vector<2x8x32xf32>
    %316 = vector.extract_strided_slice %315 {offsets = [0, 0, 0], sizes = [2, 8, 8], strides = [1, 1, 1]} : vector<2x8x32xf32> to vector<2x8x8xf32>
    %317 = vector.extract_strided_slice %315 {offsets = [0, 0, 8], sizes = [2, 8, 8], strides = [1, 1, 1]} : vector<2x8x32xf32> to vector<2x8x8xf32>
    %318 = vector.extract_strided_slice %315 {offsets = [0, 0, 16], sizes = [2, 8, 8], strides = [1, 1, 1]} : vector<2x8x32xf32> to vector<2x8x8xf32>
    %319 = vector.extract_strided_slice %315 {offsets = [0, 0, 24], sizes = [2, 8, 8], strides = [1, 1, 1]} : vector<2x8x32xf32> to vector<2x8x8xf32>
    %320 = tpu.concatenate %316, %317, %318, %319 in 0 : vector<2x8x8xf32>, vector<2x8x8xf32>, vector<2x8x8xf32>, vector<2x8x8xf32> -> vector<8x8x8xf32>
    %321 = vector.shape_cast %306 : vector<16x32xf32> to vector<2x8x32xf32>
    %322 = vector.extract_strided_slice %321 {offsets = [0, 0, 0], sizes = [2, 8, 8], strides = [1, 1, 1]} : vector<2x8x32xf32> to vector<2x8x8xf32>
    %323 = vector.extract_strided_slice %321 {offsets = [0, 0, 8], sizes = [2, 8, 8], strides = [1, 1, 1]} : vector<2x8x32xf32> to vector<2x8x8xf32>
    %324 = vector.extract_strided_slice %321 {offsets = [0, 0, 16], sizes = [2, 8, 8], strides = [1, 1, 1]} : vector<2x8x32xf32> to vector<2x8x8xf32>
    %325 = vector.extract_strided_slice %321 {offsets = [0, 0, 24], sizes = [2, 8, 8], strides = [1, 1, 1]} : vector<2x8x32xf32> to vector<2x8x8xf32>
    %326 = tpu.concatenate %322, %323, %324, %325 in 0 : vector<2x8x8xf32>, vector<2x8x8xf32>, vector<2x8x8xf32>, vector<2x8x8xf32> -> vector<8x8x8xf32>
    "tpu.trace_start"() <{level = 10 : i32, message = "xqd,xkd->xqk"}> : () -> ()
    %cst_69 = arith.constant dense<0.000000e+00> : vector<8x8x8xf32>
    %327 = tpu.matmul %314, %320, %cst_69 {dimension_numbers = #tpu.dot_dimension_numbers<[2], [2], [1], [1], [0, 0, 0, 1, 1, 1], [0], [0]>} : vector<8x8x8xf32>, vector<8x8x8xf32>, vector<8x8x8xf32> -> vector<8x8x8xf32>
    "tpu.trace_stop"() : () -> ()
    %cst_70 = arith.constant 0.353553385 : f32
    %328 = vector.broadcast %cst_70 : f32 to vector<8x8x8xf32>
    %329 = arith.mulf %327, %328 : vector<8x8x8xf32>
    %cst_71 = arith.constant dense<0xFF800000> : vector<8x8xf32>
    %330 = vector.multi_reduction <maximumf>, %329, %cst_71 [2] : vector<8x8x8xf32> to vector<8x8xf32>
    %331 = vector.shape_cast %330 : vector<8x8xf32> to vector<8x8x1xf32>
    %332 = vector.broadcast %331 : vector<8x8x1xf32> to vector<8x8x8xf32>
    %333 = arith.subf %329, %332 : vector<8x8x8xf32>
    %334 = math.exp %333 : vector<8x8x8xf32>
    %cst_72 = arith.constant dense<0.000000e+00> : vector<8x8xf32>
    %335 = vector.multi_reduction <add>, %334, %cst_72 [2] : vector<8x8x8xf32> to vector<8x8xf32>
    %336 = vector.shape_cast %335 : vector<8x8xf32> to vector<8x8x1xf32>
    %337 = vector.broadcast %336 : vector<8x8x1xf32> to vector<8x8x8xf32>
    %338 = arith.divf %334, %337 : vector<8x8x8xf32>
    "tpu.trace_start"() <{level = 10 : i32, message = "xqk,xkd->xqd"}> : () -> ()
    %cst_73 = arith.constant dense<0.000000e+00> : vector<8x8x8xf32>
    %339 = tpu.matmul %338, %326, %cst_73 {dimension_numbers = #tpu.dot_dimension_numbers<[2], [1], [1], [2], [0, 0, 0, 1, 1, 2], [0], [0]>} : vector<8x8x8xf32>, vector<8x8x8xf32>, vector<8x8x8xf32> -> vector<8x8x8xf32>
    "tpu.trace_stop"() : () -> ()
    %340 = vector.extract_strided_slice %339 {offsets = [0, 0, 0], sizes = [2, 8, 8], strides = [1, 1, 1]} : vector<8x8x8xf32> to vector<2x8x8xf32>
    %341 = vector.extract_strided_slice %339 {offsets = [2, 0, 0], sizes = [2, 8, 8], strides = [1, 1, 1]} : vector<8x8x8xf32> to vector<2x8x8xf32>
    %342 = vector.extract_strided_slice %339 {offsets = [4, 0, 0], sizes = [2, 8, 8], strides = [1, 1, 1]} : vector<8x8x8xf32> to vector<2x8x8xf32>
    %343 = vector.extract_strided_slice %339 {offsets = [6, 0, 0], sizes = [2, 8, 8], strides = [1, 1, 1]} : vector<8x8x8xf32> to vector<2x8x8xf32>
    %344 = tpu.concatenate %340, %341, %342, %343 in 2 : vector<2x8x8xf32>, vector<2x8x8xf32>, vector<2x8x8xf32>, vector<2x8x8xf32> -> vector<2x8x32xf32>
    %345 = vector.shape_cast %344 : vector<2x8x32xf32> to vector<16x32xf32>
    %cst_74 = arith.constant dense<0.000000e+00> : vector<16x32xf32>
    %346 = tpu.matmul %345, %307, %cst_74 {dimension_numbers = #tpu.dot_dimension_numbers<[1], [0], [0], [1], [0, 0, 1, 1], [], []>} : vector<16x32xf32>, vector<32x32xf32>, vector<16x32xf32> -> vector<16x32xf32>
    %347 = vector.broadcast %308 : vector<1x32xf32> to vector<16x32xf32>
    %348 = arith.addf %346, %347 : vector<16x32xf32>
    %349 = arith.addf %294, %348 : vector<16x32xf32>
    %350 = vector.extract_strided_slice %214 {offsets = [2, 64], sizes = [1, 32], strides = [1, 1]} : vector<5x128xf32> to vector<1x32xf32>
    %351 = vector.extract_strided_slice %214 {offsets = [2, 96], sizes = [1, 32], strides = [1, 1]} : vector<5x128xf32> to vector<1x32xf32>
    %cst_75 = arith.constant dense<0.000000e+00> : vector<16xf32>
    %352 = vector.multi_reduction <add>, %349, %cst_75 [1] : vector<16x32xf32> to vector<16xf32>
    %353 = vector.shape_cast %352 : vector<16xf32> to vector<16x1xf32>
    %cst_76 = arith.constant 3.200000e+01 : f32
    %354 = vector.broadcast %cst_76 : f32 to vector<16x1xf32>
    %355 = arith.divf %353, %354 : vector<16x1xf32>
    %356 = vector.broadcast %355 : vector<16x1xf32> to vector<16x32xf32>
    %357 = arith.subf %349, %356 : vector<16x32xf32>
    %358 = arith.mulf %357, %357 : vector<16x32xf32>
    %cst_77 = arith.constant dense<0.000000e+00> : vector<16xf32>
    %359 = vector.multi_reduction <add>, %358, %cst_77 [1] : vector<16x32xf32> to vector<16xf32>
    %360 = vector.shape_cast %359 : vector<16xf32> to vector<16x1xf32>
    %cst_78 = arith.constant 3.200000e+01 : f32
    %361 = vector.broadcast %cst_78 : f32 to vector<16x1xf32>
    %362 = arith.divf %360, %361 : vector<16x1xf32>
    %363 = vector.broadcast %355 : vector<16x1xf32> to vector<16x32xf32>
    %364 = arith.subf %349, %363 : vector<16x32xf32>
    %cst_79 = arith.constant 9.99999974E-6 : f32
    %365 = vector.broadcast %cst_79 : f32 to vector<16x1xf32>
    %366 = arith.addf %362, %365 : vector<16x1xf32>
    %367 = math.rsqrt %366 : vector<16x1xf32>
    %368 = vector.broadcast %367 : vector<16x1xf32> to vector<16x32xf32>
    %369 = arith.mulf %364, %368 : vector<16x32xf32>
    %370 = vector.broadcast %350 : vector<1x32xf32> to vector<16x32xf32>
    %371 = arith.mulf %369, %370 : vector<16x32xf32>
    %372 = vector.broadcast %351 : vector<1x32xf32> to vector<16x32xf32>
    %373 = arith.addf %371, %372 : vector<16x32xf32>
    %374 = vector.extract_strided_slice %216 {offsets = [0, 0], sizes = [32, 64], strides = [1, 1]} : vector<96x64xf32> to vector<32x64xf32>
    %cst_80 = arith.constant dense<0.000000e+00> : vector<16x64xf32>
    %375 = tpu.matmul %373, %374, %cst_80 {dimension_numbers = #tpu.dot_dimension_numbers<[1], [0], [0], [1], [0, 0, 1, 1], [], []>} : vector<16x32xf32>, vector<32x64xf32>, vector<16x64xf32> -> vector<16x64xf32>
    %376 = vector.extract_strided_slice %214 {offsets = [3, 64], sizes = [1, 64], strides = [1, 1]} : vector<5x128xf32> to vector<1x64xf32>
    %377 = vector.broadcast %376 : vector<1x64xf32> to vector<16x64xf32>
    %378 = arith.addf %375, %377 : vector<16x64xf32>
    %cst_81 = arith.constant 0.000000e+00 : f32
    %379 = vector.broadcast %cst_81 : f32 to vector<16x64xf32>
    %380 = arith.maximumf %378, %379 : vector<16x64xf32>
    %381 = vector.extract_strided_slice %216 {offsets = [32, 0], sizes = [64, 32], strides = [1, 1]} : vector<96x64xf32> to vector<64x32xf32>
    %cst_82 = arith.constant dense<0.000000e+00> : vector<16x32xf32>
    %382 = tpu.matmul %380, %381, %cst_82 {dimension_numbers = #tpu.dot_dimension_numbers<[1], [0], [0], [1], [0, 0, 1, 1], [], []>} : vector<16x64xf32>, vector<64x32xf32>, vector<16x32xf32> -> vector<16x32xf32>
    %383 = vector.extract_strided_slice %214 {offsets = [4, 0], sizes = [1, 32], strides = [1, 1]} : vector<5x128xf32> to vector<1x32xf32>
    %384 = vector.broadcast %383 : vector<1x32xf32> to vector<16x32xf32>
    %385 = arith.addf %382, %384 : vector<16x32xf32>
    %386 = arith.addf %373, %385 : vector<16x32xf32>
    %387 = vector.extract_strided_slice %214 {offsets = [3, 0], sizes = [1, 32], strides = [1, 1]} : vector<5x128xf32> to vector<1x32xf32>
    %388 = vector.extract_strided_slice %214 {offsets = [3, 32], sizes = [1, 32], strides = [1, 1]} : vector<5x128xf32> to vector<1x32xf32>
    %cst_83 = arith.constant dense<0.000000e+00> : vector<16xf32>
    %389 = vector.multi_reduction <add>, %386, %cst_83 [1] : vector<16x32xf32> to vector<16xf32>
    %390 = vector.shape_cast %389 : vector<16xf32> to vector<16x1xf32>
    %cst_84 = arith.constant 3.200000e+01 : f32
    %391 = vector.broadcast %cst_84 : f32 to vector<16x1xf32>
    %392 = arith.divf %390, %391 : vector<16x1xf32>
    %393 = vector.broadcast %392 : vector<16x1xf32> to vector<16x32xf32>
    %394 = arith.subf %386, %393 : vector<16x32xf32>
    %395 = arith.mulf %394, %394 : vector<16x32xf32>
    %cst_85 = arith.constant dense<0.000000e+00> : vector<16xf32>
    %396 = vector.multi_reduction <add>, %395, %cst_85 [1] : vector<16x32xf32> to vector<16xf32>
    %397 = vector.shape_cast %396 : vector<16xf32> to vector<16x1xf32>
    %cst_86 = arith.constant 3.200000e+01 : f32
    %398 = vector.broadcast %cst_86 : f32 to vector<16x1xf32>
    %399 = arith.divf %397, %398 : vector<16x1xf32>
    %400 = vector.broadcast %392 : vector<16x1xf32> to vector<16x32xf32>
    %401 = arith.subf %386, %400 : vector<16x32xf32>
    %cst_87 = arith.constant 9.99999974E-6 : f32
    %402 = vector.broadcast %cst_87 : f32 to vector<16x1xf32>
    %403 = arith.addf %399, %402 : vector<16x1xf32>
    %404 = math.rsqrt %403 : vector<16x1xf32>
    %405 = vector.broadcast %404 : vector<16x1xf32> to vector<16x32xf32>
    %406 = arith.mulf %401, %405 : vector<16x32xf32>
    %407 = vector.broadcast %387 : vector<1x32xf32> to vector<16x32xf32>
    %408 = arith.mulf %406, %407 : vector<16x32xf32>
    %409 = vector.broadcast %388 : vector<1x32xf32> to vector<16x32xf32>
    %410 = arith.addf %408, %409 : vector<16x32xf32>
    %c0_88 = arith.constant 0 : index
    %c0_89 = arith.constant 0 : index
    %411 = vector.load %arg6[%c0_88, %c0_89] : memref<40x16xf32, #tpu.memory_space<vmem>>, vector<40x16xf32>
    %412 = vector.extract_strided_slice %411 {offsets = [0, 0], sizes = [32, 16], strides = [1, 1]} : vector<40x16xf32> to vector<32x16xf32>
    %cst_90 = arith.constant dense<0.000000e+00> : vector<16x16xf32>
    %413 = tpu.matmul %410, %412, %cst_90 {dimension_numbers = #tpu.dot_dimension_numbers<[1], [0], [0], [1], [0, 0, 1, 1], [], []>} : vector<16x32xf32>, vector<32x16xf32>, vector<16x16xf32> -> vector<16x16xf32>
    %414 = vector.extract_strided_slice %411 {offsets = [32, 0], sizes = [1, 16], strides = [1, 1]} : vector<40x16xf32> to vector<1x16xf32>
    %415 = vector.broadcast %414 : vector<1x16xf32> to vector<16x16xf32>
    %416 = arith.addf %413, %415 : vector<16x16xf32>
    %c0_91 = arith.constant 0 : index
    %c0_92 = arith.constant 0 : index
    %417 = vector.load %arg7[%c0_91, %c0_92] : memref<16x16xf32, #tpu.memory_space<vmem>>, vector<16x16xf32>
    tpu.vector_store %arg7[%c0_91, %c0_92], %416 {strides = array<i32>} : memref<16x16xf32, #tpu.memory_space<vmem>>, vector<16x16xf32>,
    return
  }
  func.func @transform_0(%arg0: i32) -> (i32, i32) {
    %c0_i32 = arith.constant 0 : i32
    %c0_i32_0 = arith.constant 0 : i32
    %c0_i32_1 = arith.constant 0 : i32
    return %c0_i32, %c0_i32_0 : i32, i32
  }
  func.func @transform_1(%arg0: i32) -> (i32, i32) {
    %c0_i32 = arith.constant 0 : i32
    %c0_i32_0 = arith.constant 0 : i32
    %c0_i32_1 = arith.constant 0 : i32
    return %c0_i32, %c0_i32_0 : i32, i32
  }
  func.func @transform_2(%arg0: i32) -> (i32, i32, i32) {
    %c0_i32 = arith.constant 0 : i32
    %c0_i32_0 = arith.constant 0 : i32
    %c0_i32_1 = arith.constant 0 : i32
    %c0_i32_2 = arith.constant 0 : i32
    return %c0_i32, %c0_i32_0, %c0_i32_1 : i32, i32, i32
  }
  func.func @transform_3(%arg0: i32) -> (i32, i32, i32) {
    %c0_i32 = arith.constant 0 : i32
    %c0_i32_0 = arith.constant 0 : i32
    %c0_i32_1 = arith.constant 0 : i32
    %c0_i32_2 = arith.constant 0 : i32
    return %c0_i32, %c0_i32_0, %c0_i32_1 : i32, i32, i32
  }
  func.func @transform_4(%arg0: i32) -> (i32, i32, i32) {
    %c0_i32 = arith.constant 0 : i32
    %c0_i32_0 = arith.constant 0 : i32
    %c0_i32_1 = arith.constant 0 : i32
    %c0_i32_2 = arith.constant 0 : i32
    return %c0_i32, %c0_i32_0, %c0_i32_1 : i32, i32, i32
  }
  func.func @transform_5(%arg0: i32) -> (i32, i32) {
    %c0_i32 = arith.constant 0 : i32
    %c0_i32_0 = arith.constant 0 : i32
    %c0_i32_1 = arith.constant 0 : i32
    return %c0_i32, %c0_i32_0 : i32, i32
  }
  func.func @transform_6(%arg0: i32) -> (i32, i32) {
    %c0_i32 = arith.constant 0 : i32
    %c0_i32_0 = arith.constant 0 : i32
    %c0_i32_1 = arith.constant 0 : i32
    return %c0_i32, %c0_i32_0 : i32, i32
  }
}

</mosaic_0001>

<bundles_post_ra>
// kernel: tpu_custom_call.1
= control target key start
LH: loop header
LB: loop body
LE: loop exit
PB: predicated region body
PF: predicated region fallthrough
CT: control target
= control target key end

     0   :  { %s5347_s0 = inlined_call_operand.vmem [shape: f32[16,32], index: 0, kind: input, shape index: {}]   ;;  %s5348_s1 = inlined_call_operand.vmem [shape: f32[16,32], index: 1, kind: input, shape index: {}]   ;;  %s5349_s2 = inlined_call_operand.vmem [shape: f32[2,32,256], index: 2, kind: input, shape index: {}]   ;;  %s5350_s3 = inlined_call_operand.vmem [shape: f32[2,96,64], index: 3, kind: input, shape index: {}]   ;;  %s5351_s4 = inlined_call_operand.vmem [shape: f32[2,5,128], index: 4, kind: input, shape index: {}]   ;;  %s5352_s5 = inlined_call_operand.vmem [shape: f32[40,16], index: 5, kind: input, shape index: {}]   ;;  %s5353_s6 = inlined_call_operand.hbm [shape: f32[16,16], index: 6, kind: output, shape index: {}]  }
   0x1   :  { %v4162_v0 = vld [vmem:[%s5349_s2 + $0x30] sm:$0xff]  ;;  %v4167_v1 = vld [vmem:[%s5349_s2 + $0x20] sm:$0xff] }
   0x2   :  { %v4172_v2 = vld [vmem:[%s5349_s2 + $0x10] sm:$0xff]  ;;  %79 = vmatpush.msra.mxu0 %v4162_v0  ;;  %v3824_v3 = vpack.i.bf16 %v4167_v1, %v4162_v0  ;;  %v4180_v4 = vld [vmem:[%s5349_s2] sm:$0xff] }
   0x3   :  { %v30_v5 = vld [vmem:[%s5347_s0] sm:$0xff]  ;;  %v3829_v7 = vpack.i.bf16 %v4180_v4, %v4172_v2 }
   0x4   :  { %v34_v6 = vld [vmem:[%s5348_s1] sm:$0xff]  ;;  %v32_v8 = vmul.f32 5.656854, %v30_v5  ;;  %80 = vmatpush.msra.mxu0 %v4167_v1 }
   0x5   :  { %11 = vsyncpa [#allocation3], 0  ;;  %vm60_vm0 = vcmask 261120   ;;  %v31_v10 = vld [vmem:[%s5347_s0 + $0x8] sm:$0xff]  ;;  %v4210_v14 = vld [vmem:[%s5351_s4] sm:$0x1f]  ;;  %v24_v33 = vlaneseq }
   0x6   :  { %v4191_v9 = vadd.f32 %v34_v6, %v32_v8  ;;  %81 = vmatpush.msra.mxu0 %v4172_v2  ;;  %v33_v11 = vmul.f32 5.656854, %v31_v10  ;;  %v35_v12 = vld [vmem:[%s5348_s1 + $0x8] sm:$0xff]  ;;  %v4213_v15 = vperm.slane %v4210_v14, 0  ;;  %s4111_s0 = smov 120   ;;  %s4112_s1 = smov 104  }
   0x7   :  { %s4113_s15 = smov 112   ;;  %s4114_s16 = smov 96   ;;  %vm106_vm1 = vcmask 64512   ;;  %v25_v35 = vshrl.u32 %v24_v33, 7  ;;  %v27_v36 = vand.u32 127, %v24_v33  ;;  %v4115_v38 = vmov 0.0  }
   0x8   :  { %82 = vmatpush.msra.mxu0 %v4180_v4  ;;  %v4203_v13 = vadd.f32 %v35_v12, %v33_v11  ;;  %s4116_s17 = smov 64   ;;  %s4117_s18 = smov 32  }
   0x9   :  { %3654 = vmatmul.msk.f32.vlgmr.msra.gmra.mxu0 %vm60_vm0, %v4191_v9  ;;  %vm28_vm2 = vcmp.gt.s32.totalorder %v27_v36, %v25_v35  ;;  %s4118_s19 = smov 16   ;;  %s4119_s20 = smov 8  }
   0xa   :  { %v4285_v39 = vsel %vm28_vm2, -1e+30, %v4115_v38  ;;  %s4120_s21 = smov 24   ;;  %s3642_s26 = sshll.u32 %s5353_s6, 4  ;;  %s3643_s26 = int_to_ptr.hbm [resolvable:$true] %s3642_s26 }
   0xb   :  { %s4122_s27 = smov [#allocation2]   ;;  %s4123_s29 = smov 128  }
   0xc   :  { %s3640_s28 = sshll.u32 %s4122_s27, 4  ;;  %s3641_s28 = int_to_ptr.vmem [resolvable:$true] %s3640_s28 }
  0x11   :  { %3655 = vmatmul.msk.f32.gmra.mxu0 %vm60_vm0, %v4203_v13 }
  0x86   :  { %v84_v16 = vpop.f32.mrf.mxu0 }
  0x87   :  { %v4216_v17 = vadd.f32 %v84_v16, %v4213_v15 }
  0x89   :  { %92 = vrot.lane.b32.xlu0 %v4216_v17, %s4111_s0 }
  0x8e   :  { %v87_v18 = vpop.f32.mrf.mxu0 }
  0x8f   :  { %v4221_v19 = vadd.f32 %v87_v18, %v4213_v15 }
  0x91   :  { %102 = vrot.lane.b32.xlu2 %v4221_v19, %s4112_s1  ;;  %94 = vrot.lane.b32.xlu1 %v4221_v19, %s4111_s0 }
  0x92   :  { %96 = vrot.lane.b32.xlu0 %v4216_v17, %s4113_s15 }
  0x99   :  { %98 = vrot.lane.b32.xlu2 %v4221_v19, %s4113_s15  ;;  %100 = vrot.lane.b32.xlu1 %v4216_v17, %s4112_s1 }
  0x9a   :  { %104 = vrot.lane.b32.xlu0 %v4216_v17, %s4114_s16 }
  0xeb   :  { %v4247_v23 = vpop.permute.xlu2 %102 }
  0xf3   :  { %v4260_v26 = vpop.permute.xlu2 %98 }
  0xfb   :  { %v4235_v20 = vpop.permute.xlu0 %92 }
  0xfc   :  { %157 = vrot.lane.b32.xlu1 %v4235_v20, %s4114_s16 }
 0x103   :  { %v4239_v21 = vpop.permute.xlu1 %94 }
 0x104   :  { %v4241_v22 = vpop.permute.xlu0 %96  ;;  %183 = vrot.lane.b32.xlu0 %v4239_v21, %s4114_s16 }
 0x105   :  { %209 = vrot.lane.b32.xlu2 %v4241_v22, %s4114_s16 }
 0x10b   :  { %v4249_v24 = vpop.permute.xlu1 %100 }
 0x10c   :  { %v105_v25 = vpop.permute.xlu0 %104  ;;  %131 = vrot.lane.b32.xlu0 %v4221_v19, %s4114_s16  ;;  %261 = vrot.lane.b32.xlu1 %v4249_v24, %s4114_s16 }
 0x10d   :  { %287 = vrot.lane.b32.xlu2 %v4247_v23, %s4114_s16  ;;  %3656 = vmatpush.xpose.msk.msra.mxu1 %vm106_vm1, %v105_v25 }
 0x110   :  { %3657 = vmatmul.msk.f32.vlgmr.msra.gmra.mxu1 %vm106_vm1, %v4216_v17 }
 0x114   :  { %235 = vrot.lane.b32.xlu1 %v4260_v26, %s4114_s16 }
 0x15f   :  { %v210_v27 = vpop.permute.xlu2 %209 }
 0x160   :  { %3664 = vmatpush.xpose.msk.msra.mxu2 %vm106_vm1, %v210_v27 }
 0x163   :  { %3665 = vmatmul.msk.f32.vlgmr.msra.gmra.mxu2 %vm106_vm1, %v4241_v22 }
 0x167   :  { %v288_v28 = vpop.permute.xlu2 %287 }
 0x168   :  { %3670 = vmatpush.xpose.msk.msrb.mxu2 %vm106_vm1, %v288_v28 }
 0x16b   :  { %3671 = vmatmul.msk.f32.vlgmr.msrb.gmra.mxu2 %vm106_vm1, %v4247_v23 }
 0x16e   :  { %v158_v29 = vpop.permute.xlu1 %157 }
 0x16f   :  { %3660 = vmatpush.xpose.msk.msra.mxu3 %vm106_vm1, %v158_v29 }
 0x172   :  { %3661 = vmatmul.msk.f32.vlgmr.msra.gmra.mxu3 %vm106_vm1, %v4235_v20 }
 0x176   :  { %v184_v30 = vpop.permute.xlu0 %183 }
 0x177   :  { %3662 = vmatpush.xpose.msk.msrb.mxu1 %vm106_vm1, %v184_v30  ;;  %v3819_v30 = vpack.i.bf16 %v4249_v24, %v4241_v22 }
 0x17a   :  { %3663 = vmatmul.msk.f32.vlgmr.msrb.gmra.mxu1 %vm106_vm1, %v4239_v21 }
 0x17e   :  { %v262_v31 = vpop.permute.xlu1 %261  ;;  %v132_v32 = vpop.permute.xlu0 %131 }
 0x17f   :  { %3658 = vmatpush.xpose.msk.msrb.mxu0 %vm106_vm1, %v132_v32  ;;  %3668 = vmatpush.xpose.msk.msra.mxu1 %vm106_vm1, %v262_v31  ;;  %v3814_v31 = vpack.i.bf16 %v4235_v20, %v4216_v17 }
 0x182   :  { %3659 = vmatmul.msk.f32.vlgmr.msrb.gmra.mxu0 %vm106_vm1, %v4221_v19  ;;  %3669 = vmatmul.msk.f32.vlgmr.msra.gmra.mxu1 %vm106_vm1, %v4249_v24 }
 0x186   :  { %v236_v34 = vpop.permute.xlu1 %235 }
 0x187   :  { %3666 = vmatpush.xpose.msk.msrb.mxu3 %vm106_vm1, %v236_v34 }
 0x18a   :  { %3667 = vmatmul.msk.f32.vlgmr.msrb.gmra.mxu3 %vm106_vm1, %v4260_v26 }
 0x18d   :  { %v128_v37 = vpop.f32.mrf.mxu1 }
 0x18e   :  { %v313_v40 = vmul.f32 0.35355338, %v128_v37 }
 0x190   :  { %v321_v41 = vadd.f32 %v313_v40, %v4285_v39 }
 0x192   :  { %v329_v42 = vsel %vm106_vm1, %v321_v41, -inf }
 0x193   :  { %330 = vmax.xlane.f32.xlu2 %v329_v42 }
 0x1e6   :  { %v232_v43 = vpop.f32.mrf.mxu2 }
 0x1e7   :  { %v317_v44 = vmul.f32 0.35355338, %v232_v43 }
 0x1e9   :  { %v325_v45 = vadd.f32 %v317_v44, %v4285_v39 }
 0x1eb   :  { %v341_v46 = vsel %vm106_vm1, %v325_v45, -inf }
 0x1ec   :  { %342 = vmax.xlane.f32.xlu1 %v341_v46 }
 0x1ee   :  { %v310_v47 = vpop.f32.mrf.mxu2 }
 0x1ef   :  { %v320_v48 = vmul.f32 0.35355338, %v310_v47 }
 0x1f1   :  { %v4292_v49 = vadd.f32 %v320_v48, %v4285_v39 }
 0x1f3   :  { %v350_v50 = vsel %vm106_vm1, %v4292_v49, -inf }
 0x1f4   :  { %351 = vmax.xlane.f32.xlu1 %v350_v50 }
 0x1f5   :  { %v180_v57 = vpop.f32.mrf.mxu3 }
 0x1f6   :  { %v315_v59 = vmul.f32 0.35355338, %v180_v57 }
 0x1f7   :  { %v206_v51 = vpop.f32.mrf.mxu1 }
 0x1f8   :  { %v316_v52 = vmul.f32 0.35355338, %v206_v51  ;;  %v323_v63 = vadd.f32 %v315_v59, %v4285_v39 }
 0x1fa   :  { %v324_v53 = vadd.f32 %v316_v52, %v4285_v39  ;;  %v335_v6 = vsel %vm106_vm1, %v323_v63, -inf }
 0x1fc   :  { %v338_v54 = vsel %vm106_vm1, %v324_v53, -inf }
 0x1fd   :  { %339 = vmax.xlane.f32.xlu2 %v338_v54 }
 0x1ff   :  { %v154_v55 = vpop.f32.mrf.mxu0  ;;  %v284_v11 = vpop.f32.mrf.mxu1 }
 0x200   :  { %v314_v56 = vmul.f32 0.35355338, %v154_v55  ;;  %v319_v18 = vmul.f32 0.35355338, %v284_v11 }
 0x202   :  { %v322_v58 = vadd.f32 %v314_v56, %v4285_v39  ;;  %v327_v28 = vadd.f32 %v319_v18, %v4285_v39 }
 0x204   :  { %v332_v60 = vsel %vm106_vm1, %v322_v58, -inf  ;;  %v347_v29 = vsel %vm106_vm1, %v327_v28, -inf }
 0x205   :  { %333 = vmax.xlane.f32.xlu0 %v332_v60 }
 0x206   :  { %v331_v61 = vpop.xlane.xlu2 %330 }
 0x207   :  { %v353_v62 = vsub.f32 %v321_v41, %v331_v61 }
 0x209   :  { %v361_v5 = vmul.f32 1.442695, %v353_v62 }
 0x20b   :  { %3929 = vpow2.f32 %v361_v5 }
 0x20d   :  { %v258_v8 = vpop.f32.mrf.mxu3  ;;  %336 = vmax.xlane.f32.xlu0 %v335_v6 }
 0x20e   :  { %v318_v10 = vmul.f32 0.35355338, %v258_v8 }
 0x210   :  { %v4303_v12 = vadd.f32 %v318_v10, %v4285_v39 }
 0x211   :  { %v4305_v16 = vpop.eup %3929 }
 0x212   :  { %v344_v25 = vsel %vm106_vm1, %v4303_v12, -inf  ;;  %v377_v27 = vsel %vm106_vm1, %v4305_v16, 0.0 }
 0x213   :  { %345 = vmax.xlane.f32.xlu2 %v344_v25 }
 0x215   :  { %378 = vadd.xlane.f32.xlu0 %v377_v27 }
 0x21b   :  { %348 = vmax.xlane.f32.xlu2 %v347_v29 }
 0x229   :  { %3820 = vrot.lane.b32.xlu0 %v3819_v30, %s4116_s17 }
 0x233   :  { %3815 = vrot.lane.b32.xlu2 %v3814_v31, %s4116_s17 }
 0x25f   :  { %v343_v32 = vpop.xlane.xlu1 %342 }
 0x260   :  { %v357_v33 = vsub.f32 %v325_v45, %v343_v32 }
 0x262   :  { %v369_v34 = vmul.f32 1.442695, %v357_v33 }
 0x264   :  { %3931 = vpow2.f32 %v369_v34 }
 0x267   :  { %v352_v45 = vpop.xlane.xlu1 %351 }
 0x268   :  { %v360_v48 = vsub.f32 %v4292_v49, %v352_v45 }
 0x26a   :  { %v4319_v35 = vpop.eup %3931  ;;  %v375_v51 = vmul.f32 1.442695, %v360_v48 }
 0x26b   :  { %v389_v36 = vsel %vm106_vm1, %v4319_v35, 0.0 }
 0x26c   :  { %390 = vadd.xlane.f32.xlu2 %v389_v36 }
 0x270   :  { %v340_v38 = vpop.xlane.xlu2 %339 }
 0x271   :  { %v356_v20 = vsub.f32 %v324_v53, %v340_v38 }
 0x273   :  { %v367_v46 = vmul.f32 1.442695, %v356_v20 }
 0x278   :  { %v334_v37 = vpop.xlane.xlu0 %333 }
 0x279   :  { %v354_v22 = vsub.f32 %v322_v58, %v334_v37 }
 0x27b   :  { %v363_v24 = vmul.f32 1.442695, %v354_v22 }
 0x27d   :  { %3933 = vpow2.f32 %v363_v24 }
 0x280   :  { %v337_v40 = vpop.xlane.xlu0 %336 }
 0x281   :  { %v355_v41 = vsub.f32 %v323_v63, %v337_v40 }
 0x283   :  { %v4323_v17 = vpop.eup %3933  ;;  %v365_v42 = vmul.f32 1.442695, %v355_v41 }
 0x284   :  { %547 = vrot.lane.b32.xlu2 %v4221_v19, %s4116_s17  ;;  %v380_v43 = vsel %vm106_vm1, %v4323_v17, 0.0 }
 0x285   :  { %3935 = vpow2.f32 %v365_v42  ;;  %381 = vadd.xlane.f32.xlu0 %v380_v43 }
 0x286   :  { %v346_v44 = vpop.xlane.xlu2 %345 }
 0x287   :  { %v358_v58 = vsub.f32 %v4303_v12, %v346_v44 }
 0x288   :  { %v379_v47 = vpop.xlane.xlu0 %378 }
 0x289   :  { %3937 = vrcp.f32 %v379_v47  ;;  %v412_v59 = vand.u32 2147483648, %v379_v47  ;;  %vm406_vm4 = vweird.f32 %v379_v47  ;;  %v371_v5 = vmul.f32 1.442695, %v358_v58 }
 0x28a   :  { %3939 = vpow2.f32 %v367_v46 }
 0x28b   :  { %v4330_v50 = vpop.eup %3935  ;;  %3941 = vpow2.f32 %v375_v51  ;;  %v413_v6 = vor.u32 1.1754944e-38, %v412_v59 }
 0x28c   :  { %651 = vrot.lane.b32.xlu2 %v4260_v26, %s4116_s17  ;;  %v383_v19 = vsel %vm106_vm1, %v4330_v50, 0.0  ;;  %v410_v26 = vand.u32 2147483647, %v379_v47 }
 0x28d   :  { %384 = vadd.xlane.f32.xlu1 %v383_v19 }
 0x28e   :  { %v349_v52 = vpop.xlane.xlu2 %348  ;;  %vm411_vm6 = vcmp.eq.f32.partialorder %v410_v26, 8.507059e+37 }
 0x28f   :  { %v3938_v53 = vpop.eup %3937  ;;  %v359_v54 = vsub.f32 %v327_v28, %v349_v52 }
 0x290   :  { %v402_v55 = vmul.f32 %v3938_v53, %v379_v47  ;;  %v4336_v56 = vpop.eup %3939  ;;  %vm407_vm3 = vweird.f32 %v3938_v53 }
 0x291   :  { %v373_v57 = vmul.f32 1.442695, %v359_v54  ;;  %v386_v61 = vsel %vm106_vm1, %v4336_v56, 0.0  ;;  %vm408_vm5 = vmor %vm406_vm4, %vm407_vm3  ;;  %v4341_v11 = vpop.eup %3941 }
 0x292   :  { %v403_v49 = vsub.f32 1.0, %v402_v55  ;;  %v398_v32 = vsel %vm106_vm1, %v4341_v11, 0.0 }
 0x293   :  { %3943 = vpow2.f32 %v373_v57 }
 0x294   :  { %v404_v60 = vmul.f32 %v3938_v53, %v403_v49  ;;  %3945 = vpow2.f32 %v371_v5 }
 0x295   :  { %387 = vadd.xlane.f32.xlu1 %v386_v61 }
 0x296   :  { %v405_v62 = vadd.f32 %v3938_v53, %v404_v60  ;;  %v3816_v63 = vpop.permute.xlu2 %3815 }
 0x297   :  { %v3818_v8 = vunpack.i.h.bf16 %v3816_v63  ;;  %v3817_v10 = vunpack.i.l.bf16 %v3816_v63 }
 0x298   :  { %v409_v12 = vsel %vm408_vm5, %v3938_v53, %v405_v62 }
 0x299   :  { %v4343_v18 = vpop.eup %3943  ;;  %542 = vmatpush.msra.mxu3 %v3817_v10  ;;  %594 = vmatpush.msrb.mxu1 %v3818_v8  ;;  %v414_v25 = vsel %vm411_vm6, %v413_v6, %v409_v12 }
 0x29a   :  { %v395_v27 = vsel %vm106_vm1, %v4343_v18, 0.0  ;;  %v415_v28 = vmul.f32 %v4305_v16, %v414_v25  ;;  %v4351_v33 = vpop.eup %3945 }
 0x29b   :  { %v3821_v29 = vpop.permute.xlu0 %3820  ;;  %396 = vadd.xlane.f32.xlu0 %v395_v27  ;;  %v392_v34 = vsel %vm106_vm1, %v4351_v33, 0.0 }
 0x29c   :  { %v3823_v30 = vunpack.i.h.bf16 %v3821_v29  ;;  %v3822_v31 = vunpack.i.l.bf16 %v3821_v29  ;;  %3672 = vmatmul.msk.f32.vlgmr.msra.gmra.mxu3 %vm106_vm1, %v415_v28 }
 0x29d   :  { %399 = vadd.xlane.f32.xlu1 %v398_v32 }
 0x29e   :  { %646 = vmatpush.msrb.mxu3 %v3822_v31  ;;  %698 = vmatpush.msra.mxu1 %v3823_v30 }
 0x2a5   :  { %393 = vadd.xlane.f32.xlu1 %v392_v34 }
 0x2af   :  { %703 = vrot.lane.b32.xlu0 %v4247_v23, %s4116_s17 }
 0x2b7   :  { %3825 = vrot.lane.b32.xlu0 %v3824_v3, %s4117_s18 }
 0x2be   :  { %599 = vrot.lane.b32.xlu1 %v4239_v21, %s4116_s17 }
 0x2c6   :  { %3830 = vrot.lane.b32.xlu1 %v3829_v7, %s4117_s18 }
 0x2df   :  { %v391_v16 = vpop.xlane.xlu2 %390 }
 0x2e0   :  { %3947 = vrcp.f32 %v391_v16  ;;  %v472_v24 = vand.u32 2147483648, %v391_v16  ;;  %v470_v0 = vand.u32 2147483647, %v391_v16  ;;  %vm466_vm8 = vweird.f32 %v391_v16 }
 0x2e2   :  { %v473_v3 = vor.u32 1.1754944e-38, %v472_v24  ;;  %vm471_vm10 = vcmp.eq.f32.partialorder %v470_v0, 8.507059e+37 }
 0x2e6   :  { %v3948_v36 = vpop.eup %3947 }
 0x2e7   :  { %v462_v37 = vmul.f32 %v3948_v36, %v391_v16  ;;  %v548_v22 = vpop.permute.xlu2 %547  ;;  %vm467_vm7 = vweird.f32 %v3948_v36 }
 0x2e8   :  { %568 = vmatpush.msra.mxu0 %v548_v22  ;;  %vm468_vm9 = vmor %vm466_vm8, %vm467_vm7 }
 0x2e9   :  { %v463_v23 = vsub.f32 1.0, %v462_v37 }
 0x2eb   :  { %v464_v38 = vmul.f32 %v3948_v36, %v463_v23 }
 0x2ed   :  { %v465_v1 = vadd.f32 %v3948_v36, %v464_v38 }
 0x2ef   :  { %v469_v21 = vsel %vm468_vm9, %v3948_v36, %v465_v1  ;;  %v652_v40 = vpop.permute.xlu2 %651 }
 0x2f0   :  { %672 = vmatpush.msrb.mxu0 %v652_v40  ;;  %v474_v2 = vsel %vm471_vm10, %v473_v3, %v469_v21 }
 0x2f1   :  { %v475_v4 = vmul.f32 %v4319_v35, %v474_v2 }
 0x2f3   :  { %3676 = vmatmul.msk.f32.vlgmr.msrb.gmra.mxu3 %vm106_vm1, %v475_v4 }
 0x2f8   :  { %v382_v7 = vpop.xlane.xlu0 %381 }
 0x2f9   :  { %3949 = vrcp.f32 %v382_v7  ;;  %v427_v45 = vand.u32 2147483648, %v382_v7  ;;  %v425_v46 = vand.u32 2147483647, %v382_v7  ;;  %vm421_vm12 = vweird.f32 %v382_v7 }
 0x2fb   :  { %v428_v51 = vor.u32 1.1754944e-38, %v427_v45  ;;  %vm426_vm14 = vcmp.eq.f32.partialorder %v425_v46, 8.507059e+37 }
 0x2ff   :  { %v3950_v41 = vpop.eup %3949 }
 0x300   :  { %v417_v20 = vmul.f32 %v3950_v41, %v382_v7  ;;  %v385_v42 = vpop.xlane.xlu1 %384  ;;  %vm422_vm11 = vweird.f32 %v3950_v41 }
 0x301   :  { %3951 = vrcp.f32 %v385_v42  ;;  %vm423_vm13 = vmor %vm421_vm12, %vm422_vm11  ;;  %v442_v49 = vand.u32 2147483648, %v385_v42  ;;  %v440_v58 = vand.u32 2147483647, %v385_v42  ;;  %vm436_vm2 = vweird.f32 %v385_v42 }
 0x302   :  { %v418_v43 = vsub.f32 1.0, %v417_v20 }
 0x303   :  { %v443_v61 = vor.u32 1.1754944e-38, %v442_v49  ;;  %vm441_vm4 = vcmp.eq.f32.partialorder %v440_v58, 8.507059e+37 }
 0x304   :  { %v419_v44 = vmul.f32 %v3950_v41, %v418_v43 }
 0x306   :  { %v420_v47 = vadd.f32 %v3950_v41, %v419_v44 }
 0x307   :  { %v3952_v48 = vpop.eup %3951 }
 0x308   :  { %v424_v19 = vsel %vm423_vm13, %v3950_v41, %v420_v47  ;;  %v432_v35 = vmul.f32 %v3952_v48, %v385_v42  ;;  %v4369_v52 = vpop.xlane.xlu1 %387  ;;  %vm437_vm15 = vweird.f32 %v3952_v48 }
 0x309   :  { %v429_v54 = vsel %vm426_vm14, %v428_v51, %v424_v19  ;;  %vm438_vm3 = vmor %vm436_vm2, %vm437_vm15  ;;  %v457_v4 = vand.u32 2147483648, %v4369_v52  ;;  %vm451_vm13 = vweird.f32 %v4369_v52 }
 0x30a   :  { %v433_v53 = vsub.f32 1.0, %v432_v35  ;;  %v430_v55 = vmul.f32 %v4323_v17, %v429_v54 }
 0x30b   :  { %v458_v45 = vor.u32 1.1754944e-38, %v457_v4 }
 0x30c   :  { %v434_v57 = vmul.f32 %v3952_v48, %v433_v53  ;;  %3673 = vmatmul.msk.f32.vlgmr.msra.gmra.mxu0 %vm106_vm1, %v430_v55 }
 0x30e   :  { %v435_v59 = vadd.f32 %v3952_v48, %v434_v57  ;;  %v397_v60 = vpop.xlane.xlu0 %396 }
 0x30f   :  { %3953 = vrcp.f32 %v397_v60  ;;  %v502_v25 = vand.u32 2147483648, %v397_v60  ;;  %v500_v29 = vand.u32 2147483647, %v397_v60  ;;  %vm496_vm6 = vweird.f32 %v397_v60 }
 0x310   :  { %v439_v26 = vsel %vm438_vm3, %v3952_v48, %v435_v59  ;;  %v4373_v62 = vpop.xlane.xlu1 %399  ;;  %3955 = vrcp.f32 %v4369_v52 }
 0x311   :  { %v444_v63 = vsel %vm441_vm4, %v443_v61, %v439_v26  ;;  %3957 = vrcp.f32 %v4373_v62  ;;  %vm501_vm8 = vcmp.eq.f32.partialorder %v500_v29, 8.507059e+37  ;;  %v517_v48 = vand.u32 2147483648, %v4373_v62 }
 0x312   :  { %v445_v17 = vmul.f32 %v4330_v50, %v444_v63  ;;  %v503_v50 = vor.u32 1.1754944e-38, %v502_v25  ;;  %vm511_vm4 = vweird.f32 %v4373_v62  ;;  %v515_v19 = vand.u32 2147483647, %v4373_v62 }
 0x313   :  { %v518_v53 = vor.u32 1.1754944e-38, %v517_v48  ;;  %v39_v48 = vld [vmem:[%s5349_s2 + $0x8] sm:$0xff] }
 0x314   :  { %3674 = vmatmul.msk.f32.vlgmr.msrb.gmra.mxu1 %vm106_vm1, %v445_v17 }
 0x315   :  { %v3954_v5 = vpop.eup %3953 }
 0x316   :  { %v492_v6 = vmul.f32 %v3954_v5, %v397_v60  ;;  %v3956_v8 = vpop.eup %3955  ;;  %vm497_vm5 = vweird.f32 %v3954_v5 }
 0x317   :  { %v447_v27 = vmul.f32 %v3956_v8, %v4369_v52  ;;  %vm498_vm7 = vmor %vm496_vm6, %vm497_vm5  ;;  %v3958_v31 = vpop.eup %3957  ;;  %vm452_vm10 = vweird.f32 %v3956_v8  ;;  %vm516_vm6 = vcmp.eq.f32.partialorder %v515_v19, 8.507059e+37 }
 0x318   :  { %v493_v10 = vsub.f32 1.0, %v492_v6  ;;  %v394_v12 = vpop.xlane.xlu1 %393  ;;  %v507_v24 = vmul.f32 %v3958_v31, %v4373_v62  ;;  %vm453_vm15 = vmor %vm451_vm13, %vm452_vm10  ;;  %vm512_vm3 = vweird.f32 %v3958_v31 }
 0x319   :  { %3959 = vrcp.f32 %v394_v12  ;;  %v448_v32 = vsub.f32 1.0, %v447_v27  ;;  %v487_v0 = vand.u32 2147483648, %v394_v12  ;;  %v485_v3 = vand.u32 2147483647, %v394_v12  ;;  %vm513_vm5 = vmor %vm511_vm4, %vm512_vm3 }
 0x31a   :  { %v494_v28 = vmul.f32 %v3954_v5, %v493_v10  ;;  %v508_v40 = vsub.f32 1.0, %v507_v24  ;;  %vm481_vm11 = vweird.f32 %v394_v12 }
 0x31b   :  { %v449_v23 = vmul.f32 %v3956_v8, %v448_v32  ;;  %v488_v7 = vor.u32 1.1754944e-38, %v487_v0  ;;  %vm486_vm14 = vcmp.eq.f32.partialorder %v485_v3, 8.507059e+37 }
 0x31c   :  { %v495_v30 = vadd.f32 %v3954_v5, %v494_v28  ;;  %v509_v43 = vmul.f32 %v3958_v31, %v508_v40 }
 0x31d   :  { %v450_v21 = vadd.f32 %v3956_v8, %v449_v23 }
 0x31e   :  { %v499_v34 = vsel %vm498_vm7, %v3954_v5, %v495_v30  ;;  %v510_v47 = vadd.f32 %v3958_v31, %v509_v43  ;;  %vm755_vm7 = vcmask 130048  }
 0x31f   :  { %v3960_v16 = vpop.eup %3959  ;;  %v504_v36 = vsel %vm501_vm8, %v503_v50, %v499_v34  ;;  %v454_v42 = vsel %vm453_vm15, %v3956_v8, %v450_v21  ;;  %v544_v57 = vpop.f32.mrf.mxu3  ;;  %vm758_vm8 = vcmask 195584  }
 0x320   :  { %v477_v37 = vmul.f32 %v3960_v16, %v394_v12  ;;  %v505_v22 = vmul.f32 %v4343_v18, %v504_v36  ;;  %vm482_vm9 = vweird.f32 %v3960_v16  ;;  %v455_v18 = vand.u32 2147483647, %v4369_v52 }
 0x321   :  { %vm483_vm12 = vmor %vm481_vm11, %vm482_vm9  ;;  %v514_v52 = vsel %vm513_vm5, %v3958_v31, %v510_v47  ;;  %v41_v47 = vld [vmem:[%s5349_s2 + $0x18] sm:$0xff] }
 0x322   :  { %v478_v38 = vsub.f32 1.0, %v477_v37  ;;  %3678 = vmatmul.msk.f32.vlgmr.msra.gmra.mxu1 %vm106_vm1, %v505_v22  ;;  %vm456_vm2 = vcmp.eq.f32.partialorder %v455_v18, 8.507059e+37  ;;  %v519_v54 = vsel %vm516_vm6, %v518_v53, %v514_v52  ;;  %v4435_v19 = vpack.i.bf16 %v39_v48, %v41_v47 }
 0x323   :  { %v459_v46 = vsel %vm456_vm2, %v458_v45, %v454_v42  ;;  %v520_v55 = vmul.f32 %v4341_v11, %v519_v54  ;;  %v45_v45 = vld [vmem:[%s5349_s2 + $0x38] sm:$0xff]  ;;  %v4442_v54 = vperm.slane %v4210_v14, 2 }
 0x324   :  { %v479_v1 = vmul.f32 %v3960_v16, %v478_v38  ;;  %v460_v35 = vmul.f32 %v4336_v56, %v459_v46  ;;  %891 = vmatpush.msra.mxu0 %v45_v45 }
 0x326   :  { %v480_v2 = vadd.f32 %v3960_v16, %v479_v1  ;;  %v4121_v1 = vmov 32.0  }
 0x327   :  { %3961 = vrcp.f32 %v4121_v1 }
 0x328   :  { %v484_v41 = vsel %vm483_vm12, %v3960_v16, %v480_v2 }
 0x329   :  { %v489_v20 = vsel %vm486_vm14, %v488_v7, %v484_v41 }
 0x32a   :  { %v490_v44 = vmul.f32 %v4351_v33, %v489_v20  ;;  %v704_v33 = vpop.permute.xlu0 %703 }
 0x32c   :  { %3677 = vmatmul.msk.f32.vlgmr.msrb.gmra.mxu0 %vm106_vm1, %v490_v44  ;;  %v43_v44 = vld [vmem:[%s5349_s2 + $0x28] sm:$0xff] }
 0x32d   :  { %v3962_v3 = vpop.eup %3961  ;;  %v4425_v46 = vpack.i.bf16 %v43_v44, %v45_v45  ;;  %892 = vmatpush.msra.mxu0 %v43_v44 }
 0x32e   :  { %v819_v21 = vmul.f32 32.0, %v3962_v3  ;;  %vm823_vm9 = vweird.f32 %v3962_v3 }
 0x32f   :  { %893 = vmatpush.msra.mxu0 %v41_v47 }
 0x330   :  { %v600_v51 = vpop.permute.xlu1 %599  ;;  %v820_v40 = vsub.f32 1.0, %v819_v21 }
 0x331   :  { %620 = vmatpush.msra.mxu2 %v600_v51  ;;  %894 = vmatpush.msra.mxu0 %v39_v48 }
 0x332   :  { %3675 = vmatmul.msk.f32.vlgmr.msra.gmra.mxu2 %vm106_vm1, %v460_v35  ;;  %v3826_v58 = vpop.permute.xlu0 %3825  ;;  %v821_v2 = vmul.f32 %v3962_v3, %v820_v40 }
 0x333   :  { %724 = vmatpush.msrb.mxu2 %v704_v33  ;;  %v3828_v60 = vunpack.i.h.bf16 %v3826_v58  ;;  %v3827_v26 = vunpack.i.l.bf16 %v3826_v58 }
 0x334   :  { %v822_v4 = vadd.f32 %v3962_v3, %v821_v2 }
 0x335   :  { %799 = vmatpush.msra.mxu3 %v3827_v26 }
 0x336   :  { %v4415_v7 = vsel %vm823_vm9, %v3962_v3, %v822_v4 }
 0x337   :  { %800 = vmatpush.msra.mxu3 %v3828_v60 }
 0x338   :  { %v3831_v17 = vpop.permute.xlu1 %3830 }
 0x339   :  { %v3833_v5 = vunpack.i.h.bf16 %v3831_v17  ;;  %v3832_v6 = vunpack.i.l.bf16 %v3831_v17 }
 0x33a   :  { %3679 = vmatmul.msk.f32.vlgmr.msrb.gmra.mxu2 %vm106_vm1, %v520_v55 }
 0x33b   :  { %801 = vmatpush.msra.mxu3 %v3832_v6 }
 0x33d   :  { %802 = vmatpush.msra.mxu3 %v3833_v5 }
 0x376   :  { %v648_v49 = vpop.f32.mrf.mxu3 }
 0x377   :  { %739 = vrot.lane.b32.xlu0 %v648_v49, %s4118_s19 }
 0x389   :  { %v570_v61 = vpop.f32.mrf.mxu0 }
 0x391   :  { %v596_v56 = vpop.f32.mrf.mxu1 }
 0x392   :  { %731 = vrot.lane.b32.xlu2 %v596_v56, %s4119_s20 }
 0x39f   :  { %v700_v59 = vpop.f32.mrf.mxu1 }
 0x3a0   :  { %747 = vrot.lane.b32.xlu2 %v700_v59, %s4120_s21 }
 0x3a9   :  { %v674_v11 = vpop.f32.mrf.mxu0 }
 0x3aa   :  { %741 = vrot.lane.b32.xlu0 %v674_v11, %s4118_s19  ;;  %v4450_v11 = vperm.slane %v4210_v14, 1 }
 0x3b5   :  { %v622_v62 = vpop.f32.mrf.mxu2 }
 0x3b6   :  { %733 = vrot.lane.b32.xlu1 %v622_v62, %s4119_s20 }
 0x3bd   :  { %v726_v63 = vpop.f32.mrf.mxu2 }
 0x3be   :  { %749 = vrot.lane.b32.xlu2 %v726_v63, %s4120_s21  ;;  %778 = vrot.lane.b32.xlu1 %v4213_v15, %s4117_s18 }
 0x3e9   :  { %v740_v12 = vpop.permute.xlu0 %739 }
 0x3ec   :  { %v732_v8 = vpop.permute.xlu2 %731 }
 0x3ed   :  { %v753_v10 = vsel %vm106_vm1, %v544_v57, %v732_v8 }
 0x3ee   :  { %v756_v27 = vsel %vm755_vm7, %v753_v10, %v740_v12 }
 0x3fa   :  { %v748_v25 = vpop.permute.xlu2 %747 }
 0x3fb   :  { %v759_v28 = vsel %vm758_vm8, %v756_v27, %v748_v25 }
 0x3fc   :  { %3680 = vmatmul.msk.f32.vlgmr.msra.gmra.mxu3 %vm60_vm0, %v759_v28 }
 0x418   :  { %v750_v50 = vpop.permute.xlu2 %749 }
 0x41c   :  { %v742_v15 = vpop.permute.xlu0 %741 }
 0x428   :  { %v734_v29 = vpop.permute.xlu1 %733 }
 0x429   :  { %v754_v30 = vsel %vm106_vm1, %v570_v61, %v734_v29 }
 0x42a   :  { %v757_v31 = vsel %vm755_vm7, %v754_v30, %v742_v15 }
 0x42b   :  { %v760_v32 = vsel %vm758_vm8, %v757_v31, %v750_v50 }
 0x42c   :  { %3681 = vmatmul.msk.f32.gmra.mxu3 %vm60_vm0, %v760_v32 }
 0x430   :  { %v779_v34 = vpop.permute.xlu1 %778 }
 0x47f   :  { %v804_v16 = vpop.f32.mrf.mxu3 }
 0x480   :  { %v805_v36 = vadd.f32 %v804_v16, %v779_v34 }
 0x482   :  { %v810_v37 = vadd.f32 %v805_v36, %v4191_v9 }
 0x484   :  { %v812_v22 = vsel %vm60_vm0, %v810_v37, 0.0 }
 0x485   :  { %813 = vadd.xlane.f32.xlu0 %v812_v22 }
 0x4af   :  { %v807_v23 = vpop.f32.mrf.mxu3 }
 0x4b0   :  { %v808_v24 = vadd.f32 %v807_v23, %v779_v34 }
 0x4b2   :  { %v811_v38 = vadd.f32 %v808_v24, %v4203_v13 }
 0x4b4   :  { %v815_v0 = vsel %vm60_vm0, %v811_v38, 0.0 }
 0x4b5   :  { %816 = vadd.xlane.f32.xlu2 %v815_v0 }
 0x4cd   :  { %3835 = vrot.lane.b32.xlu2 %v4425_v46, %s4114_s16 }
 0x4d5   :  { %919 = vrot.lane.b32.xlu2 %v4450_v11, %s4114_s16 }
 0x4f8   :  { %v814_v18 = vpop.xlane.xlu0 %813 }
 0x4f9   :  { %v825_v41 = vmul.f32 %v4415_v7, %v814_v18 }
 0x4fb   :  { %v827_v20 = vsub.f32 %v810_v37, %v825_v41 }
 0x4fd   :  { %v829_v42 = vmul.f32 %v827_v20, %v827_v20 }
 0x4ff   :  { %v831_v43 = vsel %vm60_vm0, %v829_v42, 0.0 }
 0x500   :  { %832 = vadd.xlane.f32.xlu1 %v831_v43 }
 0x519   :  { %3840 = vrot.lane.b32.xlu1 %v4435_v19, %s4114_s16 }
 0x528   :  { %v817_v51 = vpop.xlane.xlu2 %816 }
 0x529   :  { %v826_v35 = vmul.f32 %v4415_v7, %v817_v51 }
 0x52b   :  { %v828_v52 = vsub.f32 %v811_v38, %v826_v35 }
 0x52d   :  { %v830_v33 = vmul.f32 %v828_v52, %v828_v52 }
 0x52f   :  { %v834_v53 = vsel %vm60_vm0, %v830_v33, 0.0 }
 0x530   :  { %835 = vadd.xlane.f32.xlu0 %v834_v53  ;;  %v3836_v55 = vpop.permute.xlu2 %3835 }
 0x531   :  { %v3838_v57 = vunpack.i.h.bf16 %v3836_v55  ;;  %v3837_v49 = vunpack.i.l.bf16 %v3836_v55 }
 0x533   :  { %934 = vmatpush.msrb.mxu1 %v3837_v49 }
 0x535   :  { %935 = vmatpush.msrb.mxu1 %v3838_v57 }
 0x538   :  { %v920_v24 = vpop.permute.xlu2 %919 }
 0x544   :  { %867 = vrot.lane.b32.xlu0 %v4442_v54, %s4114_s16 }
 0x573   :  { %v833_v56 = vpop.xlane.xlu1 %832 }
 0x574   :  { %v837_v58 = vmul.f32 %v833_v56, %v4415_v7 }
 0x576   :  { %v839_v61 = vadd.f32 1e-05, %v837_v58 }
 0x578   :  { %3963 = vrsqrt.f32 %v839_v61  ;;  %vm847_vm11 = vweird.f32 %v839_v61 }
 0x57e   :  { %v3964_v62 = vpop.eup %3963 }
 0x57f   :  { %v842_v63 = vmul.f32 %v3964_v62, %v839_v61  ;;  %vm848_vm10 = vweird.f32 %v3964_v62 }
 0x580   :  { %vm849_vm12 = vmor %vm847_vm11, %vm848_vm10 }
 0x581   :  { %v843_v17 = vmul.f32 %v3964_v62, %v842_v63 }
 0x583   :  { %v844_v5 = vmul.f32 0.5, %v843_v17 }
 0x585   :  { %v845_v10 = vsub.f32 1.5, %v844_v5 }
 0x587   :  { %v846_v25 = vmul.f32 %v3964_v62, %v845_v10 }
 0x589   :  { %v850_v27 = vsel %vm849_vm12, %v3964_v62, %v846_v25 }
 0x58a   :  { %v861_v15 = vmul.f32 %v850_v27, %v827_v20 }
 0x58b   :  { %v3841_v59 = vpop.permute.xlu1 %3840 }
 0x58c   :  { %v3843_v60 = vunpack.i.h.bf16 %v3841_v59  ;;  %v3842_v26 = vunpack.i.l.bf16 %v3841_v59  ;;  %v864_v31 = vmul.f32 %v4442_v54, %v861_v15 }
 0x58e   :  { %936 = vmatpush.msrb.mxu1 %v3842_v26 }
 0x590   :  { %937 = vmatpush.msrb.mxu1 %v3843_v60 }
 0x591   :  { %3684 = vmatmul.msk.f32.vlgmr.msrb.gmra.mxu1 %vm60_vm0, %v4191_v9 }
 0x599   :  { %3685 = vmatmul.msk.f32.gmra.mxu1 %vm60_vm0, %v4203_v13 }
 0x5a3   :  { %v836_v6 = vpop.xlane.xlu0 %835 }
 0x5a4   :  { %v838_v8 = vmul.f32 %v836_v6, %v4415_v7 }
 0x5a6   :  { %v840_v12 = vadd.f32 1e-05, %v838_v8 }
 0x5a8   :  { %3965 = vrsqrt.f32 %v840_v12  ;;  %vm857_vm14 = vweird.f32 %v840_v12 }
 0x5ae   :  { %v3966_v14 = vpop.eup %3965 }
 0x5af   :  { %v852_v28 = vmul.f32 %v3966_v14, %v840_v12  ;;  %vm858_vm13 = vweird.f32 %v3966_v14 }
 0x5b0   :  { %vm859_vm15 = vmor %vm857_vm14, %vm858_vm13 }
 0x5b1   :  { %v853_v29 = vmul.f32 %v3966_v14, %v852_v28 }
 0x5b3   :  { %v854_v30 = vmul.f32 0.5, %v853_v29 }
 0x5b5   :  { %v855_v50 = vsub.f32 1.5, %v854_v30 }
 0x5b6   :  { %v868_v32 = vpop.permute.xlu0 %867 }
 0x5b7   :  { %v856_v34 = vmul.f32 %v3966_v14, %v855_v50  ;;  %v4458_v16 = vadd.f32 %v868_v32, %v864_v31 }
 0x5b9   :  { %v860_v36 = vsel %vm859_vm15, %v3966_v14, %v856_v34  ;;  %3682 = vmatmul.msk.f32.vlgmr.msra.gmra.mxu0 %vm60_vm0, %v4458_v16 }
 0x5ba   :  { %v862_v37 = vmul.f32 %v860_v36, %v828_v52 }
 0x5bc   :  { %v865_v22 = vmul.f32 %v4442_v54, %v862_v37 }
 0x5be   :  { %v4463_v23 = vadd.f32 %v868_v32, %v865_v22 }
 0x5c1   :  { %3683 = vmatmul.msk.f32.gmra.mxu0 %vm60_vm0, %v4463_v23 }
 0x60e   :  { %v939_v38 = vpop.f32.mrf.mxu1 }
 0x60f   :  { %v4467_v0 = vadd.f32 %v939_v38, %v920_v24 }
 0x611   :  { %969 = vrot.lane.b32.xlu2 %v4467_v0, %s4112_s1  ;;  %961 = vrot.lane.b32.xlu0 %v4467_v0, %s4111_s0 }
 0x612   :  { %3686 = vmatpush.xpose.msk.msra.mxu2 %vm106_vm1, %v4467_v0 }
 0x616   :  { %v942_v1 = vpop.f32.mrf.mxu1 }
 0x617   :  { %v4475_v3 = vadd.f32 %v942_v1, %v920_v24 }
 0x619   :  { %3688 = vmatpush.xpose.msk.msrb.mxu2 %vm106_vm1, %v4475_v3 }
 0x636   :  { %v896_v21 = vpop.f32.mrf.mxu0 }
 0x637   :  { %v897_v40 = vadd.f32 %v896_v21, %v4450_v11 }
 0x639   :  { %955 = vrot.lane.b32.xlu0 %v897_v40, %s4112_s1  ;;  %947 = vrot.lane.b32.xlu1 %v897_v40, %s4111_s0 }
 0x63a   :  { %3687 = vmatmul.msk.f32.vlgmr.msra.gmra.mxu2 %vm106_vm1, %v897_v40 }
 0x63e   :  { %v899_v2 = vpop.f32.mrf.mxu0 }
 0x63f   :  { %v900_v4 = vadd.f32 %v899_v2, %v4450_v11 }
 0x641   :  { %953 = vrot.lane.b32.xlu2 %v900_v4, %s4113_s15  ;;  %965 = vrot.lane.b32.xlu0 %v4467_v0, %s4113_s15 }
 0x642   :  { %967 = vrot.lane.b32.xlu1 %v4475_v3, %s4113_s15  ;;  %3689 = vmatmul.msk.f32.vlgmr.msrb.gmra.mxu2 %vm106_vm1, %v900_v4 }
 0x649   :  { %951 = vrot.lane.b32.xlu2 %v897_v40, %s4113_s15  ;;  %949 = vrot.lane.b32.xlu0 %v900_v4, %s4111_s0 }
 0x64a   :  { %963 = vrot.lane.b32.xlu1 %v4475_v3, %s4111_s0 }
 0x651   :  { %957 = vrot.lane.b32.xlu2 %v900_v4, %s4112_s1 }
 0x652   :  { %971 = vrot.lane.b32.xlu1 %v4475_v3, %s4112_s1 }
 0x66b   :  { %v4499_v41 = vpop.permute.xlu2 %969 }
 0x683   :  { %v4497_v18 = vpop.permute.xlu0 %961 }
 0x684   :  { %3690 = vmatpush.xpose.msk.msrb.mxu3 %vm106_vm1, %v4497_v18  ;;  %v3844_v34 = vpack.i.bf16 %v4467_v0, %v4497_v18 }
 0x688   :  { %3698 = vmatpush.xpose.msk.msra.mxu3 %vm106_vm1, %v4499_v41 }
 0x69b   :  { %v954_v43 = vpop.permute.xlu2 %953 }
 0x6a3   :  { %v952_v47 = vpop.permute.xlu2 %951 }
 0x6ab   :  { %v948_v20 = vpop.permute.xlu1 %947  ;;  %v956_v42 = vpop.permute.xlu0 %955 }
 0x6ac   :  { %3691 = vmatmul.msk.f32.vlgmr.msrb.gmra.mxu3 %vm106_vm1, %v948_v20  ;;  %v958_v49 = vpop.permute.xlu2 %957 }
 0x6b3   :  { %v4508_v45 = vpop.permute.xlu0 %965 }
 0x6b4   :  { %v4506_v44 = vpop.permute.xlu1 %967  ;;  %3699 = vmatmul.msk.f32.vlgmr.msra.gmra.mxu3 %vm106_vm1, %v956_v42  ;;  %3694 = vmatpush.xpose.msk.msra.mxu1 %vm106_vm1, %v4508_v45 }
 0x6b5   :  { %3696 = vmatpush.xpose.msk.msra.mxu2 %vm106_vm1, %v4506_v44 }
 0x6b7   :  { %3695 = vmatmul.msk.f32.vlgmr.msra.gmra.mxu1 %vm106_vm1, %v952_v47 }
 0x6b8   :  { %3697 = vmatmul.msk.f32.vlgmr.msra.gmra.mxu2 %vm106_vm1, %v954_v43 }
 0x6bb   :  { %v950_v52 = vpop.permute.xlu0 %949 }
 0x6bc   :  { %v4517_v48 = vpop.permute.xlu1 %963 }
 0x6bd   :  { %v994_v51 = vpop.f32.mrf.mxu2  ;;  %3692 = vmatpush.xpose.msk.msrb.mxu0 %vm106_vm1, %v4517_v48 }
 0x6be   :  { %v1165_v35 = vmul.f32 0.35355338, %v994_v51 }
 0x6c0   :  { %3693 = vmatmul.msk.f32.vlgmr.msrb.gmra.mxu0 %vm106_vm1, %v950_v52  ;;  %v1173_v33 = vsel %vm106_vm1, %v1165_v35, -inf }
 0x6c1   :  { %1174 = vmax.xlane.f32.xlu1 %v1173_v33 }
 0x6c4   :  { %v4523_v53 = vpop.permute.xlu1 %971 }
 0x6c5   :  { %v1018_v55 = vpop.f32.mrf.mxu2  ;;  %3700 = vmatpush.xpose.msk.msra.mxu0 %vm106_vm1, %v4523_v53 }
 0x6c6   :  { %v1166_v57 = vmul.f32 0.35355338, %v1018_v55 }
 0x6c8   :  { %3701 = vmatmul.msk.f32.vlgmr.msra.gmra.mxu0 %vm106_vm1, %v958_v49  ;;  %v1176_v56 = vsel %vm106_vm1, %v1166_v57, -inf }
 0x6c9   :  { %1177 = vmax.xlane.f32.xlu2 %v1176_v56 }
 0x72f   :  { %v1042_v58 = vpop.f32.mrf.mxu3 }
 0x730   :  { %v1167_v59 = vmul.f32 0.35355338, %v1042_v58 }
 0x732   :  { %v1179_v60 = vsel %vm106_vm1, %v1167_v59, -inf }
 0x733   :  { %1180 = vmax.xlane.f32.xlu0 %v1179_v60 }
 0x734   :  { %v1090_v26 = vpop.f32.mrf.mxu1  ;;  %v1175_v36 = vpop.xlane.xlu1 %1174 }
 0x735   :  { %v1169_v61 = vmul.f32 0.35355338, %v1090_v26  ;;  %v1197_v37 = vsub.f32 %v1165_v35, %v1175_v36 }
 0x737   :  { %v1138_v62 = vpop.f32.mrf.mxu3  ;;  %v1185_v17 = vsel %vm106_vm1, %v1169_v61, -inf  ;;  %v1205_v22 = vmul.f32 1.442695, %v1197_v37 }
 0x738   :  { %v1171_v63 = vmul.f32 0.35355338, %v1138_v62  ;;  %1186 = vmax.xlane.f32.xlu1 %v1185_v17 }
 0x73a   :  { %v1191_v5 = vsel %vm106_vm1, %v1171_v63, -inf }
 0x73b   :  { %v1114_v6 = vpop.f32.mrf.mxu2  ;;  %1192 = vmax.xlane.f32.xlu0 %v1191_v5 }
 0x73c   :  { %v1178_v8 = vpop.xlane.xlu2 %1177  ;;  %v1170_v12 = vmul.f32 0.35355338, %v1114_v6 }
 0x73d   :  { %v1066_v10 = vpop.f32.mrf.mxu0  ;;  %v1198_v14 = vsub.f32 %v1166_v57, %v1178_v8 }
 0x73e   :  { %v1168_v25 = vmul.f32 0.35355338, %v1066_v10  ;;  %v1188_v28 = vsel %vm106_vm1, %v1170_v12, -inf }
 0x73f   :  { %v1207_v29 = vmul.f32 1.442695, %v1198_v14  ;;  %v3849_v14 = vpack.i.bf16 %v4499_v41, %v4475_v3 }
 0x740   :  { %v1182_v27 = vsel %vm106_vm1, %v1168_v25, -inf }
 0x741   :  { %1183 = vmax.xlane.f32.xlu2 %v1182_v27  ;;  %3967 = vpow2.f32 %v1207_v29  ;;  %v3854_v27 = vpack.i.bf16 %v4517_v48, %v4508_v45 }
 0x742   :  { %3969 = vpow2.f32 %v1205_v22 }
 0x743   :  { %1189 = vmax.xlane.f32.xlu0 %v1188_v28 }
 0x745   :  { %v1162_v15 = vpop.f32.mrf.mxu0 }
 0x746   :  { %v1172_v30 = vmul.f32 0.35355338, %v1162_v15 }
 0x747   :  { %v4535_v31 = vpop.eup %3967 }
 0x748   :  { %v1194_v50 = vsel %vm106_vm1, %v1172_v30, -inf  ;;  %v1224_v32 = vsel %vm106_vm1, %v4535_v31, 0.0  ;;  %v4542_v24 = vpop.eup %3969 }
 0x749   :  { %1195 = vmax.xlane.f32.xlu1 %v1194_v50  ;;  %v1221_v38 = vsel %vm106_vm1, %v4542_v24, 0.0 }
 0x751   :  { %1225 = vadd.xlane.f32.xlu1 %v1224_v32 }
 0x757   :  { %3845 = vrot.lane.b32.xlu0 %v3844_v34, %s4114_s16 }
 0x781   :  { %1222 = vadd.xlane.f32.xlu0 %v1221_v38 }
 0x7a6   :  { %v1181_v1 = vpop.xlane.xlu0 %1180 }
 0x7a7   :  { %v1199_v21 = vsub.f32 %v1167_v59, %v1181_v1 }
 0x7a9   :  { %v1209_v40 = vmul.f32 1.442695, %v1199_v21 }
 0x7ab   :  { %3971 = vpow2.f32 %v1209_v40  ;;  %v1187_v2 = vpop.xlane.xlu1 %1186 }
 0x7ac   :  { %v1201_v4 = vsub.f32 %v1169_v61, %v1187_v2 }
 0x7ae   :  { %v1193_v20 = vpop.xlane.xlu0 %1192  ;;  %v1213_v0 = vmul.f32 1.442695, %v1201_v4 }
 0x7af   :  { %v1203_v18 = vsub.f32 %v1171_v63, %v1193_v20 }
 0x7b0   :  { %3973 = vpow2.f32 %v1213_v0 }
 0x7b1   :  { %v4546_v42 = vpop.eup %3971  ;;  %v1217_v43 = vmul.f32 1.442695, %v1203_v18 }
 0x7b2   :  { %v1227_v47 = vsel %vm106_vm1, %v4546_v42, 0.0 }
 0x7b3   :  { %3975 = vpow2.f32 %v1217_v43  ;;  %1228 = vadd.xlane.f32.xlu2 %v1227_v47 }
 0x7b4   :  { %v1184_v51 = vpop.xlane.xlu2 %1183 }
 0x7b5   :  { %v1200_v35 = vsub.f32 %v1168_v25, %v1184_v51 }
 0x7b6   :  { %v1190_v52 = vpop.xlane.xlu0 %1189  ;;  %v4550_v33 = vpop.eup %3973 }
 0x7b7   :  { %v1211_v55 = vmul.f32 1.442695, %v1200_v35  ;;  %v1202_v57 = vsub.f32 %v1170_v12, %v1190_v52  ;;  %v1233_v49 = vsel %vm106_vm1, %v4550_v33, 0.0 }
 0x7b8   :  { %1234 = vadd.xlane.f32.xlu0 %v1233_v49 }
 0x7b9   :  { %v4554_v56 = vpop.eup %3975  ;;  %3977 = vpow2.f32 %v1211_v55  ;;  %v1215_v58 = vmul.f32 1.442695, %v1202_v57 }
 0x7ba   :  { %v1239_v59 = vsel %vm106_vm1, %v4554_v56, 0.0 }
 0x7bb   :  { %3979 = vpow2.f32 %v1215_v58  ;;  %1240 = vadd.xlane.f32.xlu2 %v1239_v59 }
 0x7bc   :  { %v1196_v60 = vpop.xlane.xlu1 %1195 }
 0x7bd   :  { %v1204_v26 = vsub.f32 %v1172_v30, %v1196_v60 }
 0x7bf   :  { %v4558_v61 = vpop.eup %3977  ;;  %v1219_v62 = vmul.f32 1.442695, %v1204_v26 }
 0x7c0   :  { %v1230_v63 = vsel %vm106_vm1, %v4558_v61, 0.0 }
 0x7c1   :  { %v4562_v17 = vpop.eup %3979  ;;  %3981 = vpow2.f32 %v1219_v62  ;;  %1231 = vadd.xlane.f32.xlu1 %v1230_v63 }
 0x7c2   :  { %v1236_v5 = vsel %vm106_vm1, %v4562_v17, 0.0 }
 0x7c3   :  { %1237 = vadd.xlane.f32.xlu2 %v1236_v5 }
 0x7c4   :  { %v1226_v48 = vpop.xlane.xlu1 %1225 }
 0x7c5   :  { %v1271_v59 = vand.u32 2147483648, %v1226_v48  ;;  %vm1265_vm13 = vweird.f32 %v1226_v48  ;;  %v1269_v26 = vand.u32 2147483647, %v1226_v48 }
 0x7c7   :  { %v4566_v6 = vpop.eup %3981 }
 0x7c8   :  { %v1242_v8 = vsel %vm106_vm1, %v4566_v6, 0.0 }
 0x7c9   :  { %1243 = vadd.xlane.f32.xlu1 %v1242_v8  ;;  %v3846_v10 = vpop.permute.xlu0 %3845 }
 0x7ca   :  { %v3848_v12 = vunpack.i.h.bf16 %v3846_v10  ;;  %v3847_v25 = vunpack.i.l.bf16 %v3846_v10 }
 0x7cc   :  { %1386 = vmatpush.msrb.mxu1 %v3848_v12  ;;  %1438 = vmatpush.msrb.mxu3 %v3847_v25 }
 0x7cd   :  { %1495 = vrot.lane.b32.xlu0 %v4506_v44, %s4114_s16 }
 0x7d5   :  { %1547 = vrot.lane.b32.xlu0 %v4523_v53, %s4114_s16 }
 0x7db   :  { %3850 = vrot.lane.b32.xlu2 %v3849_v14, %s4114_s16 }
 0x7dd   :  { %3865 = vrot.lane.b32.xlu0 %v4435_v19, %s4117_s18 }
 0x7e2   :  { %3855 = vrot.lane.b32.xlu1 %v3854_v27, %s4114_s16  ;;  %v1272_v27 = vor.u32 1.1754944e-38, %v1271_v59 }
 0x7e3   :  { %3860 = vrot.lane.b32.xlu2 %v4425_v46, %s4117_s18 }
 0x7f4   :  { %v1223_v28 = vpop.xlane.xlu0 %1222 }
 0x7f5   :  { %3983 = vrcp.f32 %v1223_v28  ;;  %v1256_v50 = vand.u32 2147483648, %v1223_v28  ;;  %v1254_v32 = vand.u32 2147483647, %v1223_v28  ;;  %vm1250_vm3 = vweird.f32 %v1223_v28 }
 0x7f6   :  { %3985 = vrcp.f32 %v1226_v48 }
 0x7f7   :  { %v1257_v3 = vor.u32 1.1754944e-38, %v1256_v50  ;;  %vm1255_vm5 = vcmp.eq.f32.partialorder %v1254_v32, 8.507059e+37 }
 0x7fb   :  { %v3984_v29 = vpop.eup %3983 }
 0x7fc   :  { %v1246_v15 = vmul.f32 %v3984_v29, %v1223_v28  ;;  %vm1251_vm2 = vweird.f32 %v3984_v29  ;;  %v3986_v37 = vpop.eup %3985 }
 0x7fd   :  { %vm1252_vm4 = vmor %vm1250_vm3, %vm1251_vm2  ;;  %v1261_v22 = vmul.f32 %v3986_v37, %v1226_v48  ;;  %vm1266_vm12 = vweird.f32 %v3986_v37  ;;  %vm1270_vm3 = vcmp.eq.f32.partialorder %v1269_v26, 8.507059e+37 }
 0x7fe   :  { %v1247_v30 = vsub.f32 1.0, %v1246_v15  ;;  %vm4589_vm14 = vmor %vm1265_vm13, %vm1266_vm12 }
 0x7ff   :  { %v1262_v40 = vsub.f32 1.0, %v1261_v22 }
 0x800   :  { %v1248_v44 = vmul.f32 %v3984_v29, %v1247_v30 }
 0x802   :  { %v1249_v53 = vadd.f32 %v3984_v29, %v1248_v44 }
 0x804   :  { %v1253_v41 = vsel %vm1252_vm4, %v3984_v29, %v1249_v53 }
 0x805   :  { %v1258_v34 = vsel %vm1255_vm5, %v1257_v3, %v1253_v41 }
 0x806   :  { %v1259_v45 = vmul.f32 %v4542_v24, %v1258_v34  ;;  %v1263_v24 = vmul.f32 %v3986_v37, %v1262_v40 }
 0x808   :  { %3702 = vmatmul.msk.f32.vlgmr.msrb.gmra.mxu1 %vm106_vm1, %v1259_v45  ;;  %v1264_v49 = vadd.f32 %v3986_v37, %v1263_v24 }
 0x80a   :  { %v1268_v25 = vsel %vm4589_vm14, %v3986_v37, %v1264_v49 }
 0x80b   :  { %v1273_v30 = vsel %vm1270_vm3, %v1272_v27, %v1268_v25 }
 0x80c   :  { %v1274_v22 = vmul.f32 %v4535_v31, %v1273_v30 }
 0x826   :  { %v1229_v36 = vpop.xlane.xlu2 %1228 }
 0x827   :  { %3987 = vrcp.f32 %v1229_v36  ;;  %v1286_v4 = vand.u32 2147483648, %v1229_v36  ;;  %v1284_v0 = vand.u32 2147483647, %v1229_v36  ;;  %vm1280_vm9 = vweird.f32 %v1229_v36 }
 0x829   :  { %v1287_v35 = vor.u32 1.1754944e-38, %v1286_v4  ;;  %vm1285_vm11 = vcmp.eq.f32.partialorder %v1284_v0, 8.507059e+37 }
 0x82b   :  { %v4582_v18 = vpop.xlane.xlu0 %1234 }
 0x82c   :  { %vm1310_vm14 = vweird.f32 %v4582_v18  ;;  %v1316_v49 = vand.u32 2147483648, %v4582_v18 }
 0x82d   :  { %v3988_v38 = vpop.eup %3987 }
 0x82e   :  { %v1276_v1 = vmul.f32 %v3988_v38, %v1229_v36  ;;  %v1241_v21 = vpop.xlane.xlu2 %1240  ;;  %vm1281_vm6 = vweird.f32 %v3988_v38 }
 0x82f   :  { %3989 = vrcp.f32 %v1241_v21  ;;  %vm1282_vm10 = vmor %vm1280_vm9, %vm1281_vm6  ;;  %v1346_v62 = vand.u32 2147483648, %v1241_v21  ;;  %v1344_v10 = vand.u32 2147483647, %v1241_v21  ;;  %vm1340_vm2 = vweird.f32 %v1241_v21 }
 0x830   :  { %v1277_v2 = vsub.f32 1.0, %v1276_v1  ;;  %3991 = vrcp.f32 %v4582_v18 }
 0x831   :  { %v1347_v15 = vor.u32 1.1754944e-38, %v1346_v62  ;;  %vm1345_vm5 = vcmp.eq.f32.partialorder %v1344_v10, 8.507059e+37 }
 0x832   :  { %v1278_v20 = vmul.f32 %v3988_v38, %v1277_v2 }
 0x834   :  { %v1279_v43 = vadd.f32 %v3988_v38, %v1278_v20  ;;  %v4584_v47 = vpop.xlane.xlu1 %1231 }
 0x835   :  { %v3990_v51 = vpop.eup %3989  ;;  %3993 = vrcp.f32 %v4584_v47  ;;  %v1299_v59 = vand.u32 2147483647, %v4584_v47 }
 0x836   :  { %v1283_v52 = vsel %vm1282_vm10, %v3988_v38, %v1279_v43  ;;  %v1336_v55 = vmul.f32 %v3990_v51, %v1241_v21  ;;  %v1238_v57 = vpop.xlane.xlu2 %1237  ;;  %vm1341_vm15 = vweird.f32 %v3990_v51  ;;  %v4593_v12 = vpop.eup %3991 }
 0x837   :  { %v1288_v58 = vsel %vm1285_vm11, %v1287_v35, %v1283_v52  ;;  %3995 = vrcp.f32 %v1238_v57  ;;  %vm1342_vm4 = vmor %vm1340_vm2, %vm1341_vm15  ;;  %v1306_v53 = vmul.f32 %v4593_v12, %v4582_v18  ;;  %v1331_v37 = vand.u32 2147483648, %v1238_v57 }
 0x838   :  { %v1337_v60 = vsub.f32 1.0, %v1336_v55  ;;  %v1289_v63 = vmul.f32 %v4546_v42, %v1288_v58  ;;  %v1329_v1 = vand.u32 2147483647, %v1238_v57  ;;  %vm1325_vm9 = vweird.f32 %v1238_v57 }
 0x839   :  { %v1307_v40 = vsub.f32 1.0, %v1306_v53  ;;  %vm1311_vm12 = vweird.f32 %v4593_v12  ;;  %v1301_v58 = vand.u32 2147483648, %v4584_v47  ;;  %vm1295_vm2 = vweird.f32 %v4584_v47 }
 0x83a   :  { %v1338_v8 = vmul.f32 %v3990_v51, %v1337_v60  ;;  %3704 = vmatmul.msk.f32.vlgmr.msrb.gmra.mxu3 %vm106_vm1, %v1289_v63  ;;  %vm1330_vm11 = vcmp.eq.f32.partialorder %v1329_v1, 8.507059e+37  ;;  %vm1312_vm15 = vmor %vm1310_vm14, %vm1311_vm12  ;;  %v1317_v63 = vor.u32 1.1754944e-38, %v1316_v49 }
 0x83b   :  { %v4598_v14 = vpop.eup %3993  ;;  %v1308_v24 = vmul.f32 %v4593_v12, %v1307_v40  ;;  %v1302_v5 = vor.u32 1.1754944e-38, %v1301_v58 }
 0x83c   :  { %v1339_v28 = vadd.f32 %v3990_v51, %v1338_v8  ;;  %v4600_v42 = vpop.xlane.xlu1 %1243  ;;  %v1291_v34 = vmul.f32 %v4598_v14, %v4584_v47  ;;  %vm1296_vm13 = vweird.f32 %v4598_v14 }
 0x83d   :  { %v3996_v29 = vpop.eup %3995  ;;  %3997 = vrcp.f32 %v4600_v42  ;;  %v1309_v52 = vadd.f32 %v4593_v12, %v1308_v24  ;;  %vm1297_vm3 = vmor %vm1295_vm2, %vm1296_vm13  ;;  %v1359_v47 = vand.u32 2147483647, %v4600_v42 }
 0x83e   :  { %v1343_v50 = vsel %vm1342_vm4, %v3990_v51, %v1339_v28  ;;  %v1321_v44 = vmul.f32 %v3996_v29, %v1238_v57  ;;  %v3851_v32 = vpop.permute.xlu2 %3850  ;;  %vm1326_vm6 = vweird.f32 %v3996_v29  ;;  %v1292_v2 = vsub.f32 1.0, %v1291_v34 }
 0x83f   :  { %v1348_v3 = vsel %vm1345_vm5, %v1347_v15, %v1343_v50  ;;  %v3853_v41 = vunpack.i.h.bf16 %v3851_v32  ;;  %v3852_v48 = vunpack.i.l.bf16 %v3851_v32  ;;  %v1496_v21 = vpop.permute.xlu0 %1495  ;;  %vm1327_vm10 = vmor %vm1325_vm9, %vm1326_vm6  ;;  %v1313_v60 = vsel %vm1312_vm15, %v4593_v12, %v1309_v52 }
 0x840   :  { %v1322_v45 = vsub.f32 1.0, %v1321_v44  ;;  %v1349_v36 = vmul.f32 %v4554_v56, %v1348_v3  ;;  %v1332_v56 = vor.u32 1.1754944e-38, %v1331_v37  ;;  %v1293_v43 = vmul.f32 %v4598_v14, %v1292_v2 }
 0x841   :  { %1542 = vmatpush.msra.mxu3 %v3853_v41  ;;  %1412 = vmatpush.msrb.mxu2 %v3852_v48  ;;  %vm1300_vm5 = vcmp.eq.f32.partialorder %v1299_v59, 8.507059e+37  ;;  %vm1355_vm9 = vweird.f32 %v4600_v42 }
 0x842   :  { %v1323_v38 = vmul.f32 %v3996_v29, %v1322_v45  ;;  %3703 = vmatmul.msk.f32.vlgmr.msrb.gmra.mxu2 %vm106_vm1, %v1274_v22  ;;  %3708 = vmatmul.msk.f32.vlgmr.msra.gmra.mxu3 %vm106_vm1, %v1349_v36  ;;  %v1294_v55 = vadd.f32 %v4598_v14, %v1293_v43 }
 0x843   :  { %1516 = vmatpush.msra.mxu2 %v1496_v21  ;;  %v3998_v20 = vpop.eup %3997 }
 0x844   :  { %v1324_v4 = vadd.f32 %v3996_v29, %v1323_v38  ;;  %v1351_v51 = vmul.f32 %v3998_v20, %v4600_v42  ;;  %v1298_v26 = vsel %vm1297_vm3, %v4598_v14, %v1294_v55  ;;  %vm1356_vm6 = vweird.f32 %v3998_v20 }
 0x845   :  { %v1303_v10 = vsel %vm1300_vm5, %v1302_v5, %v1298_v26 }
 0x846   :  { %v1328_v0 = vsel %vm1327_vm10, %v3996_v29, %v1324_v4  ;;  %v1352_v57 = vsub.f32 1.0, %v1351_v51  ;;  %v1304_v12 = vmul.f32 %v4558_v61, %v1303_v10  ;;  %vm1357_vm10 = vmor %vm1355_vm9, %vm1356_vm6  ;;  %v3861_v46 = vpop.permute.xlu2 %3860  ;;  %v50_v10 = vld [vmem:[%s5350_s3 + $0x18] sm:$0xff] }
 0x847   :  { %v1333_v31 = vsel %vm1330_vm11, %v1332_v56, %v1328_v0  ;;  %v1548_v30 = vpop.permute.xlu0 %1547  ;;  %vm1360_vm11 = vcmp.eq.f32.partialorder %v1359_v47, 8.507059e+37  ;;  %v3863_v19 = vunpack.i.h.bf16 %v3861_v46  ;;  %v3862_v45 = vunpack.i.l.bf16 %v3861_v46  ;;  %1726 = vmatpush.msrb.mxu2 %v50_v10 }
 0x848   :  { %v1334_v35 = vmul.f32 %v4562_v17, %v1333_v31  ;;  %v1314_v17 = vand.u32 2147483647, %v4582_v18  ;;  %v1353_v62 = vmul.f32 %v3998_v20, %v1352_v57  ;;  %v1361_v18 = vand.u32 2147483648, %v4600_v42 }
 0x84a   :  { %3707 = vmatmul.msk.f32.vlgmr.msra.gmra.mxu2 %vm106_vm1, %v1334_v35  ;;  %vm1315_vm4 = vcmp.eq.f32.partialorder %v1314_v17, 8.507059e+37  ;;  %v1354_v25 = vadd.f32 %v3998_v20, %v1353_v62  ;;  %v1362_v50 = vor.u32 1.1754944e-38, %v1361_v18 }
 0x84b   :  { %v1318_v8 = vsel %vm1315_vm4, %v1317_v63, %v1313_v60  ;;  %vm1740_vm4 = vcmask 523264  }
 0x84c   :  { %v1319_v14 = vmul.f32 %v4550_v33, %v1318_v8  ;;  %v1358_v15 = vsel %vm1357_vm10, %v3998_v20, %v1354_v25  ;;  %v49_v25 = vld [vmem:[%s5350_s3 + $0x10] sm:$0xff] }
 0x84d   :  { %v1363_v44 = vsel %vm1360_vm11, %v1362_v50, %v1358_v15  ;;  %1727 = vmatpush.msrb.mxu2 %v49_v25 }
 0x84e   :  { %v1364_v32 = vmul.f32 %v4566_v6, %v1363_v44  ;;  %v4689_v44 = vld [vmem:[%s5351_s4] sm:$0x1f] }
 0x84f   :  { %v3866_v48 = vpop.permute.xlu0 %3865 }
 0x850   :  { %v3868_v36 = vunpack.i.h.bf16 %v3866_v48  ;;  %v3867_v37 = vunpack.i.l.bf16 %v3866_v48 }
 0x854   :  { %v3856_v27 = vpop.permute.xlu1 %3855 }
 0x855   :  { %v3858_v28 = vunpack.i.h.bf16 %v3856_v27  ;;  %v3857_v29 = vunpack.i.l.bf16 %v3856_v27  ;;  %v48_v27 = vld [vmem:[%s5350_s3 + $0x8] sm:$0xff] }
 0x856   :  { %1728 = vmatpush.msrb.mxu2 %v48_v27 }
 0x857   :  { %1464 = vmatpush.msrb.mxu0 %v3858_v28  ;;  %1490 = vmatpush.msra.mxu1 %v3857_v29 }
 0x858   :  { %3705 = vmatmul.msk.f32.vlgmr.msrb.gmra.mxu0 %vm106_vm1, %v1304_v12  ;;  %3706 = vmatmul.msk.f32.vlgmr.msra.gmra.mxu1 %vm106_vm1, %v1319_v14 }
 0x859   :  { %1568 = vmatpush.msra.mxu0 %v1548_v30  ;;  %1636 = vmatpush.msrb.mxu1 %v3862_v45 }
 0x85b   :  { %1637 = vmatpush.msrb.mxu1 %v3863_v19  ;;  %v55_v19 = vld [vmem:[%s5350_s3 + $0x40] sm:$0xff] }
 0x85d   :  { %1638 = vmatpush.msrb.mxu1 %v3867_v37 }
 0x85f   :  { %1639 = vmatpush.msrb.mxu1 %v3868_v36  ;;  %v54_v36 = vld [vmem:[%s5350_s3 + $0x38] sm:$0xff] }
 0x860   :  { %3709 = vmatmul.msk.f32.vlgmr.msra.gmra.mxu0 %vm106_vm1, %v1364_v32  ;;  %v4692_v32 = vperm.slane %v4689_v44, 3 }
 0x885   :  { %v1388_v42 = vpop.f32.mrf.mxu1 }
 0x8bd   :  { %v1440_v33 = vpop.f32.mrf.mxu3 }
 0x8be   :  { %1575 = vrot.lane.b32.xlu1 %v1440_v33, %s4119_s20  ;;  %v58_v33 = vld [vmem:[%s5350_s3 + $0x58] sm:$0xff] }
 0x8bf   :  { %1755 = vmatpush.msrb.mxu3 %v58_v33 }
 0x8c5   :  { %v1544_v61 = vpop.f32.mrf.mxu3  ;;  %v1414_v53 = vpop.f32.mrf.mxu2 }
 0x8c6   :  { %1591 = vrot.lane.b32.xlu1 %v1544_v61, %s4120_s21  ;;  %v57_v61 = vld [vmem:[%s5350_s3 + $0x50] sm:$0xff] }
 0x8c7   :  { %1756 = vmatpush.msrb.mxu3 %v57_v61 }
 0x8cd   :  { %v1518_v6 = vpop.f32.mrf.mxu2 }
 0x8d5   :  { %v1466_v3 = vpop.f32.mrf.mxu0  ;;  %v1492_v41 = vpop.f32.mrf.mxu1 }
 0x8d6   :  { %1577 = vrot.lane.b32.xlu0 %v1466_v3, %s4119_s20  ;;  %1583 = vrot.lane.b32.xlu2 %v1492_v41, %s4118_s19  ;;  %v56_v3 = vld [vmem:[%s5350_s3 + $0x48] sm:$0xff] }
 0x8d7   :  { %1757 = vmatpush.msrb.mxu3 %v56_v3 }
 0x8d9   :  { %1758 = vmatpush.msrb.mxu3 %v55_v19 }
 0x8db   :  { %1759 = vmatpush.msrb.mxu3 %v54_v36 }
 0x8dd   :  { %v1570_v34 = vpop.f32.mrf.mxu0 }
 0x8de   :  { %1585 = vrot.lane.b32.xlu2 %v1518_v6, %s4118_s19  ;;  %1593 = vrot.lane.b32.xlu1 %v1570_v34, %s4120_s21 }
 0x8df   :  { %1615 = vrot.lane.b32.xlu0 %v4450_v11, %s4117_s18 }
 0x930   :  { %v1576_v22 = vpop.permute.xlu1 %1575  ;;  %v1584_v1 = vpop.permute.xlu2 %1583 }
 0x931   :  { %v1597_v38 = vsel %vm106_vm1, %v1388_v42, %v1576_v22  ;;  %v53_v22 = vld [vmem:[%s5350_s3 + $0x30] sm:$0xff] }
 0x932   :  { %v1599_v21 = vsel %vm755_vm7, %v1597_v38, %v1584_v1  ;;  %1760 = vmatpush.msrb.mxu3 %v53_v22 }
 0x938   :  { %v1592_v40 = vpop.permute.xlu1 %1591  ;;  %v1586_v20 = vpop.permute.xlu2 %1585 }
 0x939   :  { %v1601_v2 = vsel %vm758_vm8, %v1599_v21, %v1592_v40 }
 0x93a   :  { %3710 = vmatmul.msk.f32.vlgmr.msrb.gmra.mxu1 %vm60_vm0, %v1601_v2 }
 0x948   :  { %v1578_v11 = vpop.permute.xlu0 %1577 }
 0x949   :  { %v1598_v4 = vsel %vm106_vm1, %v1414_v53, %v1578_v11 }
 0x94a   :  { %v1600_v0 = vsel %vm755_vm7, %v1598_v4, %v1586_v20 }
 0x950   :  { %v1594_v56 = vpop.permute.xlu1 %1593 }
 0x951   :  { %v1602_v31 = vsel %vm758_vm8, %v1600_v0, %v1594_v56  ;;  %v1616_v24 = vpop.permute.xlu0 %1615 }
 0x952   :  { %3711 = vmatmul.msk.f32.gmra.mxu1 %vm60_vm0, %v1602_v31  ;;  %v52_v31 = vld [vmem:[%s5350_s3 + $0x28] sm:$0xff] }
 0x953   :  { %1761 = vmatpush.msrb.mxu3 %v52_v31 }
 0x9b7   :  { %v1641_v43 = vpop.f32.mrf.mxu1 }
 0x9b8   :  { %v1642_v51 = vadd.f32 %v1641_v43, %v1616_v24 }
 0x9ba   :  { %v1647_v35 = vadd.f32 %v1642_v51, %v4458_v16 }
 0x9bc   :  { %v1649_v52 = vsel %vm60_vm0, %v1647_v35, 0.0 }
 0x9bd   :  { %1650 = vadd.xlane.f32.xlu2 %v1649_v52 }
 0x9cf   :  { %v1644_v55 = vpop.f32.mrf.mxu1 }
 0x9d0   :  { %v1645_v57 = vadd.f32 %v1644_v55, %v1616_v24  ;;  %v51_v24 = vld [vmem:[%s5350_s3 + $0x20] sm:$0xff] }
 0x9d1   :  { %1762 = vmatpush.msrb.mxu3 %v51_v24 }
 0x9d2   :  { %v1648_v49 = vadd.f32 %v1645_v57, %v4463_v23 }
 0x9d4   :  { %v1652_v58 = vsel %vm60_vm0, %v1648_v49, 0.0 }
 0x9d5   :  { %1653 = vadd.xlane.f32.xlu1 %v1652_v58  ;;  %v1739_v58 = vperm.slane %v4689_v44, 4 }
 0x9ee   :  { %1693 = vrot.lane.b32.xlu1 %v4442_v54, %s4116_s17 }
 0xa30   :  { %v1651_v17 = vpop.xlane.xlu2 %1650 }
 0xa31   :  { %v1655_v59 = vmul.f32 %v1651_v17, %v4415_v7 }
 0xa33   :  { %v1657_v60 = vsub.f32 %v1647_v35, %v1655_v59 }
 0xa35   :  { %v1659_v26 = vmul.f32 %v1657_v60, %v1657_v60 }
 0xa37   :  { %v1661_v16 = vsel %vm60_vm0, %v1659_v26, 0.0 }
 0xa38   :  { %1662 = vadd.xlane.f32.xlu0 %v1661_v16 }
 0xa48   :  { %v1654_v62 = vpop.xlane.xlu1 %1653 }
 0xa49   :  { %v1656_v63 = vmul.f32 %v1654_v62, %v4415_v7 }
 0xa4b   :  { %v4666_v5 = vsub.f32 %v1648_v49, %v1656_v63 }
 0xa4c   :  { %1698 = vrot.lane.b32.xlu0 %v4442_v54, %s4117_s18  ;;  %v47_v54 = vld [vmem:[%s5350_s3] sm:$0xff] }
 0xa4d   :  { %v1660_v23 = vmul.f32 %v4666_v5, %v4666_v5  ;;  %1729 = vmatpush.msrb.mxu2 %v47_v54 }
 0xa4f   :  { %v1664_v8 = vsel %vm60_vm0, %v1660_v23, 0.0 }
 0xa50   :  { %1665 = vadd.xlane.f32.xlu2 %v1664_v8 }
 0xa60   :  { %v1694_v53 = vpop.permute.xlu1 %1693 }
 0xa68   :  { %1705 = vrot.lane.b32.xlu2 %v4692_v32, %s4116_s17 }
 0xaab   :  { %v1663_v18 = vpop.xlane.xlu0 %1662 }
 0xaac   :  { %v1667_v28 = vmul.f32 %v1663_v18, %v4415_v7 }
 0xaae   :  { %v1669_v29 = vadd.f32 1e-05, %v1667_v28 }
 0xab0   :  { %3999 = vrsqrt.f32 %v1669_v29  ;;  %vm1677_vm13 = vweird.f32 %v1669_v29 }
 0xab6   :  { %v4000_v47 = vpop.eup %3999 }
 0xab7   :  { %v1672_v12 = vmul.f32 %v4000_v47, %v1669_v29  ;;  %vm1678_vm12 = vweird.f32 %v4000_v47 }
 0xab8   :  { %vm1679_vm14 = vmor %vm1677_vm13, %vm1678_vm12 }
 0xab9   :  { %v1673_v14 = vmul.f32 %v4000_v47, %v1672_v12  ;;  %v4738_v12 = vld [vmem:[%s5349_s2 + $0x70] sm:$0xff] }
 0xaba   :  { %1866 = vmatpush.msrb.mxu0 %v4738_v12 }
 0xabb   :  { %v1674_v15 = vmul.f32 0.5, %v1673_v14  ;;  %v4744_v14 = vld [vmem:[%s5349_s2 + $0x60] sm:$0xff] }
 0xabc   :  { %1867 = vmatpush.msrb.mxu0 %v4744_v14 }
 0xabd   :  { %v1675_v30 = vsub.f32 1.5, %v1674_v15  ;;  %v4750_v15 = vld [vmem:[%s5349_s2 + $0x50] sm:$0xff] }
 0xabe   :  { %v1699_v46 = vpop.permute.xlu0 %1698  ;;  %1868 = vmatpush.msrb.mxu0 %v4750_v15 }
 0xabf   :  { %v1676_v50 = vmul.f32 %v4000_v47, %v1675_v30  ;;  %v4756_v30 = vld [vmem:[%s5349_s2 + $0x40] sm:$0xff] }
 0xac0   :  { %1869 = vmatpush.msrb.mxu0 %v4756_v30 }
 0xac1   :  { %v1680_v42 = vsel %vm1679_vm14, %v4000_v47, %v1676_v50 }
 0xac2   :  { %v1691_v6 = vmul.f32 %v1680_v42, %v1657_v60  ;;  %v3884_v42 = vpack.i.bf16 %v4744_v14, %v4738_v12 }
 0xac3   :  { %v1666_v41 = vpop.xlane.xlu2 %1665 }
 0xac4   :  { %v1668_v34 = vmul.f32 %v1666_v41, %v4415_v7  ;;  %v1696_v45 = vmul.f32 %v1694_v53, %v1691_v6 }
 0xac6   :  { %v1670_v48 = vadd.f32 1e-05, %v1668_v34  ;;  %v1701_v37 = vadd.f32 %v1699_v46, %v1696_v45  ;;  %v3889_v34 = vpack.i.bf16 %v4756_v30, %v4750_v15 }
 0xac8   :  { %4001 = vrsqrt.f32 %v1670_v48  ;;  %3712 = vmatmul.msk.f32.vlgmr.msrb.gmra.mxu2 %vm60_vm0, %v1701_v37  ;;  %vm1687_vm2 = vweird.f32 %v1670_v48 }
 0xacb   :  { %v1706_v43 = vpop.permute.xlu2 %1705 }
 0xace   :  { %v4002_v38 = vpop.eup %4001 }
 0xacf   :  { %v1682_v1 = vmul.f32 %v4002_v38, %v1670_v48  ;;  %vm1688_vm15 = vweird.f32 %v4002_v38 }
 0xad0   :  { %vm1689_vm3 = vmor %vm1687_vm2, %vm1688_vm15 }
 0xad1   :  { %v1683_v21 = vmul.f32 %v4002_v38, %v1682_v1 }
 0xad3   :  { %v1684_v40 = vmul.f32 0.5, %v1683_v21 }
 0xad5   :  { %v1685_v2 = vsub.f32 1.5, %v1684_v40 }
 0xad7   :  { %v1686_v11 = vmul.f32 %v4002_v38, %v1685_v2 }
 0xad9   :  { %v1690_v4 = vsel %vm1689_vm3, %v4002_v38, %v1686_v11 }
 0xada   :  { %v1692_v20 = vmul.f32 %v1690_v4, %v4666_v5 }
 0xadc   :  { %v1697_v56 = vmul.f32 %v1694_v53, %v1692_v20 }
 0xade   :  { %v1702_v0 = vadd.f32 %v1699_v46, %v1697_v56 }
 0xae0   :  { %3713 = vmatmul.msk.f32.gmra.mxu2 %vm60_vm0, %v1702_v0 }
 0xb4b   :  { %v1731_v51 = vpop.f32.mrf.mxu2 }
 0xb4c   :  { %v1732_v35 = vadd.f32 %v1731_v51, %v1706_v43 }
 0xb4e   :  { %v1737_v52 = vmax.f32 %v1732_v35, 0.0 }
 0xb50   :  { %3714 = vmatmul.msk.f32.vlgmr.msrb.gmra.mxu3 %vm1740_vm4, %v1737_v52 }
 0xb63   :  { %v1734_v55 = vpop.f32.mrf.mxu2 }
 0xb64   :  { %v1735_v57 = vadd.f32 %v1734_v55, %v1706_v43  ;;  %v4778_v43 = vld [vmem:[%s5351_s4 + $0x8] sm:$0x1f] }
 0xb65   :  { %v4781_v51 = vperm.slane %v4778_v43, 0 }
 0xb66   :  { %v1738_v49 = vmax.f32 %v1735_v57, 0.0 }
 0xb68   :  { %3715 = vmatmul.msk.f32.gmra.mxu3 %vm1740_vm4, %v1738_v49 }
 0xbd3   :  { %v1764_v17 = vpop.f32.mrf.mxu3 }
 0xbd4   :  { %v1765_v59 = vadd.f32 %v1764_v17, %v1739_v58 }
 0xbd6   :  { %v1770_v60 = vadd.f32 %v1765_v59, %v1701_v37 }
 0xbd8   :  { %v1772_v26 = vsel %vm60_vm0, %v1770_v60, 0.0 }
 0xbd9   :  { %1773 = vadd.xlane.f32.xlu0 %v1772_v26 }
 0xbeb   :  { %v1767_v16 = vpop.f32.mrf.mxu3 }
 0xbec   :  { %v1768_v62 = vadd.f32 %v1767_v16, %v1739_v58 }
 0xbee   :  { %v1771_v63 = vadd.f32 %v1768_v62, %v1702_v0 }
 0xbf0   :  { %v1775_v5 = vsel %vm60_vm0, %v1771_v63, 0.0 }
 0xbf1   :  { %1776 = vadd.xlane.f32.xlu1 %v1775_v5 }
 0xc4c   :  { %v1774_v23 = vpop.xlane.xlu0 %1773 }
 0xc4d   :  { %v1778_v8 = vmul.f32 %v1774_v23, %v4415_v7 }
 0xc4f   :  { %v1780_v10 = vsub.f32 %v1770_v60, %v1778_v8 }
 0xc51   :  { %v1782_v25 = vmul.f32 %v1780_v10, %v1780_v10 }
 0xc53   :  { %v1784_v27 = vsel %vm60_vm0, %v1782_v25, 0.0 }
 0xc54   :  { %1785 = vadd.xlane.f32.xlu2 %v1784_v27 }
 0xc64   :  { %v1777_v54 = vpop.xlane.xlu1 %1776 }
 0xc65   :  { %v1779_v18 = vmul.f32 %v1777_v54, %v4415_v7 }
 0xc67   :  { %v1781_v28 = vsub.f32 %v1771_v63, %v1779_v18 }
 0xc69   :  { %v1783_v29 = vmul.f32 %v1781_v28, %v1781_v28 }
 0xc6b   :  { %v1787_v47 = vsel %vm60_vm0, %v1783_v29, 0.0 }
 0xc6c   :  { %1788 = vadd.xlane.f32.xlu0 %v1787_v47  ;;  %1818 = vrot.lane.b32.xlu2 %v4692_v32, %s4114_s16 }
 0xcc7   :  { %v1786_v50 = vpop.xlane.xlu2 %1785 }
 0xcc8   :  { %v1790_v44 = vmul.f32 %v1786_v50, %v4415_v7 }
 0xcca   :  { %v1792_v33 = vadd.f32 1e-05, %v1790_v44 }
 0xccc   :  { %4003 = vrsqrt.f32 %v1792_v33  ;;  %vm1800_vm6 = vweird.f32 %v1792_v33 }
 0xccf   :  { %v1819_v37 = vpop.permute.xlu2 %1818 }
 0xcd2   :  { %v4004_v61 = vpop.eup %4003 }
 0xcd3   :  { %v1795_v53 = vmul.f32 %v4004_v61, %v1792_v33  ;;  %vm1801_vm5 = vweird.f32 %v4004_v61 }
 0xcd4   :  { %vm1802_vm9 = vmor %vm1800_vm6, %vm1801_vm5 }
 0xcd5   :  { %v1796_v3 = vmul.f32 %v4004_v61, %v1795_v53 }
 0xcd7   :  { %v1797_v41 = vmul.f32 0.5, %v1796_v3 }
 0xcd9   :  { %v1798_v6 = vsub.f32 1.5, %v1797_v41 }
 0xcdb   :  { %v1799_v46 = vmul.f32 %v4004_v61, %v1798_v6 }
 0xcdd   :  { %v1803_v19 = vsel %vm1802_vm9, %v4004_v61, %v1799_v46 }
 0xcde   :  { %v1814_v48 = vmul.f32 %v1803_v19, %v1780_v10 }
 0xcdf   :  { %v1789_v45 = vpop.xlane.xlu0 %1788 }
 0xce0   :  { %v1791_v36 = vmul.f32 %v1789_v45, %v4415_v7  ;;  %v1816_v22 = vmul.f32 %v1814_v48, %v4692_v32 }
 0xce2   :  { %v1793_v38 = vadd.f32 1e-05, %v1791_v36  ;;  %v4766_v1 = vadd.f32 %v1819_v37, %v1816_v22 }
 0xce4   :  { %4005 = vrsqrt.f32 %v1793_v38  ;;  %3737 = vmatmul.msk.f32.vlgmr.msrb.gmra.mxu0 %vm60_vm0, %v4766_v1  ;;  %vm1810_vm11 = vweird.f32 %v1793_v38 }
 0xcea   :  { %v4006_v21 = vpop.eup %4005 }
 0xceb   :  { %v1805_v40 = vmul.f32 %v4006_v21, %v1793_v38  ;;  %vm1811_vm10 = vweird.f32 %v4006_v21 }
 0xcec   :  { %vm1812_vm12 = vmor %vm1810_vm11, %vm1811_vm10 }
 0xced   :  { %v1806_v2 = vmul.f32 %v4006_v21, %v1805_v40 }
 0xcef   :  { %v1807_v11 = vmul.f32 0.5, %v1806_v2 }
 0xcf1   :  { %v1808_v4 = vsub.f32 1.5, %v1807_v11 }
 0xcf3   :  { %v1809_v20 = vmul.f32 %v4006_v21, %v1808_v4 }
 0xcf5   :  { %v1813_v56 = vsel %vm1812_vm12, %v4006_v21, %v1809_v20 }
 0xcf6   :  { %v1815_v0 = vmul.f32 %v1813_v56, %v1781_v28 }
 0xcf8   :  { %v1817_v31 = vmul.f32 %v1815_v0, %v4692_v32 }
 0xcfa   :  { %v4771_v24 = vadd.f32 %v1819_v37, %v1817_v31 }
 0xcfc   :  { %3738 = vmatmul.msk.f32.gmra.mxu0 %vm60_vm0, %v4771_v24 }
 0xd61   :  { %v1871_v35 = vpop.f32.mrf.mxu0 }
 0xd62   :  { %v4784_v52 = vadd.f32 %v1871_v35, %v4781_v51 }
 0xd64   :  { %1879 = vrot.lane.b32.xlu0 %v4784_v52, %s4111_s0  ;;  %1883 = vrot.lane.b32.xlu1 %v4784_v52, %s4113_s15 }
 0xd6c   :  { %1887 = vrot.lane.b32.xlu1 %v4784_v52, %s4112_s1 }
 0xd74   :  { %1891 = vrot.lane.b32.xlu1 %v4784_v52, %s4114_s16 }
 0xd79   :  { %v1874_v32 = vpop.f32.mrf.mxu0 }
 0xd7a   :  { %v4795_v55 = vadd.f32 %v1874_v32, %v4781_v51 }
 0xd7c   :  { %1881 = vrot.lane.b32.xlu0 %v4795_v55, %s4111_s0  ;;  %1885 = vrot.lane.b32.xlu2 %v4795_v55, %s4113_s15 }
 0xd84   :  { %1917 = vrot.lane.b32.xlu0 %v4795_v55, %s4114_s16  ;;  %1889 = vrot.lane.b32.xlu2 %v4795_v55, %s4112_s1 }
 0xdd6   :  { %v4805_v57 = vpop.permute.xlu2 %1885  ;;  %v4807_v49 = vpop.permute.xlu1 %1883 }
 0xdd7   :  { %2021 = vrot.lane.b32.xlu1 %v4805_v57, %s4114_s16  ;;  %v4811_v58 = vpop.permute.xlu0 %1879  ;;  %1995 = vrot.lane.b32.xlu2 %v4807_v49, %s4114_s16 }
 0xdd8   :  { %1943 = vrot.lane.b32.xlu0 %v4811_v58, %s4114_s16 }
 0xdde   :  { %v4817_v17 = vpop.permute.xlu2 %1889  ;;  %v4819_v59 = vpop.permute.xlu1 %1887 }
 0xddf   :  { %2073 = vrot.lane.b32.xlu1 %v4817_v17, %s4114_s16 }
 0xde0   :  { %2047 = vrot.lane.b32.xlu0 %v4819_v59, %s4114_s16 }
 0xde6   :  { %v1892_v60 = vpop.permute.xlu1 %1891 }
 0xde7   :  { %3739 = vmatpush.xpose.msk.msra.mxu1 %vm106_vm1, %v1892_v60 }
 0xdea   :  { %3740 = vmatmul.msk.f32.vlgmr.msra.gmra.mxu1 %vm106_vm1, %v4784_v52 }
 0xdee   :  { %v4828_v26 = vpop.permute.xlu0 %1881 }
 0xdef   :  { %1969 = vrot.lane.b32.xlu2 %v4828_v26, %s4114_s16 }
 0xdf6   :  { %v1918_v16 = vpop.permute.xlu0 %1917 }
 0xdf7   :  { %3741 = vmatpush.xpose.msk.msra.mxu2 %vm106_vm1, %v1918_v16 }
 0xdfa   :  { %3742 = vmatmul.msk.f32.vlgmr.msra.gmra.mxu2 %vm106_vm1, %v4795_v55 }
 0xe31   :  { %v1996_v62 = vpop.permute.xlu2 %1995 }
 0xe32   :  { %3747 = vmatpush.xpose.msk.msrb.mxu2 %vm106_vm1, %v1996_v62  ;;  %v3869_v62 = vpack.i.bf16 %v4811_v58, %v4784_v52 }
 0xe35   :  { %3748 = vmatmul.msk.f32.vlgmr.msrb.gmra.mxu2 %vm106_vm1, %v4807_v49 }
 0xe49   :  { %v2022_v63 = vpop.permute.xlu1 %2021  ;;  %v1970_v5 = vpop.permute.xlu2 %1969 }
 0xe4a   :  { %3745 = vmatpush.xpose.msk.msrb.mxu1 %vm106_vm1, %v1970_v5  ;;  %3749 = vmatpush.xpose.msk.msra.mxu3 %vm106_vm1, %v2022_v63  ;;  %v1944_v23 = vpop.permute.xlu0 %1943 }
 0xe4b   :  { %3743 = vmatpush.xpose.msk.msra.mxu0 %vm106_vm1, %v1944_v23 }
 0xe4d   :  { %3746 = vmatmul.msk.f32.vlgmr.msrb.gmra.mxu1 %vm106_vm1, %v4828_v26  ;;  %3750 = vmatmul.msk.f32.vlgmr.msra.gmra.mxu3 %vm106_vm1, %v4805_v57 }
 0xe4e   :  { %3744 = vmatmul.msk.f32.vlgmr.msra.gmra.mxu0 %vm106_vm1, %v4811_v58 }
 0xe51   :  { %v2074_v8 = vpop.permute.xlu1 %2073 }
 0xe52   :  { %3753 = vmatpush.xpose.msk.msra.mxu1 %vm106_vm1, %v2074_v8  ;;  %v2048_v10 = vpop.permute.xlu0 %2047 }
 0xe53   :  { %3751 = vmatpush.xpose.msk.msrb.mxu0 %vm106_vm1, %v2048_v10 }
 0xe55   :  { %3754 = vmatmul.msk.f32.vlgmr.msra.gmra.mxu1 %vm106_vm1, %v4817_v17 }
 0xe56   :  { %3752 = vmatmul.msk.f32.vlgmr.msrb.gmra.mxu0 %vm106_vm1, %v4819_v59 }
 0xe67   :  { %v1914_v25 = vpop.f32.mrf.mxu1 }
 0xe68   :  { %v2099_v27 = vmul.f32 0.35355338, %v1914_v25  ;;  %v3874_v25 = vpack.i.bf16 %v4807_v49, %v4795_v55 }
 0xe6a   :  { %v2107_v54 = vadd.f32 %v2099_v27, %v4285_v39 }
 0xe6c   :  { %v2115_v18 = vsel %vm106_vm1, %v2107_v54, -inf }
 0xe6d   :  { %2116 = vmax.xlane.f32.xlu2 %v2115_v18 }
 0xe7d   :  { %v1940_v28 = vpop.f32.mrf.mxu2 }
 0xe7e   :  { %v2100_v29 = vmul.f32 0.35355338, %v1940_v28 }
 0xe80   :  { %v2108_v47 = vadd.f32 %v2100_v29, %v4285_v39 }
 0xe82   :  { %v2118_v50 = vsel %vm106_vm1, %v2108_v47, -inf }
 0xe83   :  { %2119 = vmax.xlane.f32.xlu1 %v2118_v50 }
 0xeb8   :  { %v2018_v44 = vpop.f32.mrf.mxu2 }
 0xeb9   :  { %v2103_v33 = vmul.f32 0.35355338, %v2018_v44 }
 0xebb   :  { %v2111_v61 = vadd.f32 %v2103_v33, %v4285_v39 }
 0xebd   :  { %v2127_v53 = vsel %vm106_vm1, %v2111_v61, -inf }
 0xebe   :  { %2128 = vmax.xlane.f32.xlu2 %v2127_v53 }
 0xeca   :  { %v1992_v3 = vpop.f32.mrf.mxu1 }
 0xecb   :  { %v1966_v41 = vpop.f32.mrf.mxu0  ;;  %v2102_v19 = vmul.f32 0.35355338, %v1992_v3 }
 0xecc   :  { %v2101_v6 = vmul.f32 0.35355338, %v1966_v41 }
 0xecd   :  { %v2110_v21 = vadd.f32 %v2102_v19, %v4285_v39 }
 0xece   :  { %v2109_v46 = vadd.f32 %v2101_v6, %v4285_v39 }
 0xecf   :  { %v2124_v20 = vsel %vm106_vm1, %v2110_v21, -inf }
 0xed0   :  { %v2044_v45 = vpop.f32.mrf.mxu3  ;;  %v2121_v48 = vsel %vm106_vm1, %v2109_v46, -inf }
 0xed1   :  { %v2104_v36 = vmul.f32 0.35355338, %v2044_v45  ;;  %2122 = vmax.xlane.f32.xlu0 %v2121_v48 }
 0xed2   :  { %v2096_v40 = vpop.f32.mrf.mxu1 }
 0xed3   :  { %v2070_v37 = vpop.f32.mrf.mxu0  ;;  %v2112_v22 = vadd.f32 %v2104_v36, %v4285_v39  ;;  %v2106_v4 = vmul.f32 0.35355338, %v2096_v40 }
 0xed4   :  { %v2105_v38 = vmul.f32 0.35355338, %v2070_v37 }
 0xed5   :  { %v2130_v2 = vsel %vm106_vm1, %v2112_v22, -inf  ;;  %v2114_v0 = vadd.f32 %v2106_v4, %v4285_v39 }
 0xed6   :  { %2131 = vmax.xlane.f32.xlu2 %v2130_v2  ;;  %v2113_v11 = vadd.f32 %v2105_v38, %v4285_v39 }
 0xed7   :  { %v2136_v31 = vsel %vm106_vm1, %v2114_v0, -inf }
 0xed8   :  { %v2133_v56 = vsel %vm106_vm1, %v2113_v11, -inf }
 0xed9   :  { %2125 = vmax.xlane.f32.xlu0 %v2124_v20  ;;  %2134 = vmax.xlane.f32.xlu1 %v2133_v56 }
 0xee0   :  { %v2117_v35 = vpop.xlane.xlu2 %2116 }
 0xee1   :  { %2137 = vmax.xlane.f32.xlu0 %v2136_v31  ;;  %v2139_v32 = vsub.f32 %v2107_v54, %v2117_v35 }
 0xee3   :  { %v2147_v60 = vmul.f32 1.442695, %v2139_v32 }
 0xee5   :  { %4007 = vpow2.f32 %v2147_v60 }
 0xeeb   :  { %v4869_v16 = vpop.eup %4007 }
 0xeec   :  { %v2163_v63 = vsel %vm106_vm1, %v4869_v16, 0.0 }
 0xeed   :  { %2164 = vadd.xlane.f32.xlu1 %v2163_v63 }
 0xeee   :  { %3870 = vrot.lane.b32.xlu2 %v3869_v62, %s4116_s17 }
 0xef6   :  { %v2120_v5 = vpop.xlane.xlu1 %2119 }
 0xef7   :  { %v2140_v39 = vsub.f32 %v2108_v47, %v2120_v5 }
 0xef9   :  { %v2149_v23 = vmul.f32 1.442695, %v2140_v39 }
 0xefb   :  { %4009 = vpow2.f32 %v2149_v23 }
 0xf01   :  { %v4876_v8 = vpop.eup %4009 }
 0xf02   :  { %v2166_v10 = vsel %vm106_vm1, %v4876_v8, 0.0 }
 0xf03   :  { %2167 = vadd.xlane.f32.xlu0 %v2166_v10 }
 0xf06   :  { %3875 = vrot.lane.b32.xlu1 %v3874_v25, %s4116_s17  ;;  %v3879_v25 = vpack.i.bf16 %v4819_v59, %v4828_v26 }
 0xf31   :  { %v2129_v52 = vpop.xlane.xlu2 %2128 }
 0xf32   :  { %v2143_v58 = vsub.f32 %v2111_v61, %v2129_v52 }
 0xf34   :  { %v2155_v27 = vmul.f32 1.442695, %v2143_v58 }
 0xf36   :  { %4011 = vpow2.f32 %v2155_v27 }
 0xf3c   :  { %v4883_v54 = vpop.eup %4011 }
 0xf3d   :  { %v2175_v18 = vsel %vm106_vm1, %v4883_v54, 0.0 }
 0xf3e   :  { %2176 = vadd.xlane.f32.xlu1 %v2175_v18 }
 0xf44   :  { %v2123_v28 = vpop.xlane.xlu0 %2122 }
 0xf45   :  { %v2141_v29 = vsub.f32 %v2109_v46, %v2123_v28 }
 0xf47   :  { %v2151_v47 = vmul.f32 1.442695, %v2141_v29 }
 0xf49   :  { %4013 = vpow2.f32 %v2151_v47  ;;  %v2132_v50 = vpop.xlane.xlu2 %2131 }
 0xf4a   :  { %v2144_v44 = vsub.f32 %v2112_v22, %v2132_v50 }
 0xf4c   :  { %v2157_v33 = vmul.f32 1.442695, %v2144_v44  ;;  %v2135_v55 = vpop.xlane.xlu1 %2134  ;;  %v2126_v49 = vpop.xlane.xlu0 %2125 }
 0xf4d   :  { %v2145_v53 = vsub.f32 %v2113_v11, %v2135_v55  ;;  %v2142_v3 = vsub.f32 %v2110_v21, %v2126_v49 }
 0xf4e   :  { %4015 = vpow2.f32 %v2157_v33 }
 0xf4f   :  { %v4887_v61 = vpop.eup %4013  ;;  %v2159_v41 = vmul.f32 1.442695, %v2145_v53  ;;  %v2153_v6 = vmul.f32 1.442695, %v2142_v3 }
 0xf50   :  { %v2169_v19 = vsel %vm106_vm1, %v4887_v61, 0.0 }
 0xf51   :  { %4017 = vpow2.f32 %v2159_v41  ;;  %v3871_v45 = vpop.permute.xlu2 %3870  ;;  %2170 = vadd.xlane.f32.xlu2 %v2169_v19 }
 0xf52   :  { %4019 = vpow2.f32 %v2153_v6  ;;  %v3873_v46 = vunpack.i.h.bf16 %v3871_v45  ;;  %v3872_v48 = vunpack.i.l.bf16 %v3871_v45 }
 0xf54   :  { %v4891_v36 = vpop.eup %4015  ;;  %2328 = vmatpush.msra.mxu2 %v3872_v48  ;;  %2380 = vmatpush.msra.mxu0 %v3873_v46  ;;  %v2138_v37 = vpop.xlane.xlu0 %2137 }
 0xf55   :  { %v2146_v22 = vsub.f32 %v2114_v0, %v2138_v37  ;;  %v2178_v38 = vsel %vm106_vm1, %v4891_v36, 0.0 }
 0xf56   :  { %2179 = vadd.xlane.f32.xlu1 %v2178_v38 }
 0xf57   :  { %v4895_v21 = vpop.eup %4017  ;;  %v2161_v40 = vmul.f32 1.442695, %v2146_v22 }
 0xf58   :  { %v4897_v2 = vpop.eup %4019  ;;  %v2181_v11 = vsel %vm106_vm1, %v4895_v21, 0.0 }
 0xf59   :  { %4021 = vpow2.f32 %v2161_v40  ;;  %2182 = vadd.xlane.f32.xlu0 %v2181_v11  ;;  %v2172_v4 = vsel %vm106_vm1, %v4897_v2, 0.0 }
 0xf5a   :  { %2173 = vadd.xlane.f32.xlu2 %v2172_v4 }
 0xf5f   :  { %v4903_v20 = vpop.eup %4021 }
 0xf60   :  { %v2184_v56 = vsel %vm106_vm1, %v4903_v20, 0.0  ;;  %v2165_v0 = vpop.xlane.xlu1 %2164 }
 0xf61   :  { %2185 = vadd.xlane.f32.xlu0 %v2184_v56  ;;  %4023 = vrcp.f32 %v2165_v0  ;;  %v2198_v60 = vand.u32 2147483648, %v2165_v0  ;;  %v2196_v63 = vand.u32 2147483647, %v2165_v0  ;;  %vm2192_vm14 = vweird.f32 %v2165_v0 }
 0xf63   :  { %v2199_v39 = vor.u32 1.1754944e-38, %v2198_v60  ;;  %vm2197_vm2 = vcmp.eq.f32.partialorder %v2196_v63, 8.507059e+37 }
 0xf67   :  { %v4024_v31 = vpop.eup %4023 }
 0xf68   :  { %v2188_v35 = vmul.f32 %v4024_v31, %v2165_v0  ;;  %vm2193_vm13 = vweird.f32 %v4024_v31 }
 0xf69   :  { %vm2194_vm15 = vmor %vm2192_vm14, %vm2193_vm13 }
 0xf6a   :  { %v2189_v32 = vsub.f32 1.0, %v2188_v35 }
 0xf6c   :  { %v2190_v62 = vmul.f32 %v4024_v31, %v2189_v32 }
 0xf6e   :  { %v2191_v5 = vadd.f32 %v4024_v31, %v2190_v62 }
 0xf6f   :  { %2489 = vrot.lane.b32.xlu1 %v4817_v17, %s4116_s17 }
 0xf70   :  { %v2195_v23 = vsel %vm2194_vm15, %v4024_v31, %v2191_v5 }
 0xf71   :  { %v2200_v10 = vsel %vm2197_vm2, %v2199_v39, %v2195_v23 }
 0xf72   :  { %2437 = vrot.lane.b32.xlu2 %v4805_v57, %s4116_s17  ;;  %v2201_v52 = vmul.f32 %v4869_v16, %v2200_v10 }
 0xf74   :  { %3755 = vmatmul.msk.f32.vlgmr.msra.gmra.mxu2 %vm106_vm1, %v2201_v52 }
 0xf75   :  { %3880 = vrot.lane.b32.xlu0 %v3879_v25, %s4116_s17 }
 0xf76   :  { %v2168_v58 = vpop.xlane.xlu0 %2167 }
 0xf77   :  { %4025 = vrcp.f32 %v2168_v58  ;;  %3890 = vrot.lane.b32.xlu1 %v3889_v34, %s4117_s18  ;;  %v2213_v16 = vand.u32 2147483648, %v2168_v58  ;;  %v2211_v29 = vand.u32 2147483647, %v2168_v58  ;;  %vm2207_vm5 = vweird.f32 %v2168_v58 }
 0xf78   :  { %v3876_v17 = vpop.permute.xlu1 %3875 }
 0xf79   :  { %v3878_v27 = vunpack.i.h.bf16 %v3876_v17  ;;  %v3877_v18 = vunpack.i.l.bf16 %v3876_v17  ;;  %v2214_v15 = vor.u32 1.1754944e-38, %v2213_v16  ;;  %vm2212_vm9 = vcmp.eq.f32.partialorder %v2211_v29, 8.507059e+37 }
 0xf7b   :  { %2354 = vmatpush.msrb.mxu3 %v3877_v18  ;;  %2432 = vmatpush.msrb.mxu2 %v3878_v27 }
 0xf7d   :  { %v4026_v57 = vpop.eup %4025  ;;  %3885 = vrot.lane.b32.xlu0 %v3884_v42, %s4117_s18 }
 0xf7e   :  { %v2203_v59 = vmul.f32 %v4026_v57, %v2168_v58  ;;  %vm2208_vm3 = vweird.f32 %v4026_v57 }
 0xf7f   :  { %vm2209_vm6 = vmor %vm2207_vm5, %vm2208_vm3 }
 0xf80   :  { %v2204_v26 = vsub.f32 1.0, %v2203_v59 }
 0xf82   :  { %v2205_v28 = vmul.f32 %v4026_v57, %v2204_v26 }
 0xf84   :  { %v2206_v47 = vadd.f32 %v4026_v57, %v2205_v28 }
 0xf86   :  { %v2210_v30 = vsel %vm2209_vm6, %v4026_v57, %v2206_v47 }
 0xf87   :  { %v2215_v34 = vsel %vm2212_vm9, %v2214_v15, %v2210_v30 }
 0xf88   :  { %v2216_v50 = vmul.f32 %v4876_v8, %v2215_v34 }
 0xf8a   :  { %3756 = vmatmul.msk.f32.vlgmr.msrb.gmra.mxu3 %vm106_vm1, %v2216_v50 }
 0xfb1   :  { %v2177_v44 = vpop.xlane.xlu1 %2176 }
 0xfb2   :  { %4027 = vrcp.f32 %v2177_v44  ;;  %v2258_v33 = vand.u32 2147483648, %v2177_v44  ;;  %v2256_v49 = vand.u32 2147483647, %v2177_v44  ;;  %vm2252_vm11 = vweird.f32 %v2177_v44 }
 0xfb4   :  { %v2259_v3 = vor.u32 1.1754944e-38, %v2258_v33  ;;  %vm2257_vm13 = vcmp.eq.f32.partialorder %v2256_v49, 8.507059e+37 }
 0xfb8   :  { %v4028_v12 = vpop.eup %4027 }
 0xfb9   :  { %v2248_v14 = vmul.f32 %v4028_v12, %v2177_v44  ;;  %vm2253_vm10 = vweird.f32 %v4028_v12 }
 0xfba   :  { %vm2254_vm12 = vmor %vm2252_vm11, %vm2253_vm10 }
 0xfbb   :  { %v2249_v42 = vsub.f32 1.0, %v2248_v14 }
 0xfbd   :  { %v2250_v55 = vmul.f32 %v4028_v12, %v2249_v42 }
 0xfbf   :  { %v2251_v53 = vadd.f32 %v4028_v12, %v2250_v55 }
 0xfc1   :  { %v2255_v41 = vsel %vm2254_vm12, %v4028_v12, %v2251_v53 }
 0xfc2   :  { %v2260_v6 = vsel %vm2257_vm13, %v2259_v3, %v2255_v41 }
 0xfc3   :  { %v2261_v8 = vmul.f32 %v4883_v54, %v2260_v6 }
 0xfc4   :  { %v2171_v19 = vpop.xlane.xlu2 %2170 }
 0xfc5   :  { %4029 = vrcp.f32 %v2171_v19  ;;  %3759 = vmatmul.msk.f32.vlgmr.msrb.gmra.mxu2 %vm106_vm1, %v2261_v8  ;;  %v2226_v40 = vand.u32 2147483647, %v2171_v19  ;;  %v2228_v11 = vand.u32 2147483648, %v2171_v19  ;;  %vm2222_vm15 = vweird.f32 %v2171_v19 }
 0xfc7   :  { %vm2227_vm3 = vcmp.eq.f32.partialorder %v2226_v40, 8.507059e+37  ;;  %v2229_v35 = vor.u32 1.1754944e-38, %v2228_v11 }
 0xfc9   :  { %v2180_v45 = vpop.xlane.xlu1 %2179 }
 0xfca   :  { %4031 = vrcp.f32 %v2180_v45  ;;  %v2271_v63 = vand.u32 2147483647, %v2180_v45  ;;  %v2273_v5 = vand.u32 2147483648, %v2180_v45  ;;  %vm2267_vm6 = vweird.f32 %v2180_v45 }
 0xfcb   :  { %v4030_v46 = vpop.eup %4029 }
 0xfcc   :  { %v2218_v48 = vmul.f32 %v4030_v46, %v2171_v19  ;;  %v4928_v37 = vpop.xlane.xlu0 %2182  ;;  %vm2223_vm14 = vweird.f32 %v4030_v46  ;;  %v2274_v59 = vor.u32 1.1754944e-38, %v2273_v5  ;;  %vm2272_vm10 = vcmp.eq.f32.partialorder %v2271_v63, 8.507059e+37 }
 0xfcd   :  { %v4930_v22 = vpop.xlane.xlu2 %2173  ;;  %4033 = vrcp.f32 %v4928_v37  ;;  %vm2224_vm2 = vmor %vm2222_vm15, %vm2223_vm14  ;;  %vm2282_vm13 = vweird.f32 %v4928_v37  ;;  %v2288_v12 = vand.u32 2147483648, %v4928_v37  ;;  %v2286_v14 = vand.u32 2147483647, %v4928_v37 }
 0xfce   :  { %v2219_v38 = vsub.f32 1.0, %v2218_v48  ;;  %4035 = vrcp.f32 %v4930_v22  ;;  %v2243_v44 = vand.u32 2147483648, %v4930_v22  ;;  %vm2237_vm14 = vweird.f32 %v4930_v22 }
 0xfcf   :  { %v2289_v53 = vor.u32 1.1754944e-38, %v2288_v12 }
 0xfd0   :  { %v4032_v4 = vpop.eup %4031  ;;  %v2220_v54 = vmul.f32 %v4030_v46, %v2219_v38  ;;  %v2244_v49 = vor.u32 1.1754944e-38, %v2243_v44 }
 0xfd1   :  { %v2263_v56 = vmul.f32 %v4032_v4, %v2180_v45  ;;  %vm2268_vm5 = vweird.f32 %v4032_v4 }
 0xfd2   :  { %v2221_v0 = vadd.f32 %v4030_v46, %v2220_v54  ;;  %vm2269_vm9 = vmor %vm2267_vm6, %vm2268_vm5  ;;  %vm2287_vm5 = vcmp.eq.f32.partialorder %v2286_v14, 8.507059e+37 }
 0xfd3   :  { %v4034_v31 = vpop.eup %4033  ;;  %v2264_v32 = vsub.f32 1.0, %v2263_v56 }
 0xfd4   :  { %v4036_v60 = vpop.eup %4035  ;;  %v2225_v62 = vsel %vm2224_vm2, %v4030_v46, %v2221_v0  ;;  %v2278_v39 = vmul.f32 %v4034_v31, %v4928_v37  ;;  %v4935_v23 = vpop.xlane.xlu0 %2185  ;;  %vm2283_vm11 = vweird.f32 %v4034_v31 }
 0xfd5   :  { %v2230_v10 = vsel %vm2227_vm3, %v2229_v35, %v2225_v62  ;;  %v2265_v25 = vmul.f32 %v4032_v4, %v2264_v32  ;;  %v2233_v52 = vmul.f32 %v4036_v60, %v4930_v22  ;;  %v2438_v58 = vpop.permute.xlu2 %2437  ;;  %4037 = vrcp.f32 %v4935_v23  ;;  %vm2284_vm15 = vmor %vm2282_vm13, %vm2283_vm11 }
 0xfd6   :  { %2458 = vmatpush.msra.mxu3 %v2438_v58  ;;  %v2279_v18 = vsub.f32 1.0, %v2278_v39  ;;  %v2231_v57 = vmul.f32 %v4887_v61, %v2230_v10  ;;  %vm2238_vm12 = vweird.f32 %v4036_v60  ;;  %v2303_v8 = vand.u32 2147483648, %v4935_v23 }
 0xfd7   :  { %v2266_v17 = vadd.f32 %v4032_v4, %v2265_v25  ;;  %v2234_v27 = vsub.f32 1.0, %v2233_v52  ;;  %vm2239_vm2 = vmor %vm2237_vm14, %vm2238_vm12  ;;  %v2301_v48 = vand.u32 2147483647, %v4935_v23 }
 0xfd8   :  { %3757 = vmatmul.msk.f32.vlgmr.msra.gmra.mxu0 %vm106_vm1, %v2231_v57  ;;  %v2280_v29 = vmul.f32 %v4034_v31, %v2279_v18  ;;  %v2304_v11 = vor.u32 1.1754944e-38, %v2303_v8 }
 0xfd9   :  { %v2270_v26 = vsel %vm2269_vm9, %v4032_v4, %v2266_v17  ;;  %v2235_v28 = vmul.f32 %v4036_v60, %v2234_v27  ;;  %vm2297_vm9 = vweird.f32 %v4935_v23  ;;  %vm2302_vm11 = vcmp.eq.f32.partialorder %v2301_v48, 8.507059e+37 }
 0xfda   :  { %v2275_v16 = vsel %vm2272_vm10, %v2274_v59, %v2270_v26  ;;  %v2281_v61 = vadd.f32 %v4034_v31, %v2280_v29 }
 0xfdb   :  { %v2276_v47 = vmul.f32 %v4891_v36, %v2275_v16  ;;  %v4038_v15 = vpop.eup %4037  ;;  %v2236_v34 = vadd.f32 %v4036_v60, %v2235_v28  ;;  %v2241_v36 = vand.u32 2147483647, %v4930_v22 }
 0xfdc   :  { %v2293_v30 = vmul.f32 %v4038_v15, %v4935_v23  ;;  %v2285_v33 = vsel %vm2284_vm15, %v4034_v31, %v2281_v61  ;;  %vm2298_vm6 = vweird.f32 %v4038_v15 }
 0xfdd   :  { %3760 = vmatmul.msk.f32.vlgmr.msra.gmra.mxu3 %vm106_vm1, %v2276_v47  ;;  %v2240_v42 = vsel %vm2239_vm2, %v4036_v60, %v2236_v34  ;;  %vm2242_vm3 = vcmp.eq.f32.partialorder %v2241_v36, 8.507059e+37  ;;  %v2290_v41 = vsel %vm2287_vm5, %v2289_v53, %v2285_v33  ;;  %vm2299_vm10 = vmor %vm2297_vm9, %vm2298_vm6  ;;  %v3719_v53 = vld [vmem:[%s5349_s2 + $0x58] sm:$0xff] }
 0xfde   :  { %v2294_v50 = vsub.f32 1.0, %v2293_v30  ;;  %v2245_v3 = vsel %vm2242_vm3, %v2244_v49, %v2240_v42  ;;  %v2291_v22 = vmul.f32 %v4895_v21, %v2290_v41  ;;  %v3717_v41 = vld [vmem:[%s5349_s2 + $0x48] sm:$0xff] }
 0xfdf   :  { %v2246_v37 = vmul.f32 %v4897_v2, %v2245_v3 }
 0xfe0   :  { %v2295_v55 = vmul.f32 %v4038_v15, %v2294_v50 }
 0xfe1   :  { %v2490_v40 = vpop.permute.xlu1 %2489 }
 0xfe2   :  { %v2296_v6 = vadd.f32 %v4038_v15, %v2295_v55  ;;  %v3723_v55 = vld [vmem:[%s5349_s2 + $0x78] sm:$0xff] }
 0xfe3   :  { %2668 = vmatpush.msrb.mxu3 %v3723_v55 }
 0xfe4   :  { %v2300_v38 = vsel %vm2299_vm10, %v4038_v15, %v2296_v6 }
 0xfe5   :  { %v2305_v4 = vsel %vm2302_vm11, %v2304_v11, %v2300_v38 }
 0xfe6   :  { %v2306_v54 = vmul.f32 %v4903_v20, %v2305_v4 }
 0xfe7   :  { %v3881_v19 = vpop.permute.xlu0 %3880 }
 0xfe8   :  { %v3883_v45 = vunpack.i.h.bf16 %v3881_v19  ;;  %v3882_v46 = vunpack.i.l.bf16 %v3881_v19  ;;  %v4999_v19 = vperm.slane %v4778_v43, 2 }
 0xfe9   :  { %v3891_v5 = vpop.permute.xlu1 %3890 }
 0xfea   :  { %2406 = vmatpush.msrb.mxu1 %v3882_v46  ;;  %2484 = vmatpush.msrb.mxu0 %v3883_v45  ;;  %v3893_v39 = vunpack.i.h.bf16 %v3891_v5  ;;  %v3892_v23 = vunpack.i.l.bf16 %v3891_v5  ;;  %v5004_v46 = vpack.i.bf16 %v3717_v41, %v3719_v53  ;;  %v5014_v5 = vperm.slane %v4778_v43, 1 }
 0xfeb   :  { %3758 = vmatmul.msk.f32.vlgmr.msrb.gmra.mxu1 %vm106_vm1, %v2246_v37  ;;  %3761 = vmatmul.msk.f32.vlgmr.msrb.gmra.mxu0 %vm106_vm1, %v2291_v22 }
 0xfec   :  { %2510 = vmatpush.msra.mxu1 %v2490_v40 }
 0xfef   :  { %v3886_v60 = vpop.permute.xlu0 %3885 }
 0xff0   :  { %v3888_v62 = vunpack.i.h.bf16 %v3886_v60  ;;  %v3887_v63 = vunpack.i.l.bf16 %v3886_v60 }
 0xff2   :  { %2583 = vmatpush.msra.mxu2 %v3887_v63 }
 0xff3   :  { %3762 = vmatmul.msk.f32.vlgmr.msra.gmra.mxu1 %vm106_vm1, %v2306_v54 }
 0xff4   :  { %2584 = vmatpush.msra.mxu2 %v3888_v62 }
 0xff6   :  { %2585 = vmatpush.msra.mxu2 %v3892_v23 }
 0xff7   :  { %v2330_v2 = vpop.f32.mrf.mxu2 }
 0xff8   :  { %2586 = vmatpush.msra.mxu2 %v3893_v39 }
0x100d   :  { %v2356_v0 = vpop.f32.mrf.mxu3 }
0x1048   :  { %v2434_v56 = vpop.f32.mrf.mxu2 }
0x1049   :  { %2525 = vrot.lane.b32.xlu0 %v2434_v56, %s4118_s19 }
0x1055   :  { %v2382_v21 = vpop.f32.mrf.mxu0 }
0x1056   :  { %2517 = vrot.lane.b32.xlu2 %v2382_v21, %s4119_s20 }
0x1060   :  { %v2460_v31 = vpop.f32.mrf.mxu3 }
0x1061   :  { %2527 = vrot.lane.b32.xlu0 %v2460_v31, %s4118_s19 }
0x1068   :  { %v2408_v35 = vpop.f32.mrf.mxu1  ;;  %v2486_v32 = vpop.f32.mrf.mxu0 }
0x1069   :  { %2533 = vrot.lane.b32.xlu2 %v2486_v32, %s4120_s21  ;;  %2519 = vrot.lane.b32.xlu1 %v2408_v35, %s4119_s20 }
0x1070   :  { %v2512_v20 = vpop.f32.mrf.mxu1 }
0x1071   :  { %2535 = vrot.lane.b32.xlu2 %v2512_v20, %s4120_s21  ;;  %2562 = vrot.lane.b32.xlu1 %v4781_v51, %s4117_s18 }
0x10b0   :  { %v2518_v10 = vpop.permute.xlu2 %2517 }
0x10b1   :  { %v2539_v52 = vsel %vm106_vm1, %v2330_v2, %v2518_v10 }
0x10bb   :  { %v2526_v25 = vpop.permute.xlu0 %2525 }
0x10bc   :  { %v2541_v58 = vsel %vm755_vm7, %v2539_v52, %v2526_v25 }
0x10c3   :  { %v2534_v17 = vpop.permute.xlu2 %2533 }
0x10c4   :  { %v2543_v27 = vsel %vm758_vm8, %v2541_v58, %v2534_v17 }
0x10c5   :  { %3763 = vmatmul.msk.f32.vlgmr.msra.gmra.mxu2 %vm60_vm0, %v2543_v27 }
0x10cb   :  { %v2536_v59 = vpop.permute.xlu2 %2535 }
0x10d3   :  { %v2528_v18 = vpop.permute.xlu0 %2527 }
0x10db   :  { %v2520_v51 = vpop.permute.xlu1 %2519 }
0x10dc   :  { %v2540_v57 = vsel %vm106_vm1, %v2356_v0, %v2520_v51 }
0x10dd   :  { %v2542_v26 = vsel %vm755_vm7, %v2540_v57, %v2528_v18 }
0x10de   :  { %v2544_v16 = vsel %vm758_vm8, %v2542_v26, %v2536_v59 }
0x10df   :  { %3764 = vmatmul.msk.f32.gmra.mxu2 %vm60_vm0, %v2544_v16 }
0x10e3   :  { %v2563_v28 = vpop.permute.xlu1 %2562 }
0x1148   :  { %v2588_v29 = vpop.f32.mrf.mxu2 }
0x1149   :  { %v2589_v47 = vadd.f32 %v2588_v29, %v2563_v28 }
0x114b   :  { %v2594_v15 = vadd.f32 %v2589_v47, %v4766_v1  ;;  %v3721_v1 = vld [vmem:[%s5349_s2 + $0x68] sm:$0xff] }
0x114c   :  { %2669 = vmatpush.msrb.mxu3 %v3721_v1 }
0x114d   :  { %v2596_v30 = vsel %vm60_vm0, %v2594_v15, 0.0 }
0x114e   :  { %2597 = vadd.xlane.f32.xlu0 %v2596_v30  ;;  %2670 = vmatpush.msrb.mxu3 %v3719_v53 }
0x1150   :  { %2671 = vmatpush.msrb.mxu3 %v3717_v41 }
0x1162   :  { %v2591_v34 = vpop.f32.mrf.mxu2 }
0x1163   :  { %v2592_v61 = vadd.f32 %v2591_v34, %v2563_v28 }
0x1165   :  { %v2595_v50 = vadd.f32 %v2592_v61, %v4771_v24  ;;  %v4987_v24 = vpack.i.bf16 %v3721_v1, %v3723_v55 }
0x1167   :  { %v2599_v44 = vsel %vm60_vm0, %v2595_v50, 0.0 }
0x1168   :  { %2600 = vadd.xlane.f32.xlu2 %v2599_v44 }
0x1180   :  { %3895 = vrot.lane.b32.xlu2 %v4987_v24, %s4114_s16 }
0x1188   :  { %2696 = vrot.lane.b32.xlu2 %v5014_v5, %s4114_s16 }
0x11c1   :  { %v2598_v12 = vpop.xlane.xlu0 %2597 }
0x11c2   :  { %v2602_v36 = vmul.f32 %v2598_v12, %v4415_v7 }
0x11c4   :  { %v2604_v14 = vsub.f32 %v2594_v15, %v2602_v36 }
0x11c6   :  { %v2606_v42 = vmul.f32 %v2604_v14, %v2604_v14 }
0x11c8   :  { %v2608_v33 = vsel %vm60_vm0, %v2606_v42, 0.0 }
0x11c9   :  { %2609 = vadd.xlane.f32.xlu1 %v2608_v33 }
0x11db   :  { %v2601_v49 = vpop.xlane.xlu2 %2600 }
0x11dc   :  { %v2603_v3 = vmul.f32 %v2601_v49, %v4415_v7 }
0x11de   :  { %v2605_v6 = vsub.f32 %v2595_v50, %v2603_v3 }
0x11e0   :  { %v2607_v8 = vmul.f32 %v2605_v6, %v2605_v6 }
0x11e2   :  { %v2611_v45 = vsel %vm60_vm0, %v2607_v8, 0.0  ;;  %2644 = vrot.lane.b32.xlu1 %v4999_v19, %s4114_s16 }
0x11e3   :  { %2612 = vadd.xlane.f32.xlu0 %v2611_v45  ;;  %v3896_v38 = vpop.permute.xlu2 %3895 }
0x11e4   :  { %v3897_v11 = vunpack.i.l.bf16 %v3896_v38  ;;  %v3898_v54 = vunpack.i.h.bf16 %v3896_v38 }
0x11e6   :  { %2711 = vmatpush.msra.mxu0 %v3897_v11 }
0x11e8   :  { %2712 = vmatpush.msra.mxu0 %v3898_v54 }
0x11eb   :  { %v2697_v29 = vpop.permute.xlu2 %2696 }
0x11f7   :  { %3900 = vrot.lane.b32.xlu0 %v5004_v46, %s4114_s16 }
0x123c   :  { %v2610_v48 = vpop.xlane.xlu1 %2609 }
0x123d   :  { %v2614_v37 = vmul.f32 %v2610_v48, %v4415_v7 }
0x123f   :  { %v2616_v22 = vadd.f32 1e-05, %v2614_v37 }
0x1241   :  { %4039 = vrsqrt.f32 %v2616_v22  ;;  %vm2624_vm13 = vweird.f32 %v2616_v22 }
0x1247   :  { %v4040_v40 = vpop.eup %4039 }
0x1248   :  { %v2619_v4 = vmul.f32 %v4040_v40, %v2616_v22  ;;  %vm2625_vm12 = vweird.f32 %v4040_v40 }
0x1249   :  { %vm2626_vm14 = vmor %vm2624_vm13, %vm2625_vm12 }
0x124a   :  { %v2620_v2 = vmul.f32 %v4040_v40, %v2619_v4 }
0x124c   :  { %v2621_v56 = vmul.f32 0.5, %v2620_v2 }
0x124e   :  { %v2622_v21 = vsub.f32 1.5, %v2621_v56 }
0x1250   :  { %v2623_v0 = vmul.f32 %v4040_v40, %v2622_v21 }
0x1252   :  { %v2627_v31 = vsel %vm2626_vm14, %v4040_v40, %v2623_v0 }
0x1253   :  { %v2638_v35 = vmul.f32 %v2627_v31, %v2604_v14 }
0x1254   :  { %v2645_v32 = vpop.permute.xlu1 %2644 }
0x1255   :  { %v2641_v20 = vmul.f32 %v4999_v19, %v2638_v35 }
0x1256   :  { %v2613_v60 = vpop.xlane.xlu0 %2612 }
0x1257   :  { %v5010_v62 = vadd.f32 %v2645_v32, %v2641_v20  ;;  %v2615_v63 = vmul.f32 %v2613_v60, %v4415_v7 }
0x1259   :  { %v2617_v39 = vadd.f32 1e-05, %v2615_v63  ;;  %3765 = vmatmul.msk.f32.vlgmr.msrb.gmra.mxu3 %vm60_vm0, %v5010_v62 }
0x125b   :  { %4041 = vrsqrt.f32 %v2617_v39  ;;  %vm2634_vm2 = vweird.f32 %v2617_v39 }
0x1261   :  { %v4042_v23 = vpop.eup %4041 }
0x1262   :  { %v2629_v10 = vmul.f32 %v4042_v23, %v2617_v39  ;;  %vm2635_vm15 = vweird.f32 %v4042_v23 }
0x1263   :  { %vm2636_vm3 = vmor %vm2634_vm2, %vm2635_vm15 }
0x1264   :  { %v2630_v25 = vmul.f32 %v4042_v23, %v2629_v10 }
0x1266   :  { %v2631_v52 = vmul.f32 0.5, %v2630_v25 }
0x1268   :  { %v2632_v58 = vsub.f32 1.5, %v2631_v52 }
0x1269   :  { %v3901_v17 = vpop.permute.xlu0 %3900 }
0x126a   :  { %v2633_v27 = vmul.f32 %v4042_v23, %v2632_v58  ;;  %v3902_v51 = vunpack.i.l.bf16 %v3901_v17  ;;  %v3903_v18 = vunpack.i.h.bf16 %v3901_v17 }
0x126c   :  { %v2637_v43 = vsel %vm2636_vm3, %v4042_v23, %v2633_v27  ;;  %2713 = vmatpush.msra.mxu0 %v3902_v51 }
0x126d   :  { %v2639_v57 = vmul.f32 %v2637_v43, %v2605_v6 }
0x126e   :  { %2714 = vmatpush.msra.mxu0 %v3903_v18 }
0x126f   :  { %3767 = vmatmul.msk.f32.vlgmr.msra.gmra.mxu0 %vm60_vm0, %v4191_v9  ;;  %v2642_v59 = vmul.f32 %v4999_v19, %v2639_v57 }
0x1271   :  { %v5023_v26 = vadd.f32 %v2645_v32, %v2642_v59 }
0x1273   :  { %3766 = vmatmul.msk.f32.gmra.mxu3 %vm60_vm0, %v5023_v26 }
0x1277   :  { %3768 = vmatmul.msk.f32.gmra.mxu0 %vm60_vm0, %v4203_v13 }
0x12dc   :  { %v2673_v16 = vpop.f32.mrf.mxu3 }
0x12dd   :  { %v2674_v28 = vadd.f32 %v2673_v16, %v5014_v5 }
0x12df   :  { %2724 = vrot.lane.b32.xlu1 %v2674_v28, %s4111_s0 }
0x12ec   :  { %v2716_v47 = vpop.f32.mrf.mxu0 }
0x12ed   :  { %v5031_v15 = vadd.f32 %v2716_v47, %v2697_v29 }
0x12ef   :  { %2738 = vrot.lane.b32.xlu0 %v5031_v15, %s4111_s0  ;;  %3769 = vmatpush.xpose.msk.msrb.mxu1 %vm106_vm1, %v5031_v15 }
0x12f2   :  { %3770 = vmatmul.msk.f32.vlgmr.msrb.gmra.mxu1 %vm106_vm1, %v2674_v28 }
0x12f4   :  { %v2719_v9 = vpop.f32.mrf.mxu0 }
0x12f5   :  { %v5038_v30 = vadd.f32 %v2719_v9, %v2697_v29 }
0x12f6   :  { %v2676_v13 = vpop.f32.mrf.mxu3 }
0x12f7   :  { %v2677_v34 = vadd.f32 %v2676_v13, %v5014_v5  ;;  %2740 = vrot.lane.b32.xlu2 %v5038_v30, %s4111_s0  ;;  %2746 = vrot.lane.b32.xlu0 %v5031_v15, %s4112_s1 }
0x12f8   :  { %3771 = vmatpush.xpose.msk.msra.mxu1 %vm106_vm1, %v5038_v30 }
0x12f9   :  { %2726 = vrot.lane.b32.xlu1 %v2677_v34, %s4111_s0 }
0x12fb   :  { %3772 = vmatmul.msk.f32.vlgmr.msra.gmra.mxu1 %vm106_vm1, %v2677_v34 }
0x12ff   :  { %2732 = vrot.lane.b32.xlu2 %v2674_v28, %s4112_s1  ;;  %2748 = vrot.lane.b32.xlu0 %v5038_v30, %s4112_s1 }
0x1301   :  { %2734 = vrot.lane.b32.xlu1 %v2677_v34, %s4112_s1 }
0x1307   :  { %2742 = vrot.lane.b32.xlu2 %v5031_v15, %s4113_s15  ;;  %2728 = vrot.lane.b32.xlu0 %v2674_v28, %s4113_s15 }
0x1309   :  { %2744 = vrot.lane.b32.xlu1 %v5038_v30, %s4113_s15 }
0x130f   :  { %2730 = vrot.lane.b32.xlu2 %v2677_v34, %s4113_s15 }
0x1351   :  { %v5059_v61 = vpop.permute.xlu2 %2740  ;;  %v2725_v36 = vpop.permute.xlu1 %2724 }
0x1352   :  { %3775 = vmatpush.xpose.msk.msra.mxu3 %vm106_vm1, %v5059_v61 }
0x1359   :  { %v2733_v50 = vpop.permute.xlu2 %2732 }
0x1361   :  { %v5063_v44 = vpop.permute.xlu2 %2742  ;;  %v5065_v12 = vpop.permute.xlu0 %2738 }
0x1362   :  { %3773 = vmatpush.xpose.msk.msrb.mxu2 %vm106_vm1, %v5065_v12  ;;  %3777 = vmatpush.xpose.msk.msrb.mxu0 %vm106_vm1, %v5063_v44  ;;  %v3904_v59 = vpack.i.bf16 %v5031_v15, %v5065_v12 }
0x1365   :  { %3774 = vmatmul.msk.f32.vlgmr.msrb.gmra.mxu2 %vm106_vm1, %v2725_v36 }
0x1369   :  { %v5072_v14 = vpop.permute.xlu0 %2746  ;;  %v2731_v37 = vpop.permute.xlu2 %2730 }
0x136a   :  { %v3909_v42 = vpack.i.bf16 %v5072_v14, %v5059_v61  ;;  %3781 = vmatpush.xpose.msk.msra.mxu2 %vm106_vm1, %v5072_v14 }
0x136b   :  { %v2727_v33 = vpop.permute.xlu1 %2726 }
0x136c   :  { %3776 = vmatmul.msk.f32.vlgmr.msra.gmra.mxu3 %vm106_vm1, %v2727_v33 }
0x136d   :  { %3782 = vmatmul.msk.f32.vlgmr.msra.gmra.mxu2 %vm106_vm1, %v2733_v50 }
0x136f   :  { %v2771_v1 = vpop.f32.mrf.mxu1 }
0x1370   :  { %v2942_v55 = vmul.f32 0.35355338, %v2771_v1 }
0x1371   :  { %v2749_v49 = vpop.permute.xlu0 %2748 }
0x1372   :  { %3783 = vmatpush.xpose.msk.msrb.mxu3 %vm106_vm1, %v2749_v49  ;;  %v2950_v53 = vsel %vm106_vm1, %v2942_v55, -inf }
0x1373   :  { %v2735_v3 = vpop.permute.xlu1 %2734  ;;  %2951 = vmax.xlane.f32.xlu1 %v2950_v53 }
0x1375   :  { %3784 = vmatmul.msk.f32.vlgmr.msrb.gmra.mxu3 %vm106_vm1, %v2735_v3 }
0x1378   :  { %v2795_v41 = vpop.f32.mrf.mxu1 }
0x1379   :  { %v2943_v6 = vmul.f32 0.35355338, %v2795_v41  ;;  %v2729_v8 = vpop.permute.xlu0 %2728 }
0x137a   :  { %3778 = vmatmul.msk.f32.vlgmr.msrb.gmra.mxu0 %vm106_vm1, %v2729_v8 }
0x137b   :  { %v2745_v45 = vpop.permute.xlu1 %2744  ;;  %v2953_v48 = vsel %vm106_vm1, %v2943_v6, -inf }
0x137c   :  { %2954 = vmax.xlane.f32.xlu1 %v2953_v48  ;;  %3779 = vmatpush.xpose.msk.msrb.mxu1 %vm106_vm1, %v2745_v45 }
0x137f   :  { %3780 = vmatmul.msk.f32.vlgmr.msrb.gmra.mxu1 %vm106_vm1, %v2731_v37 }
0x13e6   :  { %v2952_v11 = vpop.xlane.xlu1 %2951 }
0x13e7   :  { %v2974_v21 = vsub.f32 %v2942_v55, %v2952_v11 }
0x13e8   :  { %v2819_v22 = vpop.f32.mrf.mxu2 }
0x13e9   :  { %v2944_v38 = vmul.f32 0.35355338, %v2819_v22  ;;  %v2982_v35 = vmul.f32 1.442695, %v2974_v21 }
0x13eb   :  { %v2956_v40 = vsel %vm106_vm1, %v2944_v38, -inf  ;;  %4043 = vpow2.f32 %v2982_v35 }
0x13ec   :  { %2957 = vmax.xlane.f32.xlu0 %v2956_v40 }
0x13ef   :  { %v2843_v4 = vpop.f32.mrf.mxu3  ;;  %v2955_v32 = vpop.xlane.xlu1 %2954 }
0x13f0   :  { %v5088_v54 = vmul.f32 0.35355338, %v2843_v4  ;;  %v2915_v2 = vpop.f32.mrf.mxu2  ;;  %v2975_v23 = vsub.f32 %v2943_v6, %v2955_v32 }
0x13f1   :  { %v2948_v56 = vmul.f32 0.35355338, %v2915_v2  ;;  %v5096_v51 = vpop.eup %4043 }
0x13f2   :  { %v2959_v0 = vsel %vm106_vm1, %v5088_v54, -inf  ;;  %v2984_v17 = vmul.f32 1.442695, %v2975_v23  ;;  %v2998_v43 = vsel %vm106_vm1, %v5096_v51, 0.0 }
0x13f3   :  { %2960 = vmax.xlane.f32.xlu2 %v2959_v0  ;;  %v2968_v31 = vsel %vm106_vm1, %v2948_v56, -inf }
0x13f4   :  { %2969 = vmax.xlane.f32.xlu0 %v2968_v31  ;;  %4045 = vpow2.f32 %v2984_v17 }
0x13f7   :  { %v2867_v20 = vpop.f32.mrf.mxu0 }
0x13f8   :  { %v2946_v60 = vmul.f32 0.35355338, %v2867_v20  ;;  %v2939_v63 = vpop.f32.mrf.mxu3 }
0x13f9   :  { %v2949_v39 = vmul.f32 0.35355338, %v2939_v63 }
0x13fa   :  { %v2962_v10 = vsel %vm106_vm1, %v2946_v60, -inf  ;;  %v5100_v18 = vpop.eup %4045 }
0x13fb   :  { %2963 = vmax.xlane.f32.xlu2 %v2962_v10  ;;  %v2971_v25 = vsel %vm106_vm1, %v2949_v39, -inf  ;;  %v3001_v57 = vsel %vm106_vm1, %v5100_v18, 0.0 }
0x13fc   :  { %2972 = vmax.xlane.f32.xlu0 %v2971_v25  ;;  %v2891_v52 = vpop.f32.mrf.mxu1 }
0x13fd   :  { %v2947_v58 = vmul.f32 0.35355338, %v2891_v52 }
0x13ff   :  { %v2965_v27 = vsel %vm106_vm1, %v2947_v58, -inf }
0x1400   :  { %2966 = vmax.xlane.f32.xlu1 %v2965_v27  ;;  %v3914_v27 = vpack.i.bf16 %v5063_v44, %v5038_v30 }
0x1404   :  { %2999 = vadd.xlane.f32.xlu0 %v2998_v43 }
0x140c   :  { %3002 = vadd.xlane.f32.xlu0 %v3001_v57 }
0x1420   :  { %3905 = vrot.lane.b32.xlu0 %v3904_v59, %s4114_s16 }
0x1428   :  { %3324 = vrot.lane.b32.xlu0 %v2749_v49, %s4114_s16 }
0x1430   :  { %3272 = vrot.lane.b32.xlu0 %v2745_v45, %s4114_s16 }
0x145f   :  { %v2958_v16 = vpop.xlane.xlu0 %2957 }
0x1460   :  { %v2976_v28 = vsub.f32 %v2944_v38, %v2958_v16 }
0x1462   :  { %v2986_v29 = vmul.f32 1.442695, %v2976_v28 }
0x1464   :  { %4047 = vpow2.f32 %v2986_v29 }
0x1466   :  { %v2961_v47 = vpop.xlane.xlu2 %2960 }
0x1467   :  { %v2970_v9 = vpop.xlane.xlu0 %2969  ;;  %v2977_v37 = vsub.f32 %v5088_v54, %v2961_v47 }
0x1468   :  { %v2980_v13 = vsub.f32 %v2948_v56, %v2970_v9 }
0x1469   :  { %v2988_v11 = vmul.f32 1.442695, %v2977_v37 }
0x146a   :  { %v5109_v34 = vpop.eup %4047  ;;  %v2994_v50 = vmul.f32 1.442695, %v2980_v13 }
0x146b   :  { %v3004_v36 = vsel %vm106_vm1, %v5109_v34, 0.0 }
0x146c   :  { %4049 = vpow2.f32 %v2994_v50  ;;  %3005 = vadd.xlane.f32.xlu2 %v3004_v36 }
0x146e   :  { %v2964_v15 = vpop.xlane.xlu2 %2963 }
0x146f   :  { %v2978_v12 = vsub.f32 %v2946_v60, %v2964_v15  ;;  %v2973_v33 = vpop.xlane.xlu0 %2972 }
0x1470   :  { %v2981_v1 = vsub.f32 %v2949_v39, %v2973_v33 }
0x1471   :  { %v2990_v55 = vmul.f32 1.442695, %v2978_v12 }
0x1472   :  { %v5113_v49 = vpop.eup %4049  ;;  %v2996_v53 = vmul.f32 1.442695, %v2981_v1 }
0x1473   :  { %4051 = vpow2.f32 %v2990_v55  ;;  %v2967_v3 = vpop.xlane.xlu1 %2966  ;;  %v3016_v41 = vsel %vm106_vm1, %v5113_v49, 0.0 }
0x1474   :  { %4053 = vpow2.f32 %v2996_v53  ;;  %v2979_v6 = vsub.f32 %v2947_v58, %v2967_v3  ;;  %3017 = vadd.xlane.f32.xlu2 %v3016_v41 }
0x1476   :  { %v2992_v8 = vmul.f32 1.442695, %v2979_v6 }
0x1477   :  { %v3000_v45 = vpop.xlane.xlu0 %2999 }
0x1478   :  { %4055 = vpow2.f32 %v2992_v8  ;;  %v3033_v60 = vand.u32 2147483648, %v3000_v45  ;;  %vm3027_vm6 = vweird.f32 %v3000_v45  ;;  %v3031_v63 = vand.u32 2147483647, %v3000_v45 }
0x1479   :  { %v5117_v48 = vpop.eup %4051  ;;  %4057 = vrcp.f32 %v3000_v45 }
0x147a   :  { %v5120_v22 = vpop.eup %4053  ;;  %v3010_v38 = vsel %vm106_vm1, %v5117_v48, 0.0  ;;  %4059 = vpow2.f32 %v2988_v11  ;;  %v3034_v23 = vor.u32 1.1754944e-38, %v3033_v60  ;;  %vm3032_vm10 = vcmp.eq.f32.partialorder %v3031_v63, 8.507059e+37 }
0x147b   :  { %3011 = vadd.xlane.f32.xlu1 %v3010_v38  ;;  %v3019_v40 = vsel %vm106_vm1, %v5120_v22, 0.0 }
0x147c   :  { %3020 = vadd.xlane.f32.xlu2 %v3019_v40 }
0x147e   :  { %v5126_v4 = vpop.eup %4055 }
0x147f   :  { %v4058_v2 = vpop.eup %4057  ;;  %v3013_v54 = vsel %vm106_vm1, %v5126_v4, 0.0  ;;  %v5132_v32 = vpop.xlane.xlu0 %3002 }
0x1480   :  { %v3023_v56 = vmul.f32 %v4058_v2, %v3000_v45  ;;  %v5130_v31 = vpop.eup %4059  ;;  %vm3028_vm5 = vweird.f32 %v4058_v2 }
0x1481   :  { %v3007_v20 = vsel %vm106_vm1, %v5130_v31, 0.0  ;;  %vm3029_vm9 = vmor %vm3027_vm6, %vm3028_vm5 }
0x1482   :  { %v3024_v21 = vsub.f32 1.0, %v3023_v56 }
0x1483   :  { %3014 = vadd.xlane.f32.xlu1 %v3013_v54 }
0x1484   :  { %v3025_v0 = vmul.f32 %v4058_v2, %v3024_v21 }
0x1486   :  { %v3026_v35 = vadd.f32 %v4058_v2, %v3025_v0 }
0x1488   :  { %v3030_v39 = vsel %vm3029_vm9, %v4058_v2, %v3026_v35  ;;  %vm3042_vm9 = vweird.f32 %v5132_v32 }
0x1489   :  { %v3035_v10 = vsel %vm3032_vm10, %v3034_v23, %v3030_v39 }
0x148a   :  { %v3036_v17 = vmul.f32 %v5096_v51, %v3035_v10 }
0x148b   :  { %3008 = vadd.xlane.f32.xlu1 %v3007_v20 }
0x1492   :  { %v3906_v25 = vpop.permute.xlu0 %3905 }
0x1493   :  { %v3908_v52 = vunpack.i.h.bf16 %v3906_v25  ;;  %v3907_v58 = vunpack.i.l.bf16 %v3906_v25 }
0x1494   :  { %3910 = vrot.lane.b32.xlu2 %v3909_v42, %s4114_s16 }
0x1495   :  { %3163 = vmatpush.msra.mxu0 %v3908_v52  ;;  %3215 = vmatpush.msrb.mxu2 %v3907_v58 }
0x1496   :  { %3785 = vmatmul.msk.f32.vlgmr.msra.gmra.mxu0 %vm106_vm1, %v3036_v17 }
0x149a   :  { %v3325_v38 = vpop.permute.xlu0 %3324 }
0x149c   :  { %3920 = vrot.lane.b32.xlu2 %v4987_v24, %s4117_s18 }
0x14a4   :  { %3915 = vrot.lane.b32.xlu1 %v3914_v27, %s4114_s16 }
0x14ac   :  { %3925 = vrot.lane.b32.xlu1 %v5004_v46, %s4117_s18 }
0x14df   :  { %v3006_v43 = vpop.xlane.xlu2 %3005 }
0x14e0   :  { %4061 = vrcp.f32 %v3006_v43  ;;  %v3063_v61 = vand.u32 2147483648, %v3006_v43  ;;  %v3061_v42 = vand.u32 2147483647, %v3006_v43  ;;  %vm3057_vm12 = vweird.f32 %v3006_v43 }
0x14e2   :  { %v3064_v47 = vor.u32 1.1754944e-38, %v3063_v61  ;;  %vm3062_vm14 = vcmp.eq.f32.partialorder %v3061_v42, 8.507059e+37 }
0x14e6   :  { %v4062_v57 = vpop.eup %4061 }
0x14e7   :  { %v3053_v59 = vmul.f32 %v4062_v57, %v3006_v43  ;;  %v3018_v16 = vpop.xlane.xlu2 %3017  ;;  %vm3058_vm11 = vweird.f32 %v4062_v57 }
0x14e8   :  { %4063 = vrcp.f32 %v3018_v16  ;;  %vm3059_vm13 = vmor %vm3057_vm12, %vm3058_vm11  ;;  %v3123_v15 = vand.u32 2147483648, %v3018_v16  ;;  %v3121_v1 = vand.u32 2147483647, %v3018_v16  ;;  %vm3117_vm2 = vweird.f32 %v3018_v16 }
0x14e9   :  { %v3054_v28 = vsub.f32 1.0, %v3053_v59  ;;  %4065 = vrcp.f32 %v5132_v32  ;;  %v3048_v59 = vand.u32 2147483648, %v5132_v32 }
0x14ea   :  { %v3124_v53 = vor.u32 1.1754944e-38, %v3123_v15  ;;  %vm3122_vm5 = vcmp.eq.f32.partialorder %v3121_v1, 8.507059e+37 }
0x14eb   :  { %v3055_v14 = vmul.f32 %v4062_v57, %v3054_v28  ;;  %v3049_v1 = vor.u32 1.1754944e-38, %v3048_v59 }
0x14ed   :  { %v3056_v51 = vadd.f32 %v4062_v57, %v3055_v14 }
0x14ee   :  { %v4064_v29 = vpop.eup %4063  ;;  %v5145_v9 = vpop.xlane.xlu1 %3011 }
0x14ef   :  { %v3060_v30 = vsel %vm3059_vm13, %v4062_v57, %v3056_v51  ;;  %v3113_v44 = vmul.f32 %v4064_v29, %v3018_v16  ;;  %v5147_v13 = vpop.xlane.xlu2 %3020  ;;  %vm3118_vm15 = vweird.f32 %v4064_v29  ;;  %4067 = vrcp.f32 %v5145_v9  ;;  %v5158_v40 = vpop.eup %4065 }
0x14f0   :  { %v3065_v50 = vsel %vm3062_vm14, %v3064_v47, %v3060_v30  ;;  %vm3119_vm3 = vmor %vm3117_vm2, %vm3118_vm15  ;;  %4069 = vrcp.f32 %v5147_v13  ;;  %v3038_v21 = vmul.f32 %v5158_v40, %v5132_v32  ;;  %v3046_v57 = vand.u32 2147483647, %v5132_v32 }
0x14f1   :  { %v3114_v36 = vsub.f32 1.0, %v3113_v44  ;;  %v3066_v12 = vmul.f32 %v5109_v34, %v3065_v50  ;;  %vm3043_vm11 = vweird.f32 %v5158_v40  ;;  %v3091_v50 = vand.u32 2147483647, %v5145_v9 }
0x14f2   :  { %v3039_v35 = vsub.f32 1.0, %v3038_v21  ;;  %vm5184_vm2 = vmor %vm3042_vm9, %vm3043_vm11  ;;  %v3136_v32 = vand.u32 2147483647, %v5147_v13 }
0x14f3   :  { %v3115_v33 = vmul.f32 %v4064_v29, %v3114_v36  ;;  %3787 = vmatmul.msk.f32.vlgmr.msrb.gmra.mxu2 %vm106_vm1, %v3066_v12  ;;  %v3138_v36 = vand.u32 2147483648, %v5147_v13  ;;  %vm3092_vm11 = vcmp.eq.f32.partialorder %v3091_v50, 8.507059e+37 }
0x14f4   :  { %v3040_v10 = vmul.f32 %v5158_v40, %v3039_v35 }
0x14f5   :  { %v3116_v55 = vadd.f32 %v4064_v29, %v3115_v33  ;;  %v5160_v11 = vpop.eup %4067 }
0x14f6   :  { %v5151_v3 = vpop.xlane.xlu1 %3014  ;;  %v4070_v56 = vpop.eup %4069  ;;  %v3083_v54 = vmul.f32 %v5160_v11, %v5145_v9  ;;  %v3041_v28 = vadd.f32 %v5158_v40, %v3040_v10  ;;  %vm3088_vm12 = vweird.f32 %v5160_v11 }
0x14f7   :  { %v3120_v41 = vsel %vm3119_vm3, %v4064_v29, %v3116_v55  ;;  %v3911_v6 = vpop.permute.xlu2 %3910  ;;  %v3093_v29 = vand.u32 2147483648, %v5145_v9  ;;  %vm3133_vm15 = vweird.f32 %v4070_v56  ;;  %vm3087_vm3 = vweird.f32 %v5145_v9 }
0x14f8   :  { %v3125_v8 = vsel %vm3122_vm5, %v3124_v53, %v3120_v41  ;;  %v3913_v34 = vunpack.i.h.bf16 %v3911_v6  ;;  %v3912_v45 = vunpack.i.l.bf16 %v3911_v6  ;;  %v3084_v20 = vsub.f32 1.0, %v3083_v54  ;;  %vm5194_vm5 = vmor %vm3087_vm3, %vm3088_vm12  ;;  %v3273_v54 = vpop.permute.xlu0 %3272 }
0x14f9   :  { %v3126_v37 = vmul.f32 %v5113_v49, %v3125_v8  ;;  %v3128_v49 = vmul.f32 %v4070_v56, %v5147_v13  ;;  %v3045_v33 = vsel %vm5184_vm2, %v5158_v40, %v3041_v28  ;;  %v3094_v55 = vor.u32 1.1754944e-38, %v3093_v29 }
0x14fa   :  { %3241 = vmatpush.msra.mxu3 %v3912_v45  ;;  %3319 = vmatpush.msra.mxu2 %v3913_v34  ;;  %v3085_v25 = vmul.f32 %v5160_v11, %v3084_v20  ;;  %v3139_v41 = vor.u32 1.1754944e-38, %v3138_v36  ;;  %vm3137_vm12 = vcmp.eq.f32.partialorder %v3136_v32, 8.507059e+37 }
0x14fb   :  { %3791 = vmatmul.msk.f32.vlgmr.msra.gmra.mxu2 %vm106_vm1, %v3126_v37  ;;  %v3129_v39 = vsub.f32 1.0, %v3128_v49  ;;  %v3108_v37 = vand.u32 2147483648, %v5151_v3 }
0x14fc   :  { %3345 = vmatpush.msrb.mxu3 %v3325_v38  ;;  %v3086_v14 = vadd.f32 %v5160_v11, %v3085_v25 }
0x14fd   :  { %v3130_v43 = vmul.f32 %v4070_v56, %v3129_v39 }
0x14fe   :  { %v3009_v2 = vpop.xlane.xlu1 %3008  ;;  %v3090_v9 = vsel %vm5194_vm5, %v5160_v11, %v3086_v14  ;;  %v3106_v11 = vand.u32 2147483647, %v5151_v3 }
0x14ff   :  { %4071 = vrcp.f32 %v3009_v2  ;;  %v3078_v52 = vand.u32 2147483648, %v3009_v2  ;;  %v3076_v27 = vand.u32 2147483647, %v3009_v2  ;;  %vm3072_vm10 = vweird.f32 %v3009_v2  ;;  %v3921_v46 = vpop.permute.xlu2 %3920 }
0x1500   :  { %4073 = vrcp.f32 %v5151_v3  ;;  %v3131_v47 = vadd.f32 %v4070_v56, %v3130_v43  ;;  %v3095_v6 = vsel %vm3092_vm11, %v3094_v55, %v3090_v9  ;;  %vm3107_vm2 = vcmp.eq.f32.partialorder %v3106_v11, 8.507059e+37 }
0x1501   :  { %v3079_v61 = vor.u32 1.1754944e-38, %v3078_v52  ;;  %vm3077_vm14 = vcmp.eq.f32.partialorder %v3076_v27, 8.507059e+37  ;;  %v3923_v39 = vunpack.i.h.bf16 %v3921_v46 }
0x1505   :  { %v4072_v0 = vpop.eup %4071 }
0x1506   :  { %v3068_v60 = vmul.f32 %v4072_v0, %v3009_v2  ;;  %v5168_v63 = vpop.eup %4073  ;;  %vm3073_vm6 = vweird.f32 %v4072_v0 }
0x1507   :  { %v3098_v58 = vmul.f32 %v5168_v63, %v5151_v3  ;;  %vm3074_vm13 = vmor %vm3072_vm10, %vm3073_vm6  ;;  %vm3132_vm6 = vweird.f32 %v5147_v13  ;;  %vm3047_vm10 = vcmp.eq.f32.partialorder %v3046_v57, 8.507059e+37 }
0x1508   :  { %v3069_v23 = vsub.f32 1.0, %v3068_v60  ;;  %vm3134_vm9 = vmor %vm3132_vm6, %vm3133_vm15  ;;  %v3050_v13 = vsel %vm3047_vm10, %v3049_v1, %v3045_v33 }
0x1509   :  { %v3099_v42 = vsub.f32 1.0, %v3098_v58  ;;  %v3135_v53 = vsel %vm3134_vm9, %v4070_v56, %v3131_v47  ;;  %v3051_v2 = vmul.f32 %v5100_v18, %v3050_v13  ;;  %v3096_v56 = vmul.f32 %v5117_v48, %v3095_v6 }
0x150a   :  { %v3070_v17 = vmul.f32 %v4072_v0, %v3069_v23  ;;  %v3140_v8 = vsel %vm3137_vm12, %v3139_v41, %v3135_v53  ;;  %v3922_v23 = vunpack.i.l.bf16 %v3921_v46 }
0x150b   :  { %v3141_v21 = vmul.f32 %v5120_v22, %v3140_v8 }
0x150c   :  { %v3071_v16 = vadd.f32 %v4072_v0, %v3070_v17 }
0x150e   :  { %v3075_v51 = vsel %vm3074_vm13, %v4072_v0, %v3071_v16  ;;  %vm3103_vm13 = vweird.f32 %v5168_v63  ;;  %v3109_v0 = vor.u32 1.1754944e-38, %v3108_v37  ;;  %v3726_v37 = vld [vmem:[%s5350_s3 + $0x68] sm:$0xff] }
0x150f   :  { %v3080_v30 = vsel %vm3077_vm14, %v3079_v61, %v3075_v51  ;;  %vm3102_vm14 = vweird.f32 %v5151_v3 }
0x1510   :  { %v3081_v15 = vmul.f32 %v5130_v31, %v3080_v30  ;;  %v3100_v31 = vmul.f32 %v5168_v63, %v3099_v42  ;;  %vm3104_vm15 = vmor %vm3102_vm14, %vm3103_vm13 }
0x1512   :  { %3788 = vmatmul.msk.f32.vlgmr.msra.gmra.mxu3 %vm106_vm1, %v3081_v15  ;;  %v3101_v34 = vadd.f32 %v5168_v63, %v3100_v31 }
0x1513   :  { %v3165_v35 = vpop.f32.mrf.mxu0 }
0x1514   :  { %v3105_v49 = vsel %vm3104_vm15, %v5168_v63, %v3101_v34  ;;  %v3728_v34 = vld [vmem:[%s5350_s3 + $0x78] sm:$0xff] }
0x1515   :  { %v3110_v18 = vsel %vm3107_vm2, %v3109_v0, %v3105_v49  ;;  %v3736_v49 = vld [vmem:[%s5350_s3 + $0xb8] sm:$0xff]  ;;  %v3735_v0 = vld [vmem:[%s5350_s3 + $0xb0] sm:$0xff] }
0x1516   :  { %v3916_v45 = vpop.permute.xlu1 %3915  ;;  %v3111_v48 = vmul.f32 %v5126_v4, %v3110_v18  ;;  %3531 = vmatpush.msrb.mxu2 %v3736_v49  ;;  %v3734_v18 = vld [vmem:[%s5350_s3 + $0xa8] sm:$0xff] }
0x1517   :  { %v3918_v38 = vunpack.i.h.bf16 %v3916_v45  ;;  %v3917_v40 = vunpack.i.l.bf16 %v3916_v45  ;;  %v3727_v45 = vld [vmem:[%s5350_s3 + $0x70] sm:$0xff] }
0x1518   :  { %3532 = vmatpush.msrb.mxu2 %v3735_v0 }
0x1519   :  { %3189 = vmatpush.msra.mxu1 %v3917_v40  ;;  %3267 = vmatpush.msrb.mxu0 %v3918_v38  ;;  %v3725_v38 = vld [vmem:[%s5350_s3 + $0x60] sm:$0xff] }
0x151a   :  { %3786 = vmatmul.msk.f32.vlgmr.msra.gmra.mxu1 %vm106_vm1, %v3051_v2  ;;  %3789 = vmatmul.msk.f32.vlgmr.msrb.gmra.mxu0 %vm106_vm1, %v3096_v56  ;;  %v5274_v56 = vld [vmem:[%s5351_s4 + $0x8] sm:$0x1f] }
0x151b   :  { %3293 = vmatpush.msrb.mxu1 %v3273_v54  ;;  %3792 = vmatmul.msk.f32.vlgmr.msrb.gmra.mxu3 %vm106_vm1, %v3141_v21  ;;  %v5277_v21 = vperm.slane %v5274_v56, 3 }
0x151c   :  { %3413 = vmatpush.msra.mxu0 %v3922_v23  ;;  %3533 = vmatpush.msrb.mxu2 %v3734_v18 }
0x151d   :  { %3503 = vmatpush.msra.mxu1 %v3728_v34 }
0x151e   :  { %v3926_v10 = vpop.permute.xlu1 %3925  ;;  %3414 = vmatpush.msra.mxu0 %v3923_v39 }
0x151f   :  { %v3927_v25 = vunpack.i.l.bf16 %v3926_v10  ;;  %v3928_v52 = vunpack.i.h.bf16 %v3926_v10  ;;  %3504 = vmatpush.msra.mxu1 %v3727_v45 }
0x1521   :  { %3415 = vmatpush.msra.mxu0 %v3927_v25  ;;  %3505 = vmatpush.msra.mxu1 %v3726_v37  ;;  %v3602_v37 = vld [vmem:[%s5352_s5 + $0x18] sm:$0xff] }
0x1522   :  { %3790 = vmatmul.msk.f32.vlgmr.msrb.gmra.mxu1 %vm106_vm1, %v3111_v48  ;;  %3623 = vmatpush.msra.mxu3 %v3602_v37 }
0x1523   :  { %3416 = vmatpush.msra.mxu0 %v3928_v52  ;;  %3506 = vmatpush.msra.mxu1 %v3725_v38  ;;  %v3600_v38 = vld [vmem:[%s5352_s5 + $0x8] sm:$0xff] }
0x1576   :  { %v3217_v22 = vpop.f32.mrf.mxu2 }
0x1577   :  { %3352 = vrot.lane.b32.xlu0 %v3217_v22, %s4119_s20 }
0x157e   :  { %v3321_v3 = vpop.f32.mrf.mxu2 }
0x157f   :  { %3368 = vrot.lane.b32.xlu0 %v3321_v3, %s4120_s21 }
0x1595   :  { %v3243_v20 = vpop.f32.mrf.mxu3 }
0x1596   :  { %3354 = vrot.lane.b32.xlu1 %v3243_v20, %s4119_s20 }
0x1597   :  { %v3191_v60 = vpop.f32.mrf.mxu1  ;;  %v3269_v4 = vpop.f32.mrf.mxu0 }
0x1598   :  { %3360 = vrot.lane.b32.xlu2 %v3269_v4, %s4118_s19 }
0x159e   :  { %v3347_v63 = vpop.f32.mrf.mxu3  ;;  %3392 = vrot.lane.b32.xlu1 %v5014_v5, %s4117_s18 }
0x159f   :  { %3370 = vrot.lane.b32.xlu0 %v3347_v63, %s4120_s21  ;;  %v3295_v24 = vpop.f32.mrf.mxu1  ;;  %v3731_v63 = vld [vmem:[%s5350_s3 + $0x90] sm:$0xff] }
0x15a0   :  { %3362 = vrot.lane.b32.xlu2 %v3295_v24, %s4118_s19 }
0x15e9   :  { %v3353_v58 = vpop.permute.xlu0 %3352 }
0x15ea   :  { %v3374_v17 = vsel %vm106_vm1, %v3165_v35, %v3353_v58  ;;  %v3733_v35 = vld [vmem:[%s5350_s3 + $0xa0] sm:$0xff] }
0x15eb   :  { %3534 = vmatpush.msrb.mxu2 %v3733_v35 }
0x15f1   :  { %v3369_v5 = vpop.permute.xlu0 %3368 }
0x15f2   :  { %v3361_v27 = vpop.permute.xlu2 %3360 }
0x15f3   :  { %v3376_v43 = vsel %vm755_vm7, %v3374_v17, %v3361_v27 }
0x15f4   :  { %v3378_v57 = vsel %vm758_vm8, %v3376_v43, %v3369_v5 }
0x15f5   :  { %3793 = vmatmul.msk.f32.vlgmr.msra.gmra.mxu0 %vm60_vm0, %v3378_v57 }
0x15fa   :  { %v3363_v28 = vpop.permute.xlu2 %3362 }
0x1608   :  { %v3355_v59 = vpop.permute.xlu1 %3354 }
0x1609   :  { %v3375_v16 = vsel %vm106_vm1, %v3191_v60, %v3355_v59  ;;  %v3732_v60 = vld [vmem:[%s5350_s3 + $0x98] sm:$0xff] }
0x160a   :  { %v3377_v14 = vsel %vm755_vm7, %v3375_v16, %v3363_v28  ;;  %3535 = vmatpush.msrb.mxu2 %v3732_v60  ;;  %v3730_v28 = vld [vmem:[%s5350_s3 + $0x88] sm:$0xff] }
0x160c   :  { %3536 = vmatpush.msrb.mxu2 %v3731_v63 }
0x160e   :  { %3537 = vmatpush.msrb.mxu2 %v3730_v28 }
0x1610   :  { %v3393_v51 = vpop.permute.xlu1 %3392 }
0x1611   :  { %v3371_v61 = vpop.permute.xlu0 %3370 }
0x1612   :  { %v3379_v42 = vsel %vm758_vm8, %v3377_v14, %v3371_v61  ;;  %v3729_v61 = vld [vmem:[%s5350_s3 + $0x80] sm:$0xff] }
0x1613   :  { %3794 = vmatmul.msk.f32.gmra.mxu0 %vm60_vm0, %v3379_v42  ;;  %3538 = vmatpush.msrb.mxu2 %v3729_v61 }
0x1672   :  { %v3418_v29 = vpop.f32.mrf.mxu0 }
0x1673   :  { %v3419_v47 = vadd.f32 %v3418_v29, %v3393_v51 }
0x1675   :  { %v3424_v30 = vadd.f32 %v3419_v47, %v5010_v62 }
0x1677   :  { %v3426_v44 = vsel %vm60_vm0, %v3424_v30, 0.0 }
0x1678   :  { %3427 = vadd.xlane.f32.xlu2 %v3426_v44 }
0x1690   :  { %v3421_v50 = vpop.f32.mrf.mxu0 }
0x1691   :  { %v3422_v36 = vadd.f32 %v3421_v50, %v3393_v51  ;;  %v3516_v50 = vperm.slane %v5274_v56, 4 }
0x1693   :  { %v3425_v15 = vadd.f32 %v3422_v36, %v5023_v26 }
0x1695   :  { %v3429_v12 = vsel %vm60_vm0, %v3425_v15, 0.0 }
0x1696   :  { %3430 = vadd.xlane.f32.xlu0 %v3429_v12 }
0x16aa   :  { %3475 = vrot.lane.b32.xlu0 %v4999_v19, %s4117_s18 }
0x16eb   :  { %v3428_v32 = vpop.xlane.xlu2 %3427 }
0x16ec   :  { %v3432_v33 = vmul.f32 %v3428_v32, %v4415_v7 }
0x16ee   :  { %v3434_v9 = vsub.f32 %v3424_v30, %v3432_v33 }
0x16f0   :  { %v3436_v31 = vmul.f32 %v3434_v9, %v3434_v9 }
0x16f2   :  { %v3438_v62 = vsel %vm60_vm0, %v3436_v31, 0.0 }
0x16f3   :  { %3439 = vadd.xlane.f32.xlu1 %v3438_v62 }
0x1709   :  { %v3431_v1 = vpop.xlane.xlu0 %3430 }
0x170a   :  { %v3433_v55 = vmul.f32 %v3431_v1, %v4415_v7 }
0x170c   :  { %v5251_v53 = vsub.f32 %v3425_v15, %v3433_v55  ;;  %3482 = vrot.lane.b32.xlu1 %v5277_v21, %s4116_s17 }
0x170e   :  { %v3437_v26 = vmul.f32 %v5251_v53, %v5251_v53 }
0x1710   :  { %v3441_v41 = vsel %vm60_vm0, %v3437_v26, 0.0 }
0x1711   :  { %3442 = vadd.xlane.f32.xlu2 %v3441_v41 }
0x171c   :  { %v3476_v39 = vpop.permute.xlu0 %3475 }
0x1729   :  { %3470 = vrot.lane.b32.xlu2 %v4999_v19, %s4116_s17 }
0x1766   :  { %v3440_v13 = vpop.xlane.xlu1 %3439 }
0x1767   :  { %v3444_v6 = vmul.f32 %v3440_v13, %v4415_v7 }
0x1769   :  { %v3446_v8 = vadd.f32 1e-05, %v3444_v6 }
0x176b   :  { %4075 = vrsqrt.f32 %v3446_v8  ;;  %vm3454_vm8 = vweird.f32 %v3446_v8 }
0x1771   :  { %v4076_v19 = vpop.eup %4075 }
0x1772   :  { %v3449_v40 = vmul.f32 %v4076_v19, %v3446_v8  ;;  %vm3455_vm1 = vweird.f32 %v4076_v19 }
0x1773   :  { %vm3456_vm3 = vmor %vm3454_vm8, %vm3455_vm1 }
0x1774   :  { %v3450_v11 = vmul.f32 %v4076_v19, %v3449_v40  ;;  %v3599_v40 = vld [vmem:[%s5352_s5] sm:$0xff] }
0x1776   :  { %v3451_v2 = vmul.f32 0.5, %v3450_v11 }
0x1778   :  { %v3452_v54 = vsub.f32 1.5, %v3451_v2 }
0x177a   :  { %v3453_v22 = vmul.f32 %v4076_v19, %v3452_v54 }
0x177c   :  { %v3457_v4 = vsel %vm3456_vm3, %v4076_v19, %v3453_v22  ;;  %v3601_v19 = vld [vmem:[%s5352_s5 + $0x10] sm:$0xff] }
0x177d   :  { %v3468_v24 = vmul.f32 %v3457_v4, %v3434_v9  ;;  %3624 = vmatpush.msra.mxu3 %v3601_v19 }
0x177e   :  { %v3483_v14 = vpop.permute.xlu1 %3482 }
0x177f   :  { %3625 = vmatpush.msra.mxu3 %v3600_v38 }
0x1781   :  { %3626 = vmatpush.msra.mxu3 %v3599_v40 }
0x1784   :  { %v3443_v48 = vpop.xlane.xlu2 %3442 }
0x1785   :  { %v3445_v3 = vmul.f32 %v3443_v48, %v4415_v7 }
0x1787   :  { %v3447_v20 = vadd.f32 1e-05, %v3445_v3 }
0x1789   :  { %4077 = vrsqrt.f32 %v3447_v20  ;;  %vm3464_vm6 = vweird.f32 %v3447_v20 }
0x178c   :  { %v3471_v46 = vpop.permute.xlu2 %3470 }
0x178d   :  { %v3473_v23 = vmul.f32 %v3471_v46, %v3468_v24 }
0x178f   :  { %v4078_v10 = vpop.eup %4077  ;;  %v3478_v25 = vadd.f32 %v3476_v39, %v3473_v23 }
0x1790   :  { %v3459_v52 = vmul.f32 %v4078_v10, %v3447_v20  ;;  %vm3465_vm5 = vweird.f32 %v4078_v10 }
0x1791   :  { %3795 = vmatmul.msk.f32.vlgmr.msra.gmra.mxu1 %vm60_vm0, %v3478_v25  ;;  %vm3466_vm9 = vmor %vm3464_vm6, %vm3465_vm5 }
0x1792   :  { %v3460_v58 = vmul.f32 %v4078_v10, %v3459_v52 }
0x1794   :  { %v3461_v17 = vmul.f32 0.5, %v3460_v58 }
0x1796   :  { %v3462_v27 = vsub.f32 1.5, %v3461_v17 }
0x1798   :  { %v3463_v5 = vmul.f32 %v4078_v10, %v3462_v27 }
0x179a   :  { %v3467_v43 = vsel %vm3466_vm9, %v4078_v10, %v3463_v5 }
0x179b   :  { %v3469_v57 = vmul.f32 %v3467_v43, %v5251_v53  ;;  %v3603_v43 = vld [vmem:[%s5352_s5 + $0x20] sm:$0xff] }
0x179d   :  { %v3474_v59 = vmul.f32 %v3471_v46, %v3469_v57  ;;  %v3604_v57 = vperm.slane %v3603_v43, 0 }
0x179f   :  { %v3479_v16 = vadd.f32 %v3476_v39, %v3474_v59 }
0x17a1   :  { %3796 = vmatmul.msk.f32.gmra.mxu1 %vm60_vm0, %v3479_v16 }
0x180e   :  { %v3508_v42 = vpop.f32.mrf.mxu1 }
0x180f   :  { %v3509_v51 = vadd.f32 %v3508_v42, %v3483_v14 }
0x1811   :  { %v3514_v29 = vmax.f32 %v3509_v51, 0.0 }
0x1813   :  { %3797 = vmatmul.msk.f32.vlgmr.msrb.gmra.mxu2 %vm1740_vm4, %v3514_v29 }
0x181e   :  { %v3511_v47 = vpop.f32.mrf.mxu1 }
0x181f   :  { %v3512_v30 = vadd.f32 %v3511_v47, %v3483_v14 }
0x1821   :  { %v3515_v44 = vmax.f32 %v3512_v30, 0.0 }
0x1823   :  { %3798 = vmatmul.msk.f32.gmra.mxu2 %vm1740_vm4, %v3515_v44 }
0x1896   :  { %v3540_v36 = vpop.f32.mrf.mxu2 }
0x1897   :  { %v3541_v15 = vadd.f32 %v3540_v36, %v3516_v50 }
0x1899   :  { %v3546_v12 = vadd.f32 %v3541_v15, %v3478_v25 }
0x189b   :  { %v3548_v32 = vsel %vm60_vm0, %v3546_v12, 0.0 }
0x189c   :  { %3549 = vadd.xlane.f32.xlu0 %v3548_v32 }
0x18a6   :  { %v3543_v33 = vpop.f32.mrf.mxu2 }
0x18a7   :  { %v3544_v9 = vadd.f32 %v3543_v33, %v3516_v50 }
0x18a9   :  { %v3547_v31 = vadd.f32 %v3544_v9, %v3479_v16 }
0x18ab   :  { %v3551_v62 = vsel %vm60_vm0, %v3547_v31, 0.0 }
0x18ac   :  { %3552 = vadd.xlane.f32.xlu2 %v3551_v62 }
0x18c4   :  { %3594 = vrot.lane.b32.xlu2 %v5277_v21, %s4114_s16 }
0x190f   :  { %v3550_v1 = vpop.xlane.xlu0 %3549 }
0x1910   :  { %v3554_v55 = vmul.f32 %v3550_v1, %v4415_v7 }
0x1912   :  { %v3556_v53 = vsub.f32 %v3546_v12, %v3554_v55 }
0x1914   :  { %v3558_v26 = vmul.f32 %v3556_v53, %v3556_v53 }
0x1916   :  { %v3560_v41 = vsel %vm60_vm0, %v3558_v26, 0.0 }
0x1917   :  { %3561 = vadd.xlane.f32.xlu1 %v3560_v41 }
0x191f   :  { %v3553_v13 = vpop.xlane.xlu2 %3552 }
0x1920   :  { %v3555_v6 = vmul.f32 %v3553_v13, %v4415_v7 }
0x1922   :  { %v3557_v8 = vsub.f32 %v3547_v31, %v3555_v6 }
0x1924   :  { %v3559_v34 = vmul.f32 %v3557_v8, %v3557_v8 }
0x1926   :  { %v3563_v45 = vsel %vm60_vm0, %v3559_v34, 0.0 }
0x1927   :  { %3564 = vadd.xlane.f32.xlu0 %v3563_v45  ;;  %v3595_v63 = vpop.permute.xlu2 %3594 }
0x198a   :  { %v3562_v11 = vpop.xlane.xlu1 %3561 }
0x198b   :  { %v3566_v2 = vmul.f32 %v3562_v11, %v4415_v7 }
0x198d   :  { %v3568_v56 = vadd.f32 1e-05, %v3566_v2 }
0x198f   :  { %4079 = vrsqrt.f32 %v3568_v56  ;;  %vm3576_vm10 = vweird.f32 %v3568_v56 }
0x1995   :  { %v4080_v54 = vpop.eup %4079 }
0x1996   :  { %v3571_v49 = vmul.f32 %v4080_v54, %v3568_v56  ;;  %vm3577_vm4 = vweird.f32 %v4080_v54 }
0x1997   :  { %vm3578_vm11 = vmor %vm3576_vm10, %vm3577_vm4 }
0x1998   :  { %v3572_v0 = vmul.f32 %v4080_v54, %v3571_v49 }
0x199a   :  { %v3573_v18 = vmul.f32 0.5, %v3572_v0  ;;  %v3565_v48 = vpop.xlane.xlu0 %3564 }
0x199b   :  { %v3567_v22 = vmul.f32 %v3565_v48, %v4415_v7 }
0x199c   :  { %v3574_v3 = vsub.f32 1.5, %v3573_v18 }
0x199d   :  { %v3569_v35 = vadd.f32 1e-05, %v3567_v22 }
0x199e   :  { %v3575_v20 = vmul.f32 %v4080_v54, %v3574_v3 }
0x199f   :  { %4081 = vrsqrt.f32 %v3569_v35  ;;  %vm3586_vm13 = vweird.f32 %v3569_v35 }
0x19a0   :  { %v3579_v60 = vsel %vm3578_vm11, %v4080_v54, %v3575_v20 }
0x19a1   :  { %v3590_v4 = vmul.f32 %v3579_v60, %v3556_v53 }
0x19a3   :  { %v3592_v24 = vmul.f32 %v3590_v4, %v5277_v21 }
0x19a5   :  { %v4082_v46 = vpop.eup %4081  ;;  %v3597_v39 = vadd.f32 %v3595_v63, %v3592_v24 }
0x19a6   :  { %v3581_v23 = vmul.f32 %v4082_v46, %v3569_v35  ;;  %vm3587_vm12 = vweird.f32 %v4082_v46 }
0x19a7   :  { %3799 = vmatmul.msk.f32.vlgmr.msra.gmra.mxu3 %vm60_vm0, %v3597_v39  ;;  %vm3588_vm14 = vmor %vm3586_vm13, %vm3587_vm12 }
0x19a8   :  { %v3582_v10 = vmul.f32 %v4082_v46, %v3581_v23 }
0x19aa   :  { %v3583_v25 = vmul.f32 0.5, %v3582_v10 }
0x19ac   :  { %v3584_v7 = vsub.f32 1.5, %v3583_v25 }
0x19ae   :  { %v3585_v52 = vmul.f32 %v4082_v46, %v3584_v7 }
0x19b0   :  { %v3589_v58 = vsel %vm3588_vm14, %v4082_v46, %v3585_v52 }
0x19b1   :  { %v3591_v17 = vmul.f32 %v3589_v58, %v3557_v8 }
0x19b3   :  { %v3593_v27 = vmul.f32 %v3591_v17, %v5277_v21 }
0x19b5   :  { %v3598_v5 = vadd.f32 %v3595_v63, %v3593_v27 }
0x19b7   :  { %3800 = vmatmul.msk.f32.gmra.mxu3 %vm60_vm0, %v3598_v5 }
0x1a2a   :  { %v3628_v59 = vpop.f32.mrf.mxu3 }
0x1a2b   :  { %v3629_v16 = vadd.f32 %v3628_v59, %v3604_v57 }
0x1a2d   :  { %3634 = vst.msk [vmem:[#allocation2] sm:$0xff] %vm755_vm7, %v3629_v16 }
0x1a3a   :  { %v3631_v28 = vpop.f32.mrf.mxu3 }
0x1a3b   :  { %v3632_v21 = vadd.f32 %v3631_v28, %v3604_v57 }
0x1a3d   :  { %3635 = vst.msk [vmem:[#allocation2 + $0x8] sm:$0xff] %vm755_vm7, %v3632_v21 }
0x1a3e   :  { %3648 = dma.vmem_to_hbm [thread:$0]  %s3641_s28, 256, %s3643_s26, [#allocation3], %s4123_s29, %s4123_s29, %s4119_s20  }
0x1a3f   :  { %4109 = dma.done.wait [#allocation3], 256  }
0x1a40   :  { %4110 = vsyncadd [#allocation3], 4294967040 }
0x1a41   :  { %3653 = vsyncpa [#allocation3], 1 }

</bundles_post_ra>
